<compile_context>
chip_gen: v7x
topology: tpu7x:2x2x1
jax: 0.10.0
libtpu: 0.0.40
codegen_flags: <defaults>
</compile_context>

<pallas_src>
import numpy as np
import jax
import jax.numpy as jnp
from jax.experimental import pallas as pl
from jax.experimental.pallas import tpu as pltpu

MAX_TIME_DELAY = 5e-9  # matches `max_time_delay = torch.tensor(5e-09)`

_CP_PAR = pltpu.CompilerParams(
    dimension_semantics=("parallel",), vmem_limit_bytes=32 * 1024 * 1024)

# order of the stacked per-mixer-block parameters fed to the trunk kernel
_MIX_KEYS = ('ln_t_g', 'ln_t_b', 'tok_w1t', 'tok_b1c', 'tok_w2t', 'tok_b2c',
             'ln_c_g', 'ln_c_b', 'ch_w1', 'ch_b1', 'ch_w2', 'ch_b2')


# ----------------------------------------------------------------------------
# In-kernel helpers (f32)
# ----------------------------------------------------------------------------
def _erf_f32(x):
    # Abramowitz & Stegun 7.1.26 rational approximation, |err| <= 1.5e-7, i.e.
    # at f32 round-off numerically equivalent to torch nn.GELU()'s exact erf.
    p = 0.3275911
    a1, a2, a3, a4, a5 = (0.254829592, -0.284496736, 1.421413741,
                          -1.453152027, 1.061405429)
    z = jnp.abs(x)
    t = 1.0 / (1.0 + p * z)
    poly = ((((a5 * t + a4) * t + a3) * t + a2) * t + a1) * t
    r = 1.0 - poly * jnp.exp(-z * z)
    return jnp.where(x < 0.0, -r, r)


def _gelu(x):
    return 0.5 * x * (1.0 + _erf_f32(x * np.float32(1.0 / np.sqrt(2.0))))


def _ln(x, g, b, eps=1e-5):
    mu = jnp.mean(x, axis=-1, keepdims=True)
    var = jnp.mean((x - mu) ** 2, axis=-1, keepdims=True)
    return (x - mu) * jax.lax.rsqrt(var + eps) * g + b


# ----------------------------------------------------------------------------
# Pallas kernels
# ----------------------------------------------------------------------------
def _mixer_trunk_kernel(x_ref,
                        ln_t_g, ln_t_b, tw1t, tb1c, tw2t, tb2c,
                        ln_c_g, ln_c_b, cw1, cb1, cw2, cb2,
                        ln_g, ln_b, head_w, head_b, heads_w, heads_b,
                        o_ref):
    """Whole MLPMixer (depth blocks) + head + fused x_init projections.

    Processes one batch element: x tile is (Nc, d_model).  Token-mix weights
    are pre-transposed so both token-mix matmuls are standard jnp.dot's on the
    (Nc, d_model) orientation — no in-kernel transposes needed.
    """
    depth = ln_t_g.shape[0]
    x = x_ref[0]                                             # (Nc, d_model)
    for i in range(depth):                                   # static unroll
        # ---- token mix:  x += rearrange(FF(rearrange(LN(x)))) ----
        y = _ln(x, ln_t_g[i], ln_t_b[i])
        h = _gelu(jnp.dot(tw1t[i], y, preferred_element_type=jnp.float32)
                  + tb1c[i])                                 # (token_dim, d_model)
        x = x + (jnp.dot(tw2t[i], h, preferred_element_type=jnp.float32)
                 + tb2c[i])                                  # (Nc, d_model)
        # ---- channel mix:  x += FF(LN(x)) ----
        y = _ln(x, ln_c_g[i], ln_c_b[i])
        h = _gelu(jnp.dot(y, cw1[i], preferred_element_type=jnp.float32)
                  + cb1[i])                                  # (Nc, channel_dim)
        x = x + (jnp.dot(h, cw2[i], preferred_element_type=jnp.float32)
                 + cb2[i])
    # ---- MLPMixer head, then fused [linear_H | BS_RF2 | BS_T | BS_BB] ----
    y = _ln(x, ln_g[...], ln_b[...])
    x_init = (jnp.dot(y, head_w[...], preferred_element_type=jnp.float32)
              + head_b[...])                                 # (Nc, N_ant)
    o_ref[0] = (jnp.dot(x_init, heads_w[...], preferred_element_type=jnp.float32)
                + heads_b[...])                              # (Nc, 48)


def _dense_ln_kernel(x_ref, w_ref, b_ref, g_ref, be_ref, o_ref):
    # dense -> LayerNorm, fused
    y = (jnp.dot(x_ref[...], w_ref[...], preferred_element_type=jnp.float32)
         + b_ref[...])
    o_ref[...] = _ln(y, g_ref[...], be_ref[...])


def _chain_kernel(t_ref, g_ref, u_ref, f_ref, o_ref):
    # Packed-real complex chain:  out = (T @ G + U) @ F
    a = jnp.einsum('gik,gkj->gij', t_ref[...], g_ref[...],
                   preferred_element_type=jnp.float32) + u_ref[...]
    o_ref[...] = jnp.einsum('gik,gkj->gij', a, f_ref[...],
                            preferred_element_type=jnp.float32)


# ----------------------------------------------------------------------------
# Pallas wrappers
# ----------------------------------------------------------------------------
def mixer_trunk_pallas(x, params):
    """x: (B, Nc, d_model) -> heads: (B, Nc, 32+M+RF*T+2*RF*Nr), one pallas_call."""
    B, Nc, D = x.shape
    mix = params['mixer']
    Cout = params['heads_w'].shape[1]

    weights = [mix[k] for k in _MIX_KEYS] + [
        params['ln_g'], params['ln_b'], params['head_w'], params['head_b'],
        params['heads_w'], params['heads_b']]

    def full_spec(a):
        nd = a.ndim
        return pl.BlockSpec(a.shape, lambda b, _nd=nd: (0,) * _nd)

    return pl.pallas_call(
        _mixer_trunk_kernel,
        grid=(B,),
        in_specs=[pl.BlockSpec((1, Nc, D), lambda b: (b, 0, 0))]
                 + [full_spec(w) for w in weights],
        out_specs=pl.BlockSpec((1, Nc, Cout), lambda b: (b, 0, 0)),
        out_shape=jax.ShapeDtypeStruct((B, Nc, Cout), jnp.float32),
        compiler_params=_CP_PAR,
    )(x, *weights)


def pallas_dense_ln(x2, w, b2, g, be):
    """LayerNorm(x2 @ w + b2) ; x2: (R, Cin), w: (Cin, Cout), rest (1, Cout)."""
    R, Cin = x2.shape
    Cout = w.shape[1]
    return pl.pallas_call(
        _dense_ln_kernel,
        grid=(1,),
        in_specs=[pl.BlockSpec((R, Cin), lambda i: (0, 0)),
                  pl.BlockSpec((Cin, Cout), lambda i: (0, 0)),
                  pl.BlockSpec((1, Cout), lambda i: (0, 0)),
                  pl.BlockSpec((1, Cout), lambda i: (0, 0)),
                  pl.BlockSpec((1, Cout), lambda i: (0, 0))],
        out_specs=pl.BlockSpec((R, Cout), lambda i: (0, 0)),
        out_shape=jax.ShapeDtypeStruct((R, Cout), jnp.float32),
        compiler_params=_CP_PAR,
    )(x2, w, b2, g, be)


def encoder_chain_pallas(H_RU_k, H_BR, H_BU_k, Phi_enc, F_enc):
    """a[l,b,nc] = ((H_RU[b,nc] @ diag(Phi[l])) @ H_BR[b,nc] + H_BU[b,nc]) @ F[l,nc].

    Packed-real complex arithmetic; all (l,nc) of one batch element handled in a
    single grid step (grid=(B,), 'parallel' so v7x can split over TensorCores).
    """
    B, Nc, Nr, N_ant = H_RU_k.shape
    M_ant = H_BR.shape[-1]
    L = Phi_enc.shape[0]
    RF = F_enc.shape[-1]
    G = B * L * Nc
    blk_rows = L * Nc                         # per-batch leading block

    # T[b,l,nc] = H_RU[b,nc] * phi[l]   (RIS diagonal == column scaling)
    t = H_RU_k[:, None] * Phi_enc[None, :, None, None, :]            # (B,L,Nc,Nr,N)
    t_pack = jnp.concatenate([jnp.real(t), jnp.imag(t)], axis=-1)    # (B,L,Nc,Nr,2N)
    t_pack = t_pack.reshape(G, Nr, 2 * N_ant)

    hbr_r, hbr_i = jnp.real(H_BR), jnp.imag(H_BR)
    g_blk = jnp.concatenate(
        [jnp.concatenate([hbr_r, hbr_i], axis=-1),
         jnp.concatenate([-hbr_i, hbr_r], axis=-1)], axis=-2)        # (B,Nc,2N,2M)
    g_blk = jnp.broadcast_to(g_blk[:, None],
                             (B, L, Nc, 2 * N_ant, 2 * M_ant)).reshape(
                                 G, 2 * N_ant, 2 * M_ant)

    u_pack = jnp.concatenate([jnp.real(H_BU_k), jnp.imag(H_BU_k)], axis=-1)
    u_pack = jnp.broadcast_to(u_pack[:, None],
                              (B, L, Nc, Nr, 2 * M_ant)).reshape(G, Nr, 2 * M_ant)

    f_r, f_i = jnp.real(F_enc), jnp.imag(F_enc)                      # (L,Nc,M,RF)
    f_blk = jnp.concatenate(
        [jnp.concatenate([f_r, f_i], axis=-1),
         jnp.concatenate([-f_i, f_r], axis=-1)], axis=-2)            # (L,Nc,2M,2RF)
    f_blk = jnp.broadcast_to(f_blk[None],
                             (B, L, Nc, 2 * M_ant, 2 * RF)).reshape(
                                 G, 2 * M_ant, 2 * RF)

    out = pl.pallas_call(
        _chain_kernel,
        grid=(B,),
        in_specs=[
            pl.BlockSpec((blk_rows, Nr, 2 * N_ant), lambda b: (b, 0, 0)),
            pl.BlockSpec((blk_rows, 2 * N_ant, 2 * M_ant), lambda b: (b, 0, 0)),
            pl.BlockSpec((blk_rows, Nr, 2 * M_ant), lambda b: (b, 0, 0)),
            pl.BlockSpec((blk_rows, 2 * M_ant, 2 * RF), lambda b: (b, 0, 0)),
        ],
        out_specs=pl.BlockSpec((blk_rows, Nr, 2 * RF), lambda b: (b, 0, 0)),
        out_shape=jax.ShapeDtypeStruct((G, Nr, 2 * RF), jnp.float32),
        compiler_params=_CP_PAR,
    )(t_pack, g_blk, u_pack, f_blk)

    out = out.reshape(B, L, Nc, Nr, 2 * RF)
    out = jnp.swapaxes(out, 0, 1)                                    # (L,B,Nc,Nr,2RF)
    return out[..., :RF] + 1j * out[..., RF:]                        # complex64


# ----------------------------------------------------------------------------
# Plain-JAX glue (tiny layernorms / shape plumbing — fused by jit)
# ----------------------------------------------------------------------------
def layer_norm(x, gamma, beta, eps=1e-5):
    mu = jnp.mean(x, axis=-1, keepdims=True)
    var = jnp.mean((x - mu) ** 2, axis=-1, keepdims=True)
    return (x - mu) * jax.lax.rsqrt(var + eps) * gamma + beta


def compute_fm(cfg):
    Nc = cfg['Nc']
    n = jnp.arange(Nc, dtype=jnp.float32) + 1.0
    nn_ = -(Nc + 1) / 2.0
    deta = cfg['B'] / Nc
    return (nn_ + n) * deta + cfg['fc']


# ----------------------------------------------------------------------------
# Parameter initialization (deterministic, synthetic, kernel-ready layout)
# ----------------------------------------------------------------------------
def init_params(key, cfg):
    Nc, K, Nr = cfg['Nc'], cfg['K'], cfg['Nr']
    RF, BS_TDDs, L = cfg['RF_chain'], cfg['BS_TDDs'], cfg['UL']
    M_ant = cfg['M1'] * cfg['M2']
    N_ant = cfg['N1'] * cfg['N2']
    d_model = K * RF * Nr * 2 * L

    keys = iter(jax.random.split(key, 64))

    def lin(cin, cout):
        k1, k2 = jax.random.split(next(keys))
        w = jax.random.normal(k1, (cin, cout), jnp.float32) / np.sqrt(cin)
        b = 0.01 * jax.random.normal(k2, (1, cout), jnp.float32)
        return w, b

    def ln(dim):
        return jnp.ones((1, dim), jnp.float32), jnp.zeros((1, dim), jnp.float32)

    p = {}
    # ---- encoder (UL_CE) learnable pilots ----
    p['S_analog'] = jax.random.normal(next(keys), (L, Nc, M_ant, RF), jnp.float32)
    p['S_analog_TDD'] = jax.random.normal(next(keys), (L, Nc, BS_TDDs, RF), jnp.float32)
    p['Phase1'] = jax.random.normal(next(keys), (L, N_ant), jnp.float32)

    # ---- decoder (DL_BF_TTD): MLPMixer projection2, depth=2, kernel-ready ----
    depth, token_dim, channel_dim = 2, 64, 64
    acc = {k: [] for k in _MIX_KEYS}
    for _ in range(depth):
        g, b = ln(d_model); acc['ln_t_g'].append(g); acc['ln_t_b'].append(b)
        w1, b1 = lin(Nc, token_dim)                     # token-mix FF, stored transposed
        acc['tok_w1t'].append(w1.T)                     # (token_dim, Nc)
        acc['tok_b1c'].append(b1.reshape(token_dim, 1))
        w2, b2 = lin(token_dim, Nc)
        acc['tok_w2t'].append(w2.T)                     # (Nc, token_dim)
        acc['tok_b2c'].append(b2.reshape(Nc, 1))
        g, b = ln(d_model); acc['ln_c_g'].append(g); acc['ln_c_b'].append(b)
        w1, b1 = lin(d_model, channel_dim)
        acc['ch_w1'].append(w1); acc['ch_b1'].append(b1)
        w2, b2 = lin(channel_dim, d_model)
        acc['ch_w2'].append(w2); acc['ch_b2'].append(b2)
    p['mixer'] = {k: jnp.stack(v) for k, v in acc.items()}
    p['ln_g'], p['ln_b'] = ln(d_model)
    p['head_w'], p['head_b'] = lin(d_model, N_ant)

    # ---- four x_init head projections fused into ONE dense ----
    # slice order: [linear_H(32) | linear_BS_RF2(M) | linear_BS_T(RF*T) | linear_BS_BB(2*RF*Nr)]
    hw, hb = lin(N_ant, 32)
    rf2w, rf2b = lin(N_ant, M_ant)
    tw, tb = lin(N_ant, RF * BS_TDDs)
    bbw, bbb = lin(N_ant, 2 * RF * Nr)
    p['heads_w'] = jnp.concatenate([hw, rf2w, tw, bbw], axis=1)
    p['heads_b'] = jnp.concatenate([hb, rf2b, tb, bbb], axis=1)

    p['RIS_w'], p['RIS_b'] = lin(Nc * 32, N_ant)
    p['LN_RIS_g'], p['LN_RIS_b'] = ln(N_ant)
    p['RF1_w'], p['RF1_b'] = lin(Nc, RF)
    p['LN_RF1_g'], p['LN_RF1_b'] = ln(RF)
    p['LN_T_g'], p['LN_T_b'] = ln(RF * BS_TDDs)
    p['LN_BB_g'], p['LN_BB_b'] = ln(2 * RF * Nr)
    return p


# ----------------------------------------------------------------------------
# Encoder: UL_CE.forward
# ----------------------------------------------------------------------------
def ul_ce_forward(params, cfg, H_BR, H_RU, H_BU, noise_key):
    Nc, Nr, K, L = cfg['Nc'], cfg['Nr'], cfg['K'], cfg['UL']
    RF, BS_TDDs = cfg['RF_chain'], cfg['BS_TDDs']
    M_ant = cfg['M1'] * cfg['M2']
    N_ant = cfg['N1'] * cfg['N2']
    fm = compute_fm(cfg)
    subarray = N_ant // Nc

    # deterministic SNR draw (train_snr holds a single value)
    upsnr = cfg['train_snr'][0]
    snr_linear = 10.0 ** (-upsnr / 10.0)

    # per-pilot RIS phase profile (same diagonal Theta for every subcarrier)
    scale = jnp.repeat(2.0 * jnp.pi * fm / cfg['fc'], subarray)       # (N_ant,)
    Phi_enc = jnp.exp(1j * scale[None, :] * params['Phase1'])         # (L, N_ant)

    # per-(pilot, subcarrier) BS analog + TTD precoder
    S_analog = jnp.exp(1j * params['S_analog']) / np.sqrt(M_ant)      # (L,Nc,M,RF)
    b_del = MAX_TIME_DELAY * jax.nn.sigmoid(params['S_analog_TDD'])   # (L,Nc,T,RF)
    delay = jnp.exp(1j * 2.0 * jnp.pi * fm[None, :, None, None] * b_del)
    F_enc = S_analog * jnp.repeat(delay, M_ant // BS_TDDs, axis=2)    # (L,Nc,M,RF)

    H_RU_k = H_RU[:, K - 1]       # (B, Nc, Nr, N_ant)
    H_BU_k = H_BU[:, K - 1]       # (B, Nc, Nr, M_ant)

    # hot path: complex matmul chain in a single Pallas kernel
    a = encoder_chain_pallas(H_RU_k, H_BR, H_BU_k, Phi_enc, F_enc)    # (L,B,Nc,Nr,RF)

    Power = jnp.sum(jnp.abs(a) ** 2, axis=(3, 4), keepdims=True)      # (L,B,Nc,1,1)
    kr, ki = jax.random.split(noise_key)
    n_r = jax.random.normal(kr, a.shape, jnp.float32)
    n_i = jax.random.normal(ki, a.shape, jnp.float32)
    noise = (n_r + 1j * n_i) * jnp.sqrt(Power * snr_linear / 2.0)
    y = a + noise

    Y = jnp.moveaxis(y, 0, -1)                                        # (B,Nc,Nr,RF,L)
    Y = Y.reshape(Y.shape[0], Nc, K * RF * Nr, L)
    x = jnp.concatenate([jnp.real(Y), jnp.imag(Y)], axis=3)           # (B,Nc,K*RF*Nr,2L)
    # TODO(synk): ParallelPolarizedSelfAttention is not defined in the reference
    # file; pass-through (identity) here.
    return x


# ----------------------------------------------------------------------------
# Decoder: DL_BF_TTD.forward (MLPMixer + heads)
# ----------------------------------------------------------------------------
def dl_bf_ttd_forward(params, cfg, x):
    Nc, Nr, K = cfg['Nc'], cfg['Nr'], cfg['K']
    RF, BS_TDDs, L = cfg['RF_chain'], cfg['BS_TDDs'], cfg['UL']
    M_ant = cfg['M1'] * cfg['M2']
    N_ant = cfg['N1'] * cfg['N2']
    d_model = K * RF * Nr * 2 * L
    fm = compute_fm(cfg)
    subarray = N_ant // Nc
    batch = x.shape[0]

    x = x.reshape(batch, d_model, Nc)
    # TODO(synk): `Block(dim=Nc, mlp_ratio=2, h=..., w=...)` is not defined in the
    # reference file; pass-through (identity) here.
    x = x.reshape(batch, Nc, d_model)

    # whole MLPMixer trunk + fused [H | RF2 | T | BB] projections: ONE pallas_call
    heads = mixer_trunk_pallas(x, params)                             # (B, Nc, 48)
    o0 = 32
    o1 = o0 + M_ant
    o2 = o1 + RF * BS_TDDs
    o3 = o2 + 2 * RF * Nr
    x_R = heads[..., :o0]                                             # (B, Nc, 32)
    RF_phase = heads[..., o0:o1]                                      # (B, Nc, M_ant)
    RF_delay = heads[..., o1:o2]                                      # (B, Nc, RF*T)
    F_BB = heads[..., o2:o3]                                          # (B, Nc, 2*RF*Nr)

    # ---- RIS phases: linear_RIS + LN_RIS fused ----
    out_RIS = x_R.reshape(batch, Nc * 32)
    Phi_phase = pallas_dense_ln(out_RIS, params['RIS_w'], params['RIS_b'],
                                params['LN_RIS_g'], params['LN_RIS_b'])  # (B, N_ant)

    scale = jnp.repeat(2.0 * jnp.pi * fm / cfg['fc'], subarray)
    Phi_T = jnp.exp(1j * scale[None, :] * Phi_phase)                  # (B, N_ant)
    Phi_VIR = Phi_T[:, :, None] * jnp.eye(N_ant, dtype=Phi_T.dtype)   # diag_embed
    # TODO(synk): dense (B,Nc,N_ant,N_ant) Phi_WB kept only because the reference
    # returns it; the information is just the (B,N_ant) diagonal.
    Phi_WB = jnp.broadcast_to(Phi_VIR[:, None], (batch, Nc, N_ant, N_ant))

    # ---- BS analog RF phases: linear_BS_RF1 + LN_BS_RF1 fused ----
    # (flat reshape matches torch .reshape semantics)
    RF_phase = pallas_dense_ln(RF_phase.reshape(batch * M_ant, Nc),
                               params['RF1_w'], params['RF1_b'],
                               params['LN_RF1_g'], params['LN_RF1_b'])   # (B*M, RF)
    F_RF = jnp.exp(1j * RF_phase.reshape(batch, 1, M_ant, RF))

    # ---- BS TTD delays ----
    RF_delay = layer_norm(RF_delay, params['LN_T_g'], params['LN_T_b'])
    RF_delay = RF_delay.reshape(batch, Nc, BS_TDDs, RF)
    b_del = MAX_TIME_DELAY * jax.nn.sigmoid(RF_delay)
    delay = jnp.exp(1j * 2.0 * jnp.pi * fm[None, :, None, None] * b_del)
    F_RF_TTDs = F_RF * jnp.repeat(delay, M_ant // BS_TDDs, axis=2)    # (B,Nc,M,RF)

    # ---- digital precoder + power normalization ----
    F_BB = layer_norm(F_BB, params['LN_BB_g'], params['LN_BB_b'])
    F_BB = F_BB.reshape(batch, Nc, RF, 2 * Nr)
    F_BB_SDMA = F_BB[..., :Nr] + 1j * F_BB[..., Nr:2 * Nr]            # (B,Nc,RF,Nr)
    F_SDMA = jnp.matmul(F_RF_TTDs, F_BB_SDMA)                         # (B,Nc,M,Nr)
    Power = jnp.sum(jnp.abs(F_SDMA) ** 2, axis=(2, 3)).reshape(batch, Nc, 1, 1)
    F_BB_SDMA = F_BB_SDMA / jnp.sqrt(Power) * np.sqrt(Nr)

    return Phi_WB, F_RF_TTDs, F_BB_SDMA, Phi_phase


# ----------------------------------------------------------------------------
# Full model: NFWB_RIS.forward
# ----------------------------------------------------------------------------
def nfwb_ris_forward(params, cfg, H_BR, H_RU1, H_BU, noise_key):
    out = ul_ce_forward(params, cfg, H_BR, H_RU1, H_BU, noise_key)
    return dl_bf_ttd_forward(params, cfg, out)


# ----------------------------------------------------------------------------
if __name__ == "__main__":
    cfg = dict(fc=28e9, B=1e9, Nc=4, M1=2, M2=2, N1=4, N2=4, K=1, Nr=2,
               RF_chain=2, BS_TDDs=2, RIS_TDDs=4, UL=2, batch=2,
               train_snr=[10.0])
    batch = cfg['batch']
    Nc, K, Nr = cfg['Nc'], cfg['K'], cfg['Nr']
    M_ant = cfg['M1'] * cfg['M2']
    N_ant = cfg['N1'] * cfg['N2']

    key = jax.random.PRNGKey(0)
    kp, kh, kn = jax.random.split(key, 3)
    params = init_params(kp, cfg)

    k1, k2, k3, k4, k5, k6 = jax.random.split(kh, 6)

    def crandn(ka, kb, shape):
        return ((jax.random.normal(ka, shape, jnp.float32)
                 + 1j * jax.random.normal(kb, shape, jnp.float32))
                / np.sqrt(2.0)).astype(jnp.complex64)

    H_BR = crandn(k1, k2, (batch, Nc, N_ant, M_ant))          # BS -> RIS channel
    H_RU1 = crandn(k3, k4, (batch, K, Nc, Nr, N_ant))         # RIS -> UE channel
    H_BU = crandn(k5, k6, (batch, K, Nc, Nr, M_ant))          # BS -> UE channel

    fwd = jax.jit(lambda prm, hbr, hru, hbu, nk:
                  nfwb_ris_forward(prm, cfg, hbr, hru, hbu, nk))
    Phi_WB, F_RF_TTDs, F_BB_SDMA, Phi_phase = fwd(params, H_BR, H_RU1, H_BU, kn)
    jax.block_until_ready((Phi_WB, F_RF_TTDs, F_BB_SDMA, Phi_phase))

    assert Phi_WB.shape == (batch, Nc, N_ant, N_ant)
    assert F_RF_TTDs.shape == (batch, Nc, M_ant, cfg['RF_chain'])
    assert F_BB_SDMA.shape == (batch, Nc, cfg['RF_chain'], Nr)
    assert Phi_phase.shape == (batch, N_ant)
    assert jnp.all(jnp.isfinite(jnp.abs(F_BB_SDMA)))
    print("KERNEL_OK")
</pallas_src>

<mosaic_0001>
module attributes {stable_mosaic.version = 11 : i64} {
  func.func @_chain_kernel(%arg0: i32, %arg1: memref<8x2x32xf32, #tpu.memory_space<vmem>>, %arg2: memref<8x32x8xf32, #tpu.memory_space<vmem>>, %arg3: memref<8x2x8xf32, #tpu.memory_space<vmem>>, %arg4: memref<8x8x4xf32, #tpu.memory_space<vmem>>, %arg5: memref<8x2x4xf32, #tpu.memory_space<vmem>>) attributes {dimension_semantics = [#tpu.dimension_semantics<parallel>], iteration_bounds = array<i64: 2>, scalar_prefetch = 0 : i64, scratch_operands = 0 : i64, tpu.core_type = #tpu.core_type<tc>, window_params = [{transform_indices = @transform_0, window_bounds = array<i64: 8, 2, 32>}, {transform_indices = @transform_1, window_bounds = array<i64: 8, 32, 8>}, {transform_indices = @transform_2, window_bounds = array<i64: 8, 2, 8>}, {transform_indices = @transform_3, window_bounds = array<i64: 8, 8, 4>}, {transform_indices = @transform_4, window_bounds = array<i64: 8, 2, 4>}]} {
    %c0 = arith.constant 0 : index
    %c0_0 = arith.constant 0 : index
    %c0_1 = arith.constant 0 : index
    %0 = vector.load %arg1[%c0, %c0_0, %c0_1] : memref<8x2x32xf32, #tpu.memory_space<vmem>>, vector<8x2x32xf32>
    %c0_2 = arith.constant 0 : index
    %c0_3 = arith.constant 0 : index
    %c0_4 = arith.constant 0 : index
    %1 = vector.load %arg2[%c0_2, %c0_3, %c0_4] : memref<8x32x8xf32, #tpu.memory_space<vmem>>, vector<8x32x8xf32>
    "tpu.trace_start"() <{level = 10 : i32, message = "gik,gkj->gij"}> : () -> ()
    %cst = arith.constant dense<0.000000e+00> : vector<8x2x8xf32>
    %2 = tpu.matmul %0, %1, %cst {dimension_numbers = #tpu.dot_dimension_numbers<[2], [1], [1], [2], [0, 0, 0, 1, 1, 2], [0], [0]>} : vector<8x2x32xf32>, vector<8x32x8xf32>, vector<8x2x8xf32> -> vector<8x2x8xf32>
    "tpu.trace_stop"() : () -> ()
    %c0_5 = arith.constant 0 : index
    %c0_6 = arith.constant 0 : index
    %c0_7 = arith.constant 0 : index
    %3 = vector.load %arg3[%c0_5, %c0_6, %c0_7] : memref<8x2x8xf32, #tpu.memory_space<vmem>>, vector<8x2x8xf32>
    %4 = arith.addf %2, %3 : vector<8x2x8xf32>
    %c0_8 = arith.constant 0 : index
    %c0_9 = arith.constant 0 : index
    %c0_10 = arith.constant 0 : index
    %5 = vector.load %arg4[%c0_8, %c0_9, %c0_10] : memref<8x8x4xf32, #tpu.memory_space<vmem>>, vector<8x8x4xf32>
    "tpu.trace_start"() <{level = 10 : i32, message = "gik,gkj->gij"}> : () -> ()
    %cst_11 = arith.constant dense<0.000000e+00> : vector<8x2x4xf32>
    %6 = tpu.matmul %4, %5, %cst_11 {dimension_numbers = #tpu.dot_dimension_numbers<[2], [1], [1], [2], [0, 0, 0, 1, 1, 2], [0], [0]>} : vector<8x2x8xf32>, vector<8x8x4xf32>, vector<8x2x4xf32> -> vector<8x2x4xf32>
    "tpu.trace_stop"() : () -> ()
    %c0_12 = arith.constant 0 : index
    %c0_13 = arith.constant 0 : index
    %c0_14 = arith.constant 0 : index
    %7 = vector.load %arg5[%c0_12, %c0_13, %c0_14] : memref<8x2x4xf32, #tpu.memory_space<vmem>>, vector<8x2x4xf32>
    tpu.vector_store %arg5[%c0_12, %c0_13, %c0_14], %6 {strides = array<i32>} : memref<8x2x4xf32, #tpu.memory_space<vmem>>, vector<8x2x4xf32>,
    return
  }
  func.func @transform_0(%arg0: i32) -> (i32, i32, i32) {
    %c0_i32 = arith.constant 0 : i32
    %c0_i32_0 = arith.constant 0 : i32
    %c0_i32_1 = arith.constant 0 : i32
    return %arg0, %c0_i32, %c0_i32_0 : i32, i32, i32
  }
  func.func @transform_1(%arg0: i32) -> (i32, i32, i32) {
    %c0_i32 = arith.constant 0 : i32
    %c0_i32_0 = arith.constant 0 : i32
    %c0_i32_1 = arith.constant 0 : i32
    return %arg0, %c0_i32, %c0_i32_0 : i32, i32, i32
  }
  func.func @transform_2(%arg0: i32) -> (i32, i32, i32) {
    %c0_i32 = arith.constant 0 : i32
    %c0_i32_0 = arith.constant 0 : i32
    %c0_i32_1 = arith.constant 0 : i32
    return %arg0, %c0_i32, %c0_i32_0 : i32, i32, i32
  }
  func.func @transform_3(%arg0: i32) -> (i32, i32, i32) {
    %c0_i32 = arith.constant 0 : i32
    %c0_i32_0 = arith.constant 0 : i32
    %c0_i32_1 = arith.constant 0 : i32
    return %arg0, %c0_i32, %c0_i32_0 : i32, i32, i32
  }
  func.func @transform_4(%arg0: i32) -> (i32, i32, i32) {
    %c0_i32 = arith.constant 0 : i32
    %c0_i32_0 = arith.constant 0 : i32
    %c0_i32_1 = arith.constant 0 : i32
    return %arg0, %c0_i32, %c0_i32_0 : i32, i32, i32
  }
}

module attributes {stable_mosaic.version = 11 : i64} {
  func.func @_dense_ln_kernel(%arg0: i32, %arg1: memref<2x128xf32, #tpu.memory_space<vmem>>, %arg2: memref<128x16xf32, #tpu.memory_space<vmem>>, %arg3: memref<1x16xf32, #tpu.memory_space<vmem>>, %arg4: memref<1x16xf32, #tpu.memory_space<vmem>>, %arg5: memref<1x16xf32, #tpu.memory_space<vmem>>, %arg6: memref<2x16xf32, #tpu.memory_space<vmem>>) attributes {dimension_semantics = [#tpu.dimension_semantics<parallel>], iteration_bounds = array<i64: 1>, scalar_prefetch = 0 : i64, scratch_operands = 0 : i64, tpu.core_type = #tpu.core_type<tc>, window_params = [{pipeline_mode = #tpu.pipeline_mode<synchronous>, transform_indices = @transform_0, window_bounds = array<i64: 2, 128>}, {pipeline_mode = #tpu.pipeline_mode<synchronous>, transform_indices = @transform_1, window_bounds = array<i64: 128, 16>}, {pipeline_mode = #tpu.pipeline_mode<synchronous>, transform_indices = @transform_2, window_bounds = array<i64: 1, 16>}, {pipeline_mode = #tpu.pipeline_mode<synchronous>, transform_indices = @transform_3, window_bounds = array<i64: 1, 16>}, {pipeline_mode = #tpu.pipeline_mode<synchronous>, transform_indices = @transform_4, window_bounds = array<i64: 1, 16>}, {pipeline_mode = #tpu.pipeline_mode<synchronous>, transform_indices = @transform_5, window_bounds = array<i64: 2, 16>}]} {
    %c0 = arith.constant 0 : index
    %c0_0 = arith.constant 0 : index
    %0 = vector.load %arg1[%c0, %c0_0] : memref<2x128xf32, #tpu.memory_space<vmem>>, vector<2x128xf32>
    %c0_1 = arith.constant 0 : index
    %c0_2 = arith.constant 0 : index
    %1 = vector.load %arg2[%c0_1, %c0_2] : memref<128x16xf32, #tpu.memory_space<vmem>>, vector<128x16xf32>
    %cst = arith.constant dense<0.000000e+00> : vector<2x16xf32>
    %2 = tpu.matmul %0, %1, %cst {dimension_numbers = #tpu.dot_dimension_numbers<[1], [0], [0], [1], [0, 0, 1, 1], [], []>} : vector<2x128xf32>, vector<128x16xf32>, vector<2x16xf32> -> vector<2x16xf32>
    %c0_3 = arith.constant 0 : index
    %c0_4 = arith.constant 0 : index
    %3 = vector.load %arg3[%c0_3, %c0_4] : memref<1x16xf32, #tpu.memory_space<vmem>>, vector<1x16xf32>
    %4 = vector.broadcast %3 : vector<1x16xf32> to vector<2x16xf32>
    %5 = arith.addf %2, %4 : vector<2x16xf32>
    %c0_5 = arith.constant 0 : index
    %c0_6 = arith.constant 0 : index
    %6 = vector.load %arg4[%c0_5, %c0_6] : memref<1x16xf32, #tpu.memory_space<vmem>>, vector<1x16xf32>
    %c0_7 = arith.constant 0 : index
    %c0_8 = arith.constant 0 : index
    %7 = vector.load %arg5[%c0_7, %c0_8] : memref<1x16xf32, #tpu.memory_space<vmem>>, vector<1x16xf32>
    %cst_9 = arith.constant dense<0.000000e+00> : vector<2xf32>
    %8 = vector.multi_reduction <add>, %5, %cst_9 [1] : vector<2x16xf32> to vector<2xf32>
    %9 = vector.shape_cast %8 : vector<2xf32> to vector<2x1xf32>
    %cst_10 = arith.constant 1.600000e+01 : f32
    %10 = vector.broadcast %cst_10 : f32 to vector<2x1xf32>
    %11 = arith.divf %9, %10 : vector<2x1xf32>
    %12 = vector.broadcast %11 : vector<2x1xf32> to vector<2x16xf32>
    %13 = arith.subf %5, %12 : vector<2x16xf32>
    %14 = arith.mulf %13, %13 : vector<2x16xf32>
    %cst_11 = arith.constant dense<0.000000e+00> : vector<2xf32>
    %15 = vector.multi_reduction <add>, %14, %cst_11 [1] : vector<2x16xf32> to vector<2xf32>
    %16 = vector.shape_cast %15 : vector<2xf32> to vector<2x1xf32>
    %cst_12 = arith.constant 1.600000e+01 : f32
    %17 = vector.broadcast %cst_12 : f32 to vector<2x1xf32>
    %18 = arith.divf %16, %17 : vector<2x1xf32>
    %19 = vector.broadcast %11 : vector<2x1xf32> to vector<2x16xf32>
    %20 = arith.subf %5, %19 : vector<2x16xf32>
    %cst_13 = arith.constant 9.99999974E-6 : f32
    %21 = vector.broadcast %cst_13 : f32 to vector<2x1xf32>
    %22 = arith.addf %18, %21 : vector<2x1xf32>
    %23 = math.rsqrt %22 : vector<2x1xf32>
    %24 = vector.broadcast %23 : vector<2x1xf32> to vector<2x16xf32>
    %25 = arith.mulf %20, %24 : vector<2x16xf32>
    %26 = vector.broadcast %6 : vector<1x16xf32> to vector<2x16xf32>
    %27 = arith.mulf %25, %26 : vector<2x16xf32>
    %28 = vector.broadcast %7 : vector<1x16xf32> to vector<2x16xf32>
    %29 = arith.addf %27, %28 : vector<2x16xf32>
    %c0_14 = arith.constant 0 : index
    %c0_15 = arith.constant 0 : index
    %30 = vector.load %arg6[%c0_14, %c0_15] : memref<2x16xf32, #tpu.memory_space<vmem>>, vector<2x16xf32>
    tpu.vector_store %arg6[%c0_14, %c0_15], %29 {strides = array<i32>} : memref<2x16xf32, #tpu.memory_space<vmem>>, vector<2x16xf32>,
    return
  }
  func.func @transform_0(%arg0: i32) -> (i32, i32) {
    %c0_i32 = arith.constant 0 : i32
    %c0_i32_0 = arith.constant 0 : i32
    %c0_i32_1 = arith.constant 0 : i32
    return %c0_i32, %c0_i32_0 : i32, i32
  }
  func.func @transform_1(%arg0: i32) -> (i32, i32) {
    %c0_i32 = arith.constant 0 : i32
    %c0_i32_0 = arith.constant 0 : i32
    %c0_i32_1 = arith.constant 0 : i32
    return %c0_i32, %c0_i32_0 : i32, i32
  }
  func.func @transform_2(%arg0: i32) -> (i32, i32) {
    %c0_i32 = arith.constant 0 : i32
    %c0_i32_0 = arith.constant 0 : i32
    %c0_i32_1 = arith.constant 0 : i32
    return %c0_i32, %c0_i32_0 : i32, i32
  }
  func.func @transform_3(%arg0: i32) -> (i32, i32) {
    %c0_i32 = arith.constant 0 : i32
    %c0_i32_0 = arith.constant 0 : i32
    %c0_i32_1 = arith.constant 0 : i32
    return %c0_i32, %c0_i32_0 : i32, i32
  }
  func.func @transform_4(%arg0: i32) -> (i32, i32) {
    %c0_i32 = arith.constant 0 : i32
    %c0_i32_0 = arith.constant 0 : i32
    %c0_i32_1 = arith.constant 0 : i32
    return %c0_i32, %c0_i32_0 : i32, i32
  }
  func.func @transform_5(%arg0: i32) -> (i32, i32) {
    %c0_i32 = arith.constant 0 : i32
    %c0_i32_0 = arith.constant 0 : i32
    %c0_i32_1 = arith.constant 0 : i32
    return %c0_i32, %c0_i32_0 : i32, i32
  }
}

module attributes {stable_mosaic.version = 11 : i64} {
  func.func @_mixer_trunk_kernel(%arg0: i32, %arg1: memref<1x4x16xf32, #tpu.memory_space<vmem>>, %arg2: memref<2x1x16xf32, #tpu.memory_space<vmem>>, %arg3: memref<2x1x16xf32, #tpu.memory_space<vmem>>, %arg4: memref<2x64x4xf32, #tpu.memory_space<vmem>>, %arg5: memref<2x64x1xf32, #tpu.memory_space<vmem>>, %arg6: memref<2x4x64xf32, #tpu.memory_space<vmem>>, %arg7: memref<2x4x1xf32, #tpu.memory_space<vmem>>, %arg8: memref<2x1x16xf32, #tpu.memory_space<vmem>>, %arg9: memref<2x1x16xf32, #tpu.memory_space<vmem>>, %arg10: memref<2x16x64xf32, #tpu.memory_space<vmem>>, %arg11: memref<2x1x64xf32, #tpu.memory_space<vmem>>, %arg12: memref<2x64x16xf32, #tpu.memory_space<vmem>>, %arg13: memref<2x1x16xf32, #tpu.memory_space<vmem>>, %arg14: memref<1x16xf32, #tpu.memory_space<vmem>>, %arg15: memref<1x16xf32, #tpu.memory_space<vmem>>, %arg16: memref<16x16xf32, #tpu.memory_space<vmem>>, %arg17: memref<1x16xf32, #tpu.memory_space<vmem>>, %arg18: memref<16x48xf32, #tpu.memory_space<vmem>>, %arg19: memref<1x48xf32, #tpu.memory_space<vmem>>, %arg20: memref<1x4x48xf32, #tpu.memory_space<vmem>>) attributes {dimension_semantics = [#tpu.dimension_semantics<parallel>], iteration_bounds = array<i64: 2>, scalar_prefetch = 0 : i64, scratch_operands = 0 : i64, tpu.core_type = #tpu.core_type<tc>, window_params = [{transform_indices = @transform_0, window_bounds = array<i64: 1, 4, 16>}, {pipeline_mode = #tpu.pipeline_mode<synchronous>, transform_indices = @transform_1, window_bounds = array<i64: 2, 1, 16>}, {pipeline_mode = #tpu.pipeline_mode<synchronous>, transform_indices = @transform_2, window_bounds = array<i64: 2, 1, 16>}, {pipeline_mode = #tpu.pipeline_mode<synchronous>, transform_indices = @transform_3, window_bounds = array<i64: 2, 64, 4>}, {pipeline_mode = #tpu.pipeline_mode<synchronous>, transform_indices = @transform_4, window_bounds = array<i64: 2, 64, 1>}, {pipeline_mode = #tpu.pipeline_mode<synchronous>, transform_indices = @transform_5, window_bounds = array<i64: 2, 4, 64>}, {pipeline_mode = #tpu.pipeline_mode<synchronous>, transform_indices = @transform_6, window_bounds = array<i64: 2, 4, 1>}, {pipeline_mode = #tpu.pipeline_mode<synchronous>, transform_indices = @transform_7, window_bounds = array<i64: 2, 1, 16>}, {pipeline_mode = #tpu.pipeline_mode<synchronous>, transform_indices = @transform_8, window_bounds = array<i64: 2, 1, 16>}, {pipeline_mode = #tpu.pipeline_mode<synchronous>, transform_indices = @transform_9, window_bounds = array<i64: 2, 16, 64>}, {pipeline_mode = #tpu.pipeline_mode<synchronous>, transform_indices = @transform_10, window_bounds = array<i64: 2, 1, 64>}, {pipeline_mode = #tpu.pipeline_mode<synchronous>, transform_indices = @transform_11, window_bounds = array<i64: 2, 64, 16>}, {pipeline_mode = #tpu.pipeline_mode<synchronous>, transform_indices = @transform_12, window_bounds = array<i64: 2, 1, 16>}, {pipeline_mode = #tpu.pipeline_mode<synchronous>, transform_indices = @transform_13, window_bounds = array<i64: 1, 16>}, {pipeline_mode = #tpu.pipeline_mode<synchronous>, transform_indices = @transform_14, window_bounds = array<i64: 1, 16>}, {pipeline_mode = #tpu.pipeline_mode<synchronous>, transform_indices = @transform_15, window_bounds = array<i64: 16, 16>}, {pipeline_mode = #tpu.pipeline_mode<synchronous>, transform_indices = @transform_16, window_bounds = array<i64: 1, 16>}, {pipeline_mode = #tpu.pipeline_mode<synchronous>, transform_indices = @transform_17, window_bounds = array<i64: 16, 48>}, {pipeline_mode = #tpu.pipeline_mode<synchronous>, transform_indices = @transform_18, window_bounds = array<i64: 1, 48>}, {transform_indices = @transform_19, window_bounds = array<i64: 1, 4, 48>}]} {
    %c0 = arith.constant 0 : index
    %c0_0 = arith.constant 0 : index
    %c0_1 = arith.constant 0 : index
    %0 = vector.load %arg1[%c0, %c0_0, %c0_1] : memref<1x4x16xf32, #tpu.memory_space<vmem>>, vector<1x4x16xf32>
    %1 = vector.shape_cast %0 : vector<1x4x16xf32> to vector<4x16xf32>
    %c0_2 = arith.constant 0 : index
    %c0_3 = arith.constant 0 : index
    %c0_4 = arith.constant 0 : index
    %2 = vector.load %arg2[%c0_2, %c0_3, %c0_4] : memref<2x1x16xf32, #tpu.memory_space<vmem>>, vector<1x1x16xf32>
    %3 = vector.shape_cast %2 : vector<1x1x16xf32> to vector<1x16xf32>
    %c0_5 = arith.constant 0 : index
    %c0_6 = arith.constant 0 : index
    %c0_7 = arith.constant 0 : index
    %4 = vector.load %arg3[%c0_5, %c0_6, %c0_7] : memref<2x1x16xf32, #tpu.memory_space<vmem>>, vector<1x1x16xf32>
    %5 = vector.shape_cast %4 : vector<1x1x16xf32> to vector<1x16xf32>
    %cst = arith.constant dense<0.000000e+00> : vector<4xf32>
    %6 = vector.multi_reduction <add>, %1, %cst [1] : vector<4x16xf32> to vector<4xf32>
    %7 = vector.shape_cast %6 : vector<4xf32> to vector<4x1xf32>
    %cst_8 = arith.constant 1.600000e+01 : f32
    %8 = vector.broadcast %cst_8 : f32 to vector<4x1xf32>
    %9 = arith.divf %7, %8 : vector<4x1xf32>
    %10 = vector.broadcast %9 : vector<4x1xf32> to vector<4x16xf32>
    %11 = arith.subf %1, %10 : vector<4x16xf32>
    %12 = arith.mulf %11, %11 : vector<4x16xf32>
    %cst_9 = arith.constant dense<0.000000e+00> : vector<4xf32>
    %13 = vector.multi_reduction <add>, %12, %cst_9 [1] : vector<4x16xf32> to vector<4xf32>
    %14 = vector.shape_cast %13 : vector<4xf32> to vector<4x1xf32>
    %cst_10 = arith.constant 1.600000e+01 : f32
    %15 = vector.broadcast %cst_10 : f32 to vector<4x1xf32>
    %16 = arith.divf %14, %15 : vector<4x1xf32>
    %17 = vector.broadcast %9 : vector<4x1xf32> to vector<4x16xf32>
    %18 = arith.subf %1, %17 : vector<4x16xf32>
    %cst_11 = arith.constant 9.99999974E-6 : f32
    %19 = vector.broadcast %cst_11 : f32 to vector<4x1xf32>
    %20 = arith.addf %16, %19 : vector<4x1xf32>
    %21 = math.rsqrt %20 : vector<4x1xf32>
    %22 = vector.broadcast %21 : vector<4x1xf32> to vector<4x16xf32>
    %23 = arith.mulf %18, %22 : vector<4x16xf32>
    %24 = vector.broadcast %3 : vector<1x16xf32> to vector<4x16xf32>
    %25 = arith.mulf %23, %24 : vector<4x16xf32>
    %26 = vector.broadcast %5 : vector<1x16xf32> to vector<4x16xf32>
    %27 = arith.addf %25, %26 : vector<4x16xf32>
    %c0_12 = arith.constant 0 : index
    %c0_13 = arith.constant 0 : index
    %c0_14 = arith.constant 0 : index
    %28 = vector.load %arg4[%c0_12, %c0_13, %c0_14] : memref<2x64x4xf32, #tpu.memory_space<vmem>>, vector<1x64x4xf32>
    %29 = vector.shape_cast %28 : vector<1x64x4xf32> to vector<64x4xf32>
    %cst_15 = arith.constant dense<0.000000e+00> : vector<64x16xf32>
    %30 = tpu.matmul %29, %27, %cst_15 {dimension_numbers = #tpu.dot_dimension_numbers<[1], [0], [0], [1], [0, 0, 1, 1], [], []>} : vector<64x4xf32>, vector<4x16xf32>, vector<64x16xf32> -> vector<64x16xf32>
    %c0_16 = arith.constant 0 : index
    %c0_17 = arith.constant 0 : index
    %c0_18 = arith.constant 0 : index
    %31 = vector.load %arg5[%c0_16, %c0_17, %c0_18] : memref<2x64x1xf32, #tpu.memory_space<vmem>>, vector<1x64x1xf32>
    %32 = vector.shape_cast %31 : vector<1x64x1xf32> to vector<64x1xf32>
    %33 = vector.broadcast %32 : vector<64x1xf32> to vector<64x16xf32>
    %34 = arith.addf %30, %33 : vector<64x16xf32>
    %cst_19 = arith.constant 5.000000e-01 : f32
    %35 = vector.broadcast %cst_19 : f32 to vector<64x16xf32>
    %36 = arith.mulf %35, %34 : vector<64x16xf32>
    %cst_20 = arith.constant 0.707106769 : f32
    %37 = vector.broadcast %cst_20 : f32 to vector<64x16xf32>
    %38 = arith.mulf %34, %37 : vector<64x16xf32>
    %39 = math.absf %38 : vector<64x16xf32>
    %cst_21 = arith.constant 0.327591091 : f32
    %40 = vector.broadcast %cst_21 : f32 to vector<64x16xf32>
    %41 = arith.mulf %40, %39 : vector<64x16xf32>
    %cst_22 = arith.constant 1.000000e+00 : f32
    %42 = vector.broadcast %cst_22 : f32 to vector<64x16xf32>
    %43 = arith.addf %42, %41 : vector<64x16xf32>
    %cst_23 = arith.constant 1.000000e+00 : f32
    %44 = vector.broadcast %cst_23 : f32 to vector<64x16xf32>
    %45 = arith.divf %44, %43 : vector<64x16xf32>
    %cst_24 = arith.constant 1.06140542 : f32
    %46 = vector.broadcast %cst_24 : f32 to vector<64x16xf32>
    %47 = arith.mulf %46, %45 : vector<64x16xf32>
    %cst_25 = arith.constant -1.45315206 : f32
    %48 = vector.broadcast %cst_25 : f32 to vector<64x16xf32>
    %49 = arith.addf %47, %48 : vector<64x16xf32>
    %50 = arith.mulf %49, %45 : vector<64x16xf32>
    %cst_26 = arith.constant 1.42141378 : f32
    %51 = vector.broadcast %cst_26 : f32 to vector<64x16xf32>
    %52 = arith.addf %50, %51 : vector<64x16xf32>
    %53 = arith.mulf %52, %45 : vector<64x16xf32>
    %cst_27 = arith.constant -0.284496725 : f32
    %54 = vector.broadcast %cst_27 : f32 to vector<64x16xf32>
    %55 = arith.addf %53, %54 : vector<64x16xf32>
    %56 = arith.mulf %55, %45 : vector<64x16xf32>
    %cst_28 = arith.constant 0.254829586 : f32
    %57 = vector.broadcast %cst_28 : f32 to vector<64x16xf32>
    %58 = arith.addf %56, %57 : vector<64x16xf32>
    %59 = arith.mulf %58, %45 : vector<64x16xf32>
    %cst_29 = arith.constant 0.000000e+00 : f32
    %60 = vector.broadcast %cst_29 : f32 to vector<64x16xf32>
    %61 = arith.subf %60, %39 : vector<64x16xf32>
    %62 = arith.mulf %61, %39 : vector<64x16xf32>
    %63 = math.exp %62 : vector<64x16xf32>
    %64 = arith.mulf %59, %63 : vector<64x16xf32>
    %cst_30 = arith.constant 1.000000e+00 : f32
    %65 = vector.broadcast %cst_30 : f32 to vector<64x16xf32>
    %66 = arith.subf %65, %64 : vector<64x16xf32>
    %cst_31 = arith.constant 0.000000e+00 : f32
    %67 = vector.broadcast %cst_31 : f32 to vector<64x16xf32>
    %68 = arith.cmpf olt, %38, %67 : vector<64x16xf32>
    %cst_32 = arith.constant 0.000000e+00 : f32
    %69 = vector.broadcast %cst_32 : f32 to vector<64x16xf32>
    %70 = arith.subf %69, %66 : vector<64x16xf32>
    %71 = arith.select %68, %70, %66 : vector<64x16xi1>, vector<64x16xf32>
    %cst_33 = arith.constant 1.000000e+00 : f32
    %72 = vector.broadcast %cst_33 : f32 to vector<64x16xf32>
    %73 = arith.addf %72, %71 : vector<64x16xf32>
    %74 = arith.mulf %36, %73 : vector<64x16xf32>
    %c0_34 = arith.constant 0 : index
    %c0_35 = arith.constant 0 : index
    %c0_36 = arith.constant 0 : index
    %75 = vector.load %arg6[%c0_34, %c0_35, %c0_36] : memref<2x4x64xf32, #tpu.memory_space<vmem>>, vector<1x4x64xf32>
    %76 = vector.shape_cast %75 : vector<1x4x64xf32> to vector<4x64xf32>
    %cst_37 = arith.constant dense<0.000000e+00> : vector<4x16xf32>
    %77 = tpu.matmul %76, %74, %cst_37 {dimension_numbers = #tpu.dot_dimension_numbers<[1], [0], [0], [1], [0, 0, 1, 1], [], []>} : vector<4x64xf32>, vector<64x16xf32>, vector<4x16xf32> -> vector<4x16xf32>
    %c0_38 = arith.constant 0 : index
    %c0_39 = arith.constant 0 : index
    %c0_40 = arith.constant 0 : index
    %78 = vector.load %arg7[%c0_38, %c0_39, %c0_40] : memref<2x4x1xf32, #tpu.memory_space<vmem>>, vector<1x4x1xf32>
    %79 = vector.shape_cast %78 : vector<1x4x1xf32> to vector<4x1xf32>
    %80 = vector.broadcast %79 : vector<4x1xf32> to vector<4x16xf32>
    %81 = arith.addf %77, %80 : vector<4x16xf32>
    %82 = arith.addf %1, %81 : vector<4x16xf32>
    %c0_41 = arith.constant 0 : index
    %c0_42 = arith.constant 0 : index
    %c0_43 = arith.constant 0 : index
    %83 = vector.load %arg8[%c0_41, %c0_42, %c0_43] : memref<2x1x16xf32, #tpu.memory_space<vmem>>, vector<1x1x16xf32>
    %84 = vector.shape_cast %83 : vector<1x1x16xf32> to vector<1x16xf32>
    %c0_44 = arith.constant 0 : index
    %c0_45 = arith.constant 0 : index
    %c0_46 = arith.constant 0 : index
    %85 = vector.load %arg9[%c0_44, %c0_45, %c0_46] : memref<2x1x16xf32, #tpu.memory_space<vmem>>, vector<1x1x16xf32>
    %86 = vector.shape_cast %85 : vector<1x1x16xf32> to vector<1x16xf32>
    %cst_47 = arith.constant dense<0.000000e+00> : vector<4xf32>
    %87 = vector.multi_reduction <add>, %82, %cst_47 [1] : vector<4x16xf32> to vector<4xf32>
    %88 = vector.shape_cast %87 : vector<4xf32> to vector<4x1xf32>
    %cst_48 = arith.constant 1.600000e+01 : f32
    %89 = vector.broadcast %cst_48 : f32 to vector<4x1xf32>
    %90 = arith.divf %88, %89 : vector<4x1xf32>
    %91 = vector.broadcast %90 : vector<4x1xf32> to vector<4x16xf32>
    %92 = arith.subf %82, %91 : vector<4x16xf32>
    %93 = arith.mulf %92, %92 : vector<4x16xf32>
    %cst_49 = arith.constant dense<0.000000e+00> : vector<4xf32>
    %94 = vector.multi_reduction <add>, %93, %cst_49 [1] : vector<4x16xf32> to vector<4xf32>
    %95 = vector.shape_cast %94 : vector<4xf32> to vector<4x1xf32>
    %cst_50 = arith.constant 1.600000e+01 : f32
    %96 = vector.broadcast %cst_50 : f32 to vector<4x1xf32>
    %97 = arith.divf %95, %96 : vector<4x1xf32>
    %98 = vector.broadcast %90 : vector<4x1xf32> to vector<4x16xf32>
    %99 = arith.subf %82, %98 : vector<4x16xf32>
    %cst_51 = arith.constant 9.99999974E-6 : f32
    %100 = vector.broadcast %cst_51 : f32 to vector<4x1xf32>
    %101 = arith.addf %97, %100 : vector<4x1xf32>
    %102 = math.rsqrt %101 : vector<4x1xf32>
    %103 = vector.broadcast %102 : vector<4x1xf32> to vector<4x16xf32>
    %104 = arith.mulf %99, %103 : vector<4x16xf32>
    %105 = vector.broadcast %84 : vector<1x16xf32> to vector<4x16xf32>
    %106 = arith.mulf %104, %105 : vector<4x16xf32>
    %107 = vector.broadcast %86 : vector<1x16xf32> to vector<4x16xf32>
    %108 = arith.addf %106, %107 : vector<4x16xf32>
    %c0_52 = arith.constant 0 : index
    %c0_53 = arith.constant 0 : index
    %c0_54 = arith.constant 0 : index
    %109 = vector.load %arg10[%c0_52, %c0_53, %c0_54] : memref<2x16x64xf32, #tpu.memory_space<vmem>>, vector<1x16x64xf32>
    %110 = vector.shape_cast %109 : vector<1x16x64xf32> to vector<16x64xf32>
    %cst_55 = arith.constant dense<0.000000e+00> : vector<4x64xf32>
    %111 = tpu.matmul %108, %110, %cst_55 {dimension_numbers = #tpu.dot_dimension_numbers<[1], [0], [0], [1], [0, 0, 1, 1], [], []>} : vector<4x16xf32>, vector<16x64xf32>, vector<4x64xf32> -> vector<4x64xf32>
    %c0_56 = arith.constant 0 : index
    %c0_57 = arith.constant 0 : index
    %c0_58 = arith.constant 0 : index
    %112 = vector.load %arg11[%c0_56, %c0_57, %c0_58] : memref<2x1x64xf32, #tpu.memory_space<vmem>>, vector<1x1x64xf32>
    %113 = vector.shape_cast %112 : vector<1x1x64xf32> to vector<1x64xf32>
    %114 = vector.broadcast %113 : vector<1x64xf32> to vector<4x64xf32>
    %115 = arith.addf %111, %114 : vector<4x64xf32>
    %cst_59 = arith.constant 5.000000e-01 : f32
    %116 = vector.broadcast %cst_59 : f32 to vector<4x64xf32>
    %117 = arith.mulf %116, %115 : vector<4x64xf32>
    %cst_60 = arith.constant 0.707106769 : f32
    %118 = vector.broadcast %cst_60 : f32 to vector<4x64xf32>
    %119 = arith.mulf %115, %118 : vector<4x64xf32>
    %120 = math.absf %119 : vector<4x64xf32>
    %cst_61 = arith.constant 0.327591091 : f32
    %121 = vector.broadcast %cst_61 : f32 to vector<4x64xf32>
    %122 = arith.mulf %121, %120 : vector<4x64xf32>
    %cst_62 = arith.constant 1.000000e+00 : f32
    %123 = vector.broadcast %cst_62 : f32 to vector<4x64xf32>
    %124 = arith.addf %123, %122 : vector<4x64xf32>
    %cst_63 = arith.constant 1.000000e+00 : f32
    %125 = vector.broadcast %cst_63 : f32 to vector<4x64xf32>
    %126 = arith.divf %125, %124 : vector<4x64xf32>
    %cst_64 = arith.constant 1.06140542 : f32
    %127 = vector.broadcast %cst_64 : f32 to vector<4x64xf32>
    %128 = arith.mulf %127, %126 : vector<4x64xf32>
    %cst_65 = arith.constant -1.45315206 : f32
    %129 = vector.broadcast %cst_65 : f32 to vector<4x64xf32>
    %130 = arith.addf %128, %129 : vector<4x64xf32>
    %131 = arith.mulf %130, %126 : vector<4x64xf32>
    %cst_66 = arith.constant 1.42141378 : f32
    %132 = vector.broadcast %cst_66 : f32 to vector<4x64xf32>
    %133 = arith.addf %131, %132 : vector<4x64xf32>
    %134 = arith.mulf %133, %126 : vector<4x64xf32>
    %cst_67 = arith.constant -0.284496725 : f32
    %135 = vector.broadcast %cst_67 : f32 to vector<4x64xf32>
    %136 = arith.addf %134, %135 : vector<4x64xf32>
    %137 = arith.mulf %136, %126 : vector<4x64xf32>
    %cst_68 = arith.constant 0.254829586 : f32
    %138 = vector.broadcast %cst_68 : f32 to vector<4x64xf32>
    %139 = arith.addf %137, %138 : vector<4x64xf32>
    %140 = arith.mulf %139, %126 : vector<4x64xf32>
    %cst_69 = arith.constant 0.000000e+00 : f32
    %141 = vector.broadcast %cst_69 : f32 to vector<4x64xf32>
    %142 = arith.subf %141, %120 : vector<4x64xf32>
    %143 = arith.mulf %142, %120 : vector<4x64xf32>
    %144 = math.exp %143 : vector<4x64xf32>
    %145 = arith.mulf %140, %144 : vector<4x64xf32>
    %cst_70 = arith.constant 1.000000e+00 : f32
    %146 = vector.broadcast %cst_70 : f32 to vector<4x64xf32>
    %147 = arith.subf %146, %145 : vector<4x64xf32>
    %cst_71 = arith.constant 0.000000e+00 : f32
    %148 = vector.broadcast %cst_71 : f32 to vector<4x64xf32>
    %149 = arith.cmpf olt, %119, %148 : vector<4x64xf32>
    %cst_72 = arith.constant 0.000000e+00 : f32
    %150 = vector.broadcast %cst_72 : f32 to vector<4x64xf32>
    %151 = arith.subf %150, %147 : vector<4x64xf32>
    %152 = arith.select %149, %151, %147 : vector<4x64xi1>, vector<4x64xf32>
    %cst_73 = arith.constant 1.000000e+00 : f32
    %153 = vector.broadcast %cst_73 : f32 to vector<4x64xf32>
    %154 = arith.addf %153, %152 : vector<4x64xf32>
    %155 = arith.mulf %117, %154 : vector<4x64xf32>
    %c0_74 = arith.constant 0 : index
    %c0_75 = arith.constant 0 : index
    %c0_76 = arith.constant 0 : index
    %156 = vector.load %arg12[%c0_74, %c0_75, %c0_76] : memref<2x64x16xf32, #tpu.memory_space<vmem>>, vector<1x64x16xf32>
    %157 = vector.shape_cast %156 : vector<1x64x16xf32> to vector<64x16xf32>
    %cst_77 = arith.constant dense<0.000000e+00> : vector<4x16xf32>
    %158 = tpu.matmul %155, %157, %cst_77 {dimension_numbers = #tpu.dot_dimension_numbers<[1], [0], [0], [1], [0, 0, 1, 1], [], []>} : vector<4x64xf32>, vector<64x16xf32>, vector<4x16xf32> -> vector<4x16xf32>
    %c0_78 = arith.constant 0 : index
    %c0_79 = arith.constant 0 : index
    %c0_80 = arith.constant 0 : index
    %159 = vector.load %arg13[%c0_78, %c0_79, %c0_80] : memref<2x1x16xf32, #tpu.memory_space<vmem>>, vector<1x1x16xf32>
    %160 = vector.shape_cast %159 : vector<1x1x16xf32> to vector<1x16xf32>
    %161 = vector.broadcast %160 : vector<1x16xf32> to vector<4x16xf32>
    %162 = arith.addf %158, %161 : vector<4x16xf32>
    %163 = arith.addf %82, %162 : vector<4x16xf32>
    %c1 = arith.constant 1 : index
    %c0_81 = arith.constant 0 : index
    %c0_82 = arith.constant 0 : index
    %164 = vector.load %arg2[%c1, %c0_81, %c0_82] : memref<2x1x16xf32, #tpu.memory_space<vmem>>, vector<1x1x16xf32>
    %165 = vector.shape_cast %164 : vector<1x1x16xf32> to vector<1x16xf32>
    %c1_83 = arith.constant 1 : index
    %c0_84 = arith.constant 0 : index
    %c0_85 = arith.constant 0 : index
    %166 = vector.load %arg3[%c1_83, %c0_84, %c0_85] : memref<2x1x16xf32, #tpu.memory_space<vmem>>, vector<1x1x16xf32>
    %167 = vector.shape_cast %166 : vector<1x1x16xf32> to vector<1x16xf32>
    %cst_86 = arith.constant dense<0.000000e+00> : vector<4xf32>
    %168 = vector.multi_reduction <add>, %163, %cst_86 [1] : vector<4x16xf32> to vector<4xf32>
    %169 = vector.shape_cast %168 : vector<4xf32> to vector<4x1xf32>
    %cst_87 = arith.constant 1.600000e+01 : f32
    %170 = vector.broadcast %cst_87 : f32 to vector<4x1xf32>
    %171 = arith.divf %169, %170 : vector<4x1xf32>
    %172 = vector.broadcast %171 : vector<4x1xf32> to vector<4x16xf32>
    %173 = arith.subf %163, %172 : vector<4x16xf32>
    %174 = arith.mulf %173, %173 : vector<4x16xf32>
    %cst_88 = arith.constant dense<0.000000e+00> : vector<4xf32>
    %175 = vector.multi_reduction <add>, %174, %cst_88 [1] : vector<4x16xf32> to vector<4xf32>
    %176 = vector.shape_cast %175 : vector<4xf32> to vector<4x1xf32>
    %cst_89 = arith.constant 1.600000e+01 : f32
    %177 = vector.broadcast %cst_89 : f32 to vector<4x1xf32>
    %178 = arith.divf %176, %177 : vector<4x1xf32>
    %179 = vector.broadcast %171 : vector<4x1xf32> to vector<4x16xf32>
    %180 = arith.subf %163, %179 : vector<4x16xf32>
    %cst_90 = arith.constant 9.99999974E-6 : f32
    %181 = vector.broadcast %cst_90 : f32 to vector<4x1xf32>
    %182 = arith.addf %178, %181 : vector<4x1xf32>
    %183 = math.rsqrt %182 : vector<4x1xf32>
    %184 = vector.broadcast %183 : vector<4x1xf32> to vector<4x16xf32>
    %185 = arith.mulf %180, %184 : vector<4x16xf32>
    %186 = vector.broadcast %165 : vector<1x16xf32> to vector<4x16xf32>
    %187 = arith.mulf %185, %186 : vector<4x16xf32>
    %188 = vector.broadcast %167 : vector<1x16xf32> to vector<4x16xf32>
    %189 = arith.addf %187, %188 : vector<4x16xf32>
    %c1_91 = arith.constant 1 : index
    %c0_92 = arith.constant 0 : index
    %c0_93 = arith.constant 0 : index
    %190 = vector.load %arg4[%c1_91, %c0_92, %c0_93] : memref<2x64x4xf32, #tpu.memory_space<vmem>>, vector<1x64x4xf32>
    %191 = vector.shape_cast %190 : vector<1x64x4xf32> to vector<64x4xf32>
    %cst_94 = arith.constant dense<0.000000e+00> : vector<64x16xf32>
    %192 = tpu.matmul %191, %189, %cst_94 {dimension_numbers = #tpu.dot_dimension_numbers<[1], [0], [0], [1], [0, 0, 1, 1], [], []>} : vector<64x4xf32>, vector<4x16xf32>, vector<64x16xf32> -> vector<64x16xf32>
    %c1_95 = arith.constant 1 : index
    %c0_96 = arith.constant 0 : index
    %c0_97 = arith.constant 0 : index
    %193 = vector.load %arg5[%c1_95, %c0_96, %c0_97] : memref<2x64x1xf32, #tpu.memory_space<vmem>>, vector<1x64x1xf32>
    %194 = vector.shape_cast %193 : vector<1x64x1xf32> to vector<64x1xf32>
    %195 = vector.broadcast %194 : vector<64x1xf32> to vector<64x16xf32>
    %196 = arith.addf %192, %195 : vector<64x16xf32>
    %cst_98 = arith.constant 5.000000e-01 : f32
    %197 = vector.broadcast %cst_98 : f32 to vector<64x16xf32>
    %198 = arith.mulf %197, %196 : vector<64x16xf32>
    %cst_99 = arith.constant 0.707106769 : f32
    %199 = vector.broadcast %cst_99 : f32 to vector<64x16xf32>
    %200 = arith.mulf %196, %199 : vector<64x16xf32>
    %201 = math.absf %200 : vector<64x16xf32>
    %cst_100 = arith.constant 0.327591091 : f32
    %202 = vector.broadcast %cst_100 : f32 to vector<64x16xf32>
    %203 = arith.mulf %202, %201 : vector<64x16xf32>
    %cst_101 = arith.constant 1.000000e+00 : f32
    %204 = vector.broadcast %cst_101 : f32 to vector<64x16xf32>
    %205 = arith.addf %204, %203 : vector<64x16xf32>
    %cst_102 = arith.constant 1.000000e+00 : f32
    %206 = vector.broadcast %cst_102 : f32 to vector<64x16xf32>
    %207 = arith.divf %206, %205 : vector<64x16xf32>
    %cst_103 = arith.constant 1.06140542 : f32
    %208 = vector.broadcast %cst_103 : f32 to vector<64x16xf32>
    %209 = arith.mulf %208, %207 : vector<64x16xf32>
    %cst_104 = arith.constant -1.45315206 : f32
    %210 = vector.broadcast %cst_104 : f32 to vector<64x16xf32>
    %211 = arith.addf %209, %210 : vector<64x16xf32>
    %212 = arith.mulf %211, %207 : vector<64x16xf32>
    %cst_105 = arith.constant 1.42141378 : f32
    %213 = vector.broadcast %cst_105 : f32 to vector<64x16xf32>
    %214 = arith.addf %212, %213 : vector<64x16xf32>
    %215 = arith.mulf %214, %207 : vector<64x16xf32>
    %cst_106 = arith.constant -0.284496725 : f32
    %216 = vector.broadcast %cst_106 : f32 to vector<64x16xf32>
    %217 = arith.addf %215, %216 : vector<64x16xf32>
    %218 = arith.mulf %217, %207 : vector<64x16xf32>
    %cst_107 = arith.constant 0.254829586 : f32
    %219 = vector.broadcast %cst_107 : f32 to vector<64x16xf32>
    %220 = arith.addf %218, %219 : vector<64x16xf32>
    %221 = arith.mulf %220, %207 : vector<64x16xf32>
    %cst_108 = arith.constant 0.000000e+00 : f32
    %222 = vector.broadcast %cst_108 : f32 to vector<64x16xf32>
    %223 = arith.subf %222, %201 : vector<64x16xf32>
    %224 = arith.mulf %223, %201 : vector<64x16xf32>
    %225 = math.exp %224 : vector<64x16xf32>
    %226 = arith.mulf %221, %225 : vector<64x16xf32>
    %cst_109 = arith.constant 1.000000e+00 : f32
    %227 = vector.broadcast %cst_109 : f32 to vector<64x16xf32>
    %228 = arith.subf %227, %226 : vector<64x16xf32>
    %cst_110 = arith.constant 0.000000e+00 : f32
    %229 = vector.broadcast %cst_110 : f32 to vector<64x16xf32>
    %230 = arith.cmpf olt, %200, %229 : vector<64x16xf32>
    %cst_111 = arith.constant 0.000000e+00 : f32
    %231 = vector.broadcast %cst_111 : f32 to vector<64x16xf32>
    %232 = arith.subf %231, %228 : vector<64x16xf32>
    %233 = arith.select %230, %232, %228 : vector<64x16xi1>, vector<64x16xf32>
    %cst_112 = arith.constant 1.000000e+00 : f32
    %234 = vector.broadcast %cst_112 : f32 to vector<64x16xf32>
    %235 = arith.addf %234, %233 : vector<64x16xf32>
    %236 = arith.mulf %198, %235 : vector<64x16xf32>
    %c1_113 = arith.constant 1 : index
    %c0_114 = arith.constant 0 : index
    %c0_115 = arith.constant 0 : index
    %237 = vector.load %arg6[%c1_113, %c0_114, %c0_115] : memref<2x4x64xf32, #tpu.memory_space<vmem>>, vector<1x4x64xf32>
    %238 = vector.shape_cast %237 : vector<1x4x64xf32> to vector<4x64xf32>
    %cst_116 = arith.constant dense<0.000000e+00> : vector<4x16xf32>
    %239 = tpu.matmul %238, %236, %cst_116 {dimension_numbers = #tpu.dot_dimension_numbers<[1], [0], [0], [1], [0, 0, 1, 1], [], []>} : vector<4x64xf32>, vector<64x16xf32>, vector<4x16xf32> -> vector<4x16xf32>
    %c1_117 = arith.constant 1 : index
    %c0_118 = arith.constant 0 : index
    %c0_119 = arith.constant 0 : index
    %240 = vector.load %arg7[%c1_117, %c0_118, %c0_119] : memref<2x4x1xf32, #tpu.memory_space<vmem>>, vector<1x4x1xf32>
    %241 = vector.shape_cast %240 : vector<1x4x1xf32> to vector<4x1xf32>
    %242 = vector.broadcast %241 : vector<4x1xf32> to vector<4x16xf32>
    %243 = arith.addf %239, %242 : vector<4x16xf32>
    %244 = arith.addf %163, %243 : vector<4x16xf32>
    %c1_120 = arith.constant 1 : index
    %c0_121 = arith.constant 0 : index
    %c0_122 = arith.constant 0 : index
    %245 = vector.load %arg8[%c1_120, %c0_121, %c0_122] : memref<2x1x16xf32, #tpu.memory_space<vmem>>, vector<1x1x16xf32>
    %246 = vector.shape_cast %245 : vector<1x1x16xf32> to vector<1x16xf32>
    %c1_123 = arith.constant 1 : index
    %c0_124 = arith.constant 0 : index
    %c0_125 = arith.constant 0 : index
    %247 = vector.load %arg9[%c1_123, %c0_124, %c0_125] : memref<2x1x16xf32, #tpu.memory_space<vmem>>, vector<1x1x16xf32>
    %248 = vector.shape_cast %247 : vector<1x1x16xf32> to vector<1x16xf32>
    %cst_126 = arith.constant dense<0.000000e+00> : vector<4xf32>
    %249 = vector.multi_reduction <add>, %244, %cst_126 [1] : vector<4x16xf32> to vector<4xf32>
    %250 = vector.shape_cast %249 : vector<4xf32> to vector<4x1xf32>
    %cst_127 = arith.constant 1.600000e+01 : f32
    %251 = vector.broadcast %cst_127 : f32 to vector<4x1xf32>
    %252 = arith.divf %250, %251 : vector<4x1xf32>
    %253 = vector.broadcast %252 : vector<4x1xf32> to vector<4x16xf32>
    %254 = arith.subf %244, %253 : vector<4x16xf32>
    %255 = arith.mulf %254, %254 : vector<4x16xf32>
    %cst_128 = arith.constant dense<0.000000e+00> : vector<4xf32>
    %256 = vector.multi_reduction <add>, %255, %cst_128 [1] : vector<4x16xf32> to vector<4xf32>
    %257 = vector.shape_cast %256 : vector<4xf32> to vector<4x1xf32>
    %cst_129 = arith.constant 1.600000e+01 : f32
    %258 = vector.broadcast %cst_129 : f32 to vector<4x1xf32>
    %259 = arith.divf %257, %258 : vector<4x1xf32>
    %260 = vector.broadcast %252 : vector<4x1xf32> to vector<4x16xf32>
    %261 = arith.subf %244, %260 : vector<4x16xf32>
    %cst_130 = arith.constant 9.99999974E-6 : f32
    %262 = vector.broadcast %cst_130 : f32 to vector<4x1xf32>
    %263 = arith.addf %259, %262 : vector<4x1xf32>
    %264 = math.rsqrt %263 : vector<4x1xf32>
    %265 = vector.broadcast %264 : vector<4x1xf32> to vector<4x16xf32>
    %266 = arith.mulf %261, %265 : vector<4x16xf32>
    %267 = vector.broadcast %246 : vector<1x16xf32> to vector<4x16xf32>
    %268 = arith.mulf %266, %267 : vector<4x16xf32>
    %269 = vector.broadcast %248 : vector<1x16xf32> to vector<4x16xf32>
    %270 = arith.addf %268, %269 : vector<4x16xf32>
    %c1_131 = arith.constant 1 : index
    %c0_132 = arith.constant 0 : index
    %c0_133 = arith.constant 0 : index
    %271 = vector.load %arg10[%c1_131, %c0_132, %c0_133] : memref<2x16x64xf32, #tpu.memory_space<vmem>>, vector<1x16x64xf32>
    %272 = vector.shape_cast %271 : vector<1x16x64xf32> to vector<16x64xf32>
    %cst_134 = arith.constant dense<0.000000e+00> : vector<4x64xf32>
    %273 = tpu.matmul %270, %272, %cst_134 {dimension_numbers = #tpu.dot_dimension_numbers<[1], [0], [0], [1], [0, 0, 1, 1], [], []>} : vector<4x16xf32>, vector<16x64xf32>, vector<4x64xf32> -> vector<4x64xf32>
    %c1_135 = arith.constant 1 : index
    %c0_136 = arith.constant 0 : index
    %c0_137 = arith.constant 0 : index
    %274 = vector.load %arg11[%c1_135, %c0_136, %c0_137] : memref<2x1x64xf32, #tpu.memory_space<vmem>>, vector<1x1x64xf32>
    %275 = vector.shape_cast %274 : vector<1x1x64xf32> to vector<1x64xf32>
    %276 = vector.broadcast %275 : vector<1x64xf32> to vector<4x64xf32>
    %277 = arith.addf %273, %276 : vector<4x64xf32>
    %cst_138 = arith.constant 5.000000e-01 : f32
    %278 = vector.broadcast %cst_138 : f32 to vector<4x64xf32>
    %279 = arith.mulf %278, %277 : vector<4x64xf32>
    %cst_139 = arith.constant 0.707106769 : f32
    %280 = vector.broadcast %cst_139 : f32 to vector<4x64xf32>
    %281 = arith.mulf %277, %280 : vector<4x64xf32>
    %282 = math.absf %281 : vector<4x64xf32>
    %cst_140 = arith.constant 0.327591091 : f32
    %283 = vector.broadcast %cst_140 : f32 to vector<4x64xf32>
    %284 = arith.mulf %283, %282 : vector<4x64xf32>
    %cst_141 = arith.constant 1.000000e+00 : f32
    %285 = vector.broadcast %cst_141 : f32 to vector<4x64xf32>
    %286 = arith.addf %285, %284 : vector<4x64xf32>
    %cst_142 = arith.constant 1.000000e+00 : f32
    %287 = vector.broadcast %cst_142 : f32 to vector<4x64xf32>
    %288 = arith.divf %287, %286 : vector<4x64xf32>
    %cst_143 = arith.constant 1.06140542 : f32
    %289 = vector.broadcast %cst_143 : f32 to vector<4x64xf32>
    %290 = arith.mulf %289, %288 : vector<4x64xf32>
    %cst_144 = arith.constant -1.45315206 : f32
    %291 = vector.broadcast %cst_144 : f32 to vector<4x64xf32>
    %292 = arith.addf %290, %291 : vector<4x64xf32>
    %293 = arith.mulf %292, %288 : vector<4x64xf32>
    %cst_145 = arith.constant 1.42141378 : f32
    %294 = vector.broadcast %cst_145 : f32 to vector<4x64xf32>
    %295 = arith.addf %293, %294 : vector<4x64xf32>
    %296 = arith.mulf %295, %288 : vector<4x64xf32>
    %cst_146 = arith.constant -0.284496725 : f32
    %297 = vector.broadcast %cst_146 : f32 to vector<4x64xf32>
    %298 = arith.addf %296, %297 : vector<4x64xf32>
    %299 = arith.mulf %298, %288 : vector<4x64xf32>
    %cst_147 = arith.constant 0.254829586 : f32
    %300 = vector.broadcast %cst_147 : f32 to vector<4x64xf32>
    %301 = arith.addf %299, %300 : vector<4x64xf32>
    %302 = arith.mulf %301, %288 : vector<4x64xf32>
    %cst_148 = arith.constant 0.000000e+00 : f32
    %303 = vector.broadcast %cst_148 : f32 to vector<4x64xf32>
    %304 = arith.subf %303, %282 : vector<4x64xf32>
    %305 = arith.mulf %304, %282 : vector<4x64xf32>
    %306 = math.exp %305 : vector<4x64xf32>
    %307 = arith.mulf %302, %306 : vector<4x64xf32>
    %cst_149 = arith.constant 1.000000e+00 : f32
    %308 = vector.broadcast %cst_149 : f32 to vector<4x64xf32>
    %309 = arith.subf %308, %307 : vector<4x64xf32>
    %cst_150 = arith.constant 0.000000e+00 : f32
    %310 = vector.broadcast %cst_150 : f32 to vector<4x64xf32>
    %311 = arith.cmpf olt, %281, %310 : vector<4x64xf32>
    %cst_151 = arith.constant 0.000000e+00 : f32
    %312 = vector.broadcast %cst_151 : f32 to vector<4x64xf32>
    %313 = arith.subf %312, %309 : vector<4x64xf32>
    %314 = arith.select %311, %313, %309 : vector<4x64xi1>, vector<4x64xf32>
    %cst_152 = arith.constant 1.000000e+00 : f32
    %315 = vector.broadcast %cst_152 : f32 to vector<4x64xf32>
    %316 = arith.addf %315, %314 : vector<4x64xf32>
    %317 = arith.mulf %279, %316 : vector<4x64xf32>
    %c1_153 = arith.constant 1 : index
    %c0_154 = arith.constant 0 : index
    %c0_155 = arith.constant 0 : index
    %318 = vector.load %arg12[%c1_153, %c0_154, %c0_155] : memref<2x64x16xf32, #tpu.memory_space<vmem>>, vector<1x64x16xf32>
    %319 = vector.shape_cast %318 : vector<1x64x16xf32> to vector<64x16xf32>
    %cst_156 = arith.constant dense<0.000000e+00> : vector<4x16xf32>
    %320 = tpu.matmul %317, %319, %cst_156 {dimension_numbers = #tpu.dot_dimension_numbers<[1], [0], [0], [1], [0, 0, 1, 1], [], []>} : vector<4x64xf32>, vector<64x16xf32>, vector<4x16xf32> -> vector<4x16xf32>
    %c1_157 = arith.constant 1 : index
    %c0_158 = arith.constant 0 : index
    %c0_159 = arith.constant 0 : index
    %321 = vector.load %arg13[%c1_157, %c0_158, %c0_159] : memref<2x1x16xf32, #tpu.memory_space<vmem>>, vector<1x1x16xf32>
    %322 = vector.shape_cast %321 : vector<1x1x16xf32> to vector<1x16xf32>
    %323 = vector.broadcast %322 : vector<1x16xf32> to vector<4x16xf32>
    %324 = arith.addf %320, %323 : vector<4x16xf32>
    %325 = arith.addf %244, %324 : vector<4x16xf32>
    %c0_160 = arith.constant 0 : index
    %c0_161 = arith.constant 0 : index
    %326 = vector.load %arg14[%c0_160, %c0_161] : memref<1x16xf32, #tpu.memory_space<vmem>>, vector<1x16xf32>
    %c0_162 = arith.constant 0 : index
    %c0_163 = arith.constant 0 : index
    %327 = vector.load %arg15[%c0_162, %c0_163] : memref<1x16xf32, #tpu.memory_space<vmem>>, vector<1x16xf32>
    %cst_164 = arith.constant dense<0.000000e+00> : vector<4xf32>
    %328 = vector.multi_reduction <add>, %325, %cst_164 [1] : vector<4x16xf32> to vector<4xf32>
    %329 = vector.shape_cast %328 : vector<4xf32> to vector<4x1xf32>
    %cst_165 = arith.constant 1.600000e+01 : f32
    %330 = vector.broadcast %cst_165 : f32 to vector<4x1xf32>
    %331 = arith.divf %329, %330 : vector<4x1xf32>
    %332 = vector.broadcast %331 : vector<4x1xf32> to vector<4x16xf32>
    %333 = arith.subf %325, %332 : vector<4x16xf32>
    %334 = arith.mulf %333, %333 : vector<4x16xf32>
    %cst_166 = arith.constant dense<0.000000e+00> : vector<4xf32>
    %335 = vector.multi_reduction <add>, %334, %cst_166 [1] : vector<4x16xf32> to vector<4xf32>
    %336 = vector.shape_cast %335 : vector<4xf32> to vector<4x1xf32>
    %cst_167 = arith.constant 1.600000e+01 : f32
    %337 = vector.broadcast %cst_167 : f32 to vector<4x1xf32>
    %338 = arith.divf %336, %337 : vector<4x1xf32>
    %339 = vector.broadcast %331 : vector<4x1xf32> to vector<4x16xf32>
    %340 = arith.subf %325, %339 : vector<4x16xf32>
    %cst_168 = arith.constant 9.99999974E-6 : f32
    %341 = vector.broadcast %cst_168 : f32 to vector<4x1xf32>
    %342 = arith.addf %338, %341 : vector<4x1xf32>
    %343 = math.rsqrt %342 : vector<4x1xf32>
    %344 = vector.broadcast %343 : vector<4x1xf32> to vector<4x16xf32>
    %345 = arith.mulf %340, %344 : vector<4x16xf32>
    %346 = vector.broadcast %326 : vector<1x16xf32> to vector<4x16xf32>
    %347 = arith.mulf %345, %346 : vector<4x16xf32>
    %348 = vector.broadcast %327 : vector<1x16xf32> to vector<4x16xf32>
    %349 = arith.addf %347, %348 : vector<4x16xf32>
    %c0_169 = arith.constant 0 : index
    %c0_170 = arith.constant 0 : index
    %350 = vector.load %arg16[%c0_169, %c0_170] : memref<16x16xf32, #tpu.memory_space<vmem>>, vector<16x16xf32>
    %cst_171 = arith.constant dense<0.000000e+00> : vector<4x16xf32>
    %351 = tpu.matmul %349, %350, %cst_171 {dimension_numbers = #tpu.dot_dimension_numbers<[1], [0], [0], [1], [0, 0, 1, 1], [], []>} : vector<4x16xf32>, vector<16x16xf32>, vector<4x16xf32> -> vector<4x16xf32>
    %c0_172 = arith.constant 0 : index
    %c0_173 = arith.constant 0 : index
    %352 = vector.load %arg17[%c0_172, %c0_173] : memref<1x16xf32, #tpu.memory_space<vmem>>, vector<1x16xf32>
    %353 = vector.broadcast %352 : vector<1x16xf32> to vector<4x16xf32>
    %354 = arith.addf %351, %353 : vector<4x16xf32>
    %c0_174 = arith.constant 0 : index
    %c0_175 = arith.constant 0 : index
    %355 = vector.load %arg18[%c0_174, %c0_175] : memref<16x48xf32, #tpu.memory_space<vmem>>, vector<16x48xf32>
    %cst_176 = arith.constant dense<0.000000e+00> : vector<4x48xf32>
    %356 = tpu.matmul %354, %355, %cst_176 {dimension_numbers = #tpu.dot_dimension_numbers<[1], [0], [0], [1], [0, 0, 1, 1], [], []>} : vector<4x16xf32>, vector<16x48xf32>, vector<4x48xf32> -> vector<4x48xf32>
    %c0_177 = arith.constant 0 : index
    %c0_178 = arith.constant 0 : index
    %357 = vector.load %arg19[%c0_177, %c0_178] : memref<1x48xf32, #tpu.memory_space<vmem>>, vector<1x48xf32>
    %358 = vector.broadcast %357 : vector<1x48xf32> to vector<4x48xf32>
    %359 = arith.addf %356, %358 : vector<4x48xf32>
    %c0_179 = arith.constant 0 : index
    %c0_180 = arith.constant 0 : index
    %c0_181 = arith.constant 0 : index
    %360 = vector.load %arg20[%c0_179, %c0_180, %c0_181] : memref<1x4x48xf32, #tpu.memory_space<vmem>>, vector<1x4x48xf32>
    %361 = vector.shape_cast %360 : vector<1x4x48xf32> to vector<4x48xf32>
    %362 = vector.shape_cast %359 : vector<4x48xf32> to vector<1x4x48xf32>
    tpu.vector_store %arg20[%c0_179, %c0_180, %c0_181], %362 {strides = array<i32>} : memref<1x4x48xf32, #tpu.memory_space<vmem>>, vector<1x4x48xf32>,
    return
  }
  func.func @transform_0(%arg0: i32) -> (i32, i32, i32) {
    %c0_i32 = arith.constant 0 : i32
    %c0_i32_0 = arith.constant 0 : i32
    %c0_i32_1 = arith.constant 0 : i32
    return %arg0, %c0_i32, %c0_i32_0 : i32, i32, i32
  }
  func.func @transform_1(%arg0: i32) -> (i32, i32, i32) {
    %c0_i32 = arith.constant 0 : i32
    %c0_i32_0 = arith.constant 0 : i32
    %c0_i32_1 = arith.constant 0 : i32
    %c0_i32_2 = arith.constant 0 : i32
    return %c0_i32, %c0_i32_0, %c0_i32_1 : i32, i32, i32
  }
  func.func @transform_2(%arg0: i32) -> (i32, i32, i32) {
    %c0_i32 = arith.constant 0 : i32
    %c0_i32_0 = arith.constant 0 : i32
    %c0_i32_1 = arith.constant 0 : i32
    %c0_i32_2 = arith.constant 0 : i32
    return %c0_i32, %c0_i32_0, %c0_i32_1 : i32, i32, i32
  }
  func.func @transform_3(%arg0: i32) -> (i32, i32, i32) {
    %c0_i32 = arith.constant 0 : i32
    %c0_i32_0 = arith.constant 0 : i32
    %c0_i32_1 = arith.constant 0 : i32
    %c0_i32_2 = arith.constant 0 : i32
    return %c0_i32, %c0_i32_0, %c0_i32_1 : i32, i32, i32
  }
  func.func @transform_4(%arg0: i32) -> (i32, i32, i32) {
    %c0_i32 = arith.constant 0 : i32
    %c0_i32_0 = arith.constant 0 : i32
    %c0_i32_1 = arith.constant 0 : i32
    %c0_i32_2 = arith.constant 0 : i32
    return %c0_i32, %c0_i32_0, %c0_i32_1 : i32, i32, i32
  }
  func.func @transform_5(%arg0: i32) -> (i32, i32, i32) {
    %c0_i32 = arith.constant 0 : i32
    %c0_i32_0 = arith.constant 0 : i32
    %c0_i32_1 = arith.constant 0 : i32
    %c0_i32_2 = arith.constant 0 : i32
    return %c0_i32, %c0_i32_0, %c0_i32_1 : i32, i32, i32
  }
  func.func @transform_6(%arg0: i32) -> (i32, i32, i32) {
    %c0_i32 = arith.constant 0 : i32
    %c0_i32_0 = arith.constant 0 : i32
    %c0_i32_1 = arith.constant 0 : i32
    %c0_i32_2 = arith.constant 0 : i32
    return %c0_i32, %c0_i32_0, %c0_i32_1 : i32, i32, i32
  }
  func.func @transform_7(%arg0: i32) -> (i32, i32, i32) {
    %c0_i32 = arith.constant 0 : i32
    %c0_i32_0 = arith.constant 0 : i32
    %c0_i32_1 = arith.constant 0 : i32
    %c0_i32_2 = arith.constant 0 : i32
    return %c0_i32, %c0_i32_0, %c0_i32_1 : i32, i32, i32
  }
  func.func @transform_8(%arg0: i32) -> (i32, i32, i32) {
    %c0_i32 = arith.constant 0 : i32
    %c0_i32_0 = arith.constant 0 : i32
    %c0_i32_1 = arith.constant 0 : i32
    %c0_i32_2 = arith.constant 0 : i32
    return %c0_i32, %c0_i32_0, %c0_i32_1 : i32, i32, i32
  }
  func.func @transform_9(%arg0: i32) -> (i32, i32, i32) {
    %c0_i32 = arith.constant 0 : i32
    %c0_i32_0 = arith.constant 0 : i32
    %c0_i32_1 = arith.constant 0 : i32
    %c0_i32_2 = arith.constant 0 : i32
    return %c0_i32, %c0_i32_0, %c0_i32_1 : i32, i32, i32
  }
  func.func @transform_10(%arg0: i32) -> (i32, i32, i32) {
    %c0_i32 = arith.constant 0 : i32
    %c0_i32_0 = arith.constant 0 : i32
    %c0_i32_1 = arith.constant 0 : i32
    %c0_i32_2 = arith.constant 0 : i32
    return %c0_i32, %c0_i32_0, %c0_i32_1 : i32, i32, i32
  }
  func.func @transform_11(%arg0: i32) -> (i32, i32, i32) {
    %c0_i32 = arith.constant 0 : i32
    %c0_i32_0 = arith.constant 0 : i32
    %c0_i32_1 = arith.constant 0 : i32
    %c0_i32_2 = arith.constant 0 : i32
    return %c0_i32, %c0_i32_0, %c0_i32_1 : i32, i32, i32
  }
  func.func @transform_12(%arg0: i32) -> (i32, i32, i32) {
    %c0_i32 = arith.constant 0 : i32
    %c0_i32_0 = arith.constant 0 : i32
    %c0_i32_1 = arith.constant 0 : i32
    %c0_i32_2 = arith.constant 0 : i32
    return %c0_i32, %c0_i32_0, %c0_i32_1 : i32, i32, i32
  }
  func.func @transform_13(%arg0: i32) -> (i32, i32) {
    %c0_i32 = arith.constant 0 : i32
    %c0_i32_0 = arith.constant 0 : i32
    %c0_i32_1 = arith.constant 0 : i32
    return %c0_i32, %c0_i32_0 : i32, i32
  }
  func.func @transform_14(%arg0: i32) -> (i32, i32) {
    %c0_i32 = arith.constant 0 : i32
    %c0_i32_0 = arith.constant 0 : i32
    %c0_i32_1 = arith.constant 0 : i32
    return %c0_i32, %c0_i32_0 : i32, i32
  }
  func.func @transform_15(%arg0: i32) -> (i32, i32) {
    %c0_i32 = arith.constant 0 : i32
    %c0_i32_0 = arith.constant 0 : i32
    %c0_i32_1 = arith.constant 0 : i32
    return %c0_i32, %c0_i32_0 : i32, i32
  }
  func.func @transform_16(%arg0: i32) -> (i32, i32) {
    %c0_i32 = arith.constant 0 : i32
    %c0_i32_0 = arith.constant 0 : i32
    %c0_i32_1 = arith.constant 0 : i32
    return %c0_i32, %c0_i32_0 : i32, i32
  }
  func.func @transform_17(%arg0: i32) -> (i32, i32) {
    %c0_i32 = arith.constant 0 : i32
    %c0_i32_0 = arith.constant 0 : i32
    %c0_i32_1 = arith.constant 0 : i32
    return %c0_i32, %c0_i32_0 : i32, i32
  }
  func.func @transform_18(%arg0: i32) -> (i32, i32) {
    %c0_i32 = arith.constant 0 : i32
    %c0_i32_0 = arith.constant 0 : i32
    %c0_i32_1 = arith.constant 0 : i32
    return %c0_i32, %c0_i32_0 : i32, i32
  }
  func.func @transform_19(%arg0: i32) -> (i32, i32, i32) {
    %c0_i32 = arith.constant 0 : i32
    %c0_i32_0 = arith.constant 0 : i32
    %c0_i32_1 = arith.constant 0 : i32
    return %arg0, %c0_i32, %c0_i32_0 : i32, i32, i32
  }
}

module attributes {stable_mosaic.version = 11 : i64} {
  func.func @_dense_ln_kernel(%arg0: i32, %arg1: memref<8x4xf32, #tpu.memory_space<vmem>>, %arg2: memref<4x2xf32, #tpu.memory_space<vmem>>, %arg3: memref<1x2xf32, #tpu.memory_space<vmem>>, %arg4: memref<1x2xf32, #tpu.memory_space<vmem>>, %arg5: memref<1x2xf32, #tpu.memory_space<vmem>>, %arg6: memref<8x2xf32, #tpu.memory_space<vmem>>) attributes {dimension_semantics = [#tpu.dimension_semantics<parallel>], iteration_bounds = array<i64: 1>, scalar_prefetch = 0 : i64, scratch_operands = 0 : i64, tpu.core_type = #tpu.core_type<tc>, window_params = [{pipeline_mode = #tpu.pipeline_mode<synchronous>, transform_indices = @transform_0, window_bounds = array<i64: 8, 4>}, {pipeline_mode = #tpu.pipeline_mode<synchronous>, transform_indices = @transform_1, window_bounds = array<i64: 4, 2>}, {pipeline_mode = #tpu.pipeline_mode<synchronous>, transform_indices = @transform_2, window_bounds = array<i64: 1, 2>}, {pipeline_mode = #tpu.pipeline_mode<synchronous>, transform_indices = @transform_3, window_bounds = array<i64: 1, 2>}, {pipeline_mode = #tpu.pipeline_mode<synchronous>, transform_indices = @transform_4, window_bounds = array<i64: 1, 2>}, {pipeline_mode = #tpu.pipeline_mode<synchronous>, transform_indices = @transform_5, window_bounds = array<i64: 8, 2>}]} {
    %c0 = arith.constant 0 : index
    %c0_0 = arith.constant 0 : index
    %0 = vector.load %arg1[%c0, %c0_0] : memref<8x4xf32, #tpu.memory_space<vmem>>, vector<8x4xf32>
    %c0_1 = arith.constant 0 : index
    %c0_2 = arith.constant 0 : index
    %1 = vector.load %arg2[%c0_1, %c0_2] : memref<4x2xf32, #tpu.memory_space<vmem>>, vector<4x2xf32>
    %cst = arith.constant dense<0.000000e+00> : vector<8x2xf32>
    %2 = tpu.matmul %0, %1, %cst {dimension_numbers = #tpu.dot_dimension_numbers<[1], [0], [0], [1], [0, 0, 1, 1], [], []>} : vector<8x4xf32>, vector<4x2xf32>, vector<8x2xf32> -> vector<8x2xf32>
    %c0_3 = arith.constant 0 : index
    %c0_4 = arith.constant 0 : index
    %3 = vector.load %arg3[%c0_3, %c0_4] : memref<1x2xf32, #tpu.memory_space<vmem>>, vector<1x2xf32>
    %4 = vector.broadcast %3 : vector<1x2xf32> to vector<8x2xf32>
    %5 = arith.addf %2, %4 : vector<8x2xf32>
    %c0_5 = arith.constant 0 : index
    %c0_6 = arith.constant 0 : index
    %6 = vector.load %arg4[%c0_5, %c0_6] : memref<1x2xf32, #tpu.memory_space<vmem>>, vector<1x2xf32>
    %c0_7 = arith.constant 0 : index
    %c0_8 = arith.constant 0 : index
    %7 = vector.load %arg5[%c0_7, %c0_8] : memref<1x2xf32, #tpu.memory_space<vmem>>, vector<1x2xf32>
    %cst_9 = arith.constant dense<0.000000e+00> : vector<8xf32>
    %8 = vector.multi_reduction <add>, %5, %cst_9 [1] : vector<8x2xf32> to vector<8xf32>
    %9 = vector.shape_cast %8 : vector<8xf32> to vector<8x1xf32>
    %cst_10 = arith.constant 2.000000e+00 : f32
    %10 = vector.broadcast %cst_10 : f32 to vector<8x1xf32>
    %11 = arith.divf %9, %10 : vector<8x1xf32>
    %12 = vector.broadcast %11 : vector<8x1xf32> to vector<8x2xf32>
    %13 = arith.subf %5, %12 : vector<8x2xf32>
    %14 = arith.mulf %13, %13 : vector<8x2xf32>
    %cst_11 = arith.constant dense<0.000000e+00> : vector<8xf32>
    %15 = vector.multi_reduction <add>, %14, %cst_11 [1] : vector<8x2xf32> to vector<8xf32>
    %16 = vector.shape_cast %15 : vector<8xf32> to vector<8x1xf32>
    %cst_12 = arith.constant 2.000000e+00 : f32
    %17 = vector.broadcast %cst_12 : f32 to vector<8x1xf32>
    %18 = arith.divf %16, %17 : vector<8x1xf32>
    %19 = vector.broadcast %11 : vector<8x1xf32> to vector<8x2xf32>
    %20 = arith.subf %5, %19 : vector<8x2xf32>
    %cst_13 = arith.constant 9.99999974E-6 : f32
    %21 = vector.broadcast %cst_13 : f32 to vector<8x1xf32>
    %22 = arith.addf %18, %21 : vector<8x1xf32>
    %23 = math.rsqrt %22 : vector<8x1xf32>
    %24 = vector.broadcast %23 : vector<8x1xf32> to vector<8x2xf32>
    %25 = arith.mulf %20, %24 : vector<8x2xf32>
    %26 = vector.broadcast %6 : vector<1x2xf32> to vector<8x2xf32>
    %27 = arith.mulf %25, %26 : vector<8x2xf32>
    %28 = vector.broadcast %7 : vector<1x2xf32> to vector<8x2xf32>
    %29 = arith.addf %27, %28 : vector<8x2xf32>
    %c0_14 = arith.constant 0 : index
    %c0_15 = arith.constant 0 : index
    %30 = vector.load %arg6[%c0_14, %c0_15] : memref<8x2xf32, #tpu.memory_space<vmem>>, vector<8x2xf32>
    tpu.vector_store %arg6[%c0_14, %c0_15], %29 {strides = array<i32>} : memref<8x2xf32, #tpu.memory_space<vmem>>, vector<8x2xf32>,
    return
  }
  func.func @transform_0(%arg0: i32) -> (i32, i32) {
    %c0_i32 = arith.constant 0 : i32
    %c0_i32_0 = arith.constant 0 : i32
    %c0_i32_1 = arith.constant 0 : i32
    return %c0_i32, %c0_i32_0 : i32, i32
  }
  func.func @transform_1(%arg0: i32) -> (i32, i32) {
    %c0_i32 = arith.constant 0 : i32
    %c0_i32_0 = arith.constant 0 : i32
    %c0_i32_1 = arith.constant 0 : i32
    return %c0_i32, %c0_i32_0 : i32, i32
  }
  func.func @transform_2(%arg0: i32) -> (i32, i32) {
    %c0_i32 = arith.constant 0 : i32
    %c0_i32_0 = arith.constant 0 : i32
    %c0_i32_1 = arith.constant 0 : i32
    return %c0_i32, %c0_i32_0 : i32, i32
  }
  func.func @transform_3(%arg0: i32) -> (i32, i32) {
    %c0_i32 = arith.constant 0 : i32
    %c0_i32_0 = arith.constant 0 : i32
    %c0_i32_1 = arith.constant 0 : i32
    return %c0_i32, %c0_i32_0 : i32, i32
  }
  func.func @transform_4(%arg0: i32) -> (i32, i32) {
    %c0_i32 = arith.constant 0 : i32
    %c0_i32_0 = arith.constant 0 : i32
    %c0_i32_1 = arith.constant 0 : i32
    return %c0_i32, %c0_i32_0 : i32, i32
  }
  func.func @transform_5(%arg0: i32) -> (i32, i32) {
    %c0_i32 = arith.constant 0 : i32
    %c0_i32_0 = arith.constant 0 : i32
    %c0_i32_1 = arith.constant 0 : i32
    return %c0_i32, %c0_i32_0 : i32, i32
  }
}

</mosaic_0001>

<bundles_post_ra>
// kernel: custom-call
= control target key start
LH: loop header
LB: loop body
LE: loop exit
PB: predicated region body
PF: predicated region fallthrough
CT: control target
= control target key end

     0   :  { %2 = vsyncpa [#allocation0], 0  ;;  %s61_s0 = inlined_call_operand.hbm [shape: c64[2,1,4,2,16], index: 0, kind: input, shape index: {}]   ;;  %s62_s1 = inlined_call_operand.vmem [shape: f32[2,1,4,2,16], index: 1, kind: output, shape index: {}]  }
   0x1   :  { %s3_s8 = sshll.u32 %s62_s1, 4  ;;  %s9_s11 = scalar_lea.hbm %s61_s0, 256  ;;  %s4_s8 = int_to_ptr.vmem [resolvable:$true] %s3_s8 }
   0x2   :  { %p10_p0 = scmp.ne.s32.totalorder %s61_s0, %s9_s11  ;;  %s11_s16 = scalar_lea.hbm %s61_s0, 512 }
   0x3   :  { %p12_p1 = scmp.lt.u32.totalorder %s11_s16, %s9_s11  ;;  %p13_p2 = scmp.lt.u32.totalorder %s9_s11, %s61_s0 }
   0x5   :  { %p14_p3 = por %p13_p2, %p12_p1 }
   0x7   :  { %p15_p4 = pnand %p14_p3, %p10_p0 }
   0x9   :  { %18 = shalt.err (!%p15_p4)  }
   0xa   :  { %s19_s1 = scalar_lea.vmem %s4_s8, 256  ;;  %p24_p6 = scmp.lt.s32.totalorder %s4_s8, %s4_s8 }
   0xb   :  { %p20_p5 = scmp.ne.s32.totalorder %s4_s8, %s19_s1  ;;  %p25_p7 = scmp.lt.s32.totalorder %s19_s1, %s19_s1 }
   0xd   :  { %p26_p8 = por %p25_p7, %p24_p6 }
   0xf   :  { %p27_p9 = pnand %p26_p8, %p20_p5 }
  0x11   :  { %30 = shalt.err (!%p27_p9)  }
  0x12   :  { %6 = dma.hbm_to_vmem [thread:$0]  %s61_s0, 256, %s4_s8, [#allocation0] }
  0x13   :  { %31 = dma.done.wait [#allocation0], 256  }
  0x14   :  { %32 = vsyncadd [#allocation0], 4294967040 }
  0x15   :  { %8 = vsyncpa [#allocation0], 1 }

// kernel: custom-call.1
= control target key start
LH: loop header
LB: loop body
LE: loop exit
PB: predicated region body
PF: predicated region fallthrough
CT: control target
= control target key end

     0   :  { %s59_s0 = inlined_call_operand.hbm [shape: c64[2,1,4,2,16], index: 0, kind: input, shape index: {}]   ;;  %s60_s1 = inlined_call_operand.vmem [shape: f32[2,1,4,2,16], index: 1, kind: output, shape index: {}]  }
   0x1   :  { %s2_s8 = scalar_lea.hbm %s59_s0, 256 }
   0x2   :  { %3 = vsyncpa [#allocation0], 0  ;;  %s4_s11 = sshll.u32 %s60_s1, 4  ;;  %s34_s14 = scalar_lea.hbm %s59_s0, 512  ;;  %s5_s11 = int_to_ptr.vmem [resolvable:$true] %s4_s11 }
   0x3   :  { %p11_p0 = scmp.ne.s32.totalorder %s2_s8, %s34_s14  ;;  %p13_p1 = scmp.lt.u32.totalorder %s2_s8, %s59_s0 }
   0x4   :  { %p14_p2 = scmp.lt.u32.totalorder %s34_s14, %s34_s14  ;;  %p16_p4 = scmp.lt.u32.totalorder %s34_s14, %s2_s8 }
   0x6   :  { %p15_p3 = por %p14_p2, %p13_p1 }
   0x8   :  { %p17_p5 = por %p16_p4, %p15_p3 }
   0xa   :  { %p18_p6 = pnand %p17_p5, %p11_p0 }
   0xc   :  { %21 = shalt.err (!%p18_p6)  }
   0xd   :  { %s22_s17 = scalar_lea.vmem %s5_s11, 256  ;;  %p27_p8 = scmp.lt.s32.totalorder %s5_s11, %s5_s11 }
   0xe   :  { %p23_p7 = scmp.ne.s32.totalorder %s5_s11, %s22_s17  ;;  %p28_p9 = scmp.lt.s32.totalorder %s22_s17, %s22_s17 }
  0x10   :  { %p29_p10 = por %p28_p9, %p27_p8 }
  0x12   :  { %p30_p11 = pnand %p29_p10, %p23_p7 }
  0x14   :  { %33 = shalt.err (!%p30_p11)  }
  0x15   :  { %7 = dma.hbm_to_vmem [thread:$0]  %s2_s8, 256, %s5_s11, [#allocation0] }
  0x16   :  { %35 = dma.done.wait [#allocation0], 256  }
  0x17   :  { %36 = vsyncadd [#allocation0], 4294967040 }
  0x18   :  { %9 = vsyncpa [#allocation0], 1 }

// kernel: custom-call.2
= control target key start
LH: loop header
LB: loop body
LE: loop exit
PB: predicated region body
PF: predicated region fallthrough
CT: control target
= control target key end

     0   :  { %2 = vsyncpa [#allocation0], 0  ;;  %s61_s0 = inlined_call_operand.hbm [shape: c64[2,4,16,4], index: 0, kind: input, shape index: {}]   ;;  %s62_s1 = inlined_call_operand.vmem [shape: f32[2,4,16,4], index: 1, kind: output, shape index: {}]  }
   0x1   :  { %s3_s8 = sshll.u32 %s62_s1, 4  ;;  %s9_s11 = scalar_lea.hbm %s61_s0, 512  ;;  %s4_s8 = int_to_ptr.vmem [resolvable:$true] %s3_s8 }
   0x2   :  { %p10_p0 = scmp.ne.s32.totalorder %s61_s0, %s9_s11  ;;  %s11_s16 = scalar_lea.hbm %s61_s0, 1024 }
   0x3   :  { %p12_p1 = scmp.lt.u32.totalorder %s11_s16, %s9_s11  ;;  %p13_p2 = scmp.lt.u32.totalorder %s9_s11, %s61_s0 }
   0x5   :  { %p14_p3 = por %p13_p2, %p12_p1 }
   0x7   :  { %p15_p4 = pnand %p14_p3, %p10_p0 }
   0x9   :  { %18 = shalt.err (!%p15_p4)  }
   0xa   :  { %s19_s1 = scalar_lea.vmem %s4_s8, 512  ;;  %p24_p6 = scmp.lt.s32.totalorder %s4_s8, %s4_s8 }
   0xb   :  { %p20_p5 = scmp.ne.s32.totalorder %s4_s8, %s19_s1  ;;  %p25_p7 = scmp.lt.s32.totalorder %s19_s1, %s19_s1 }
   0xd   :  { %p26_p8 = por %p25_p7, %p24_p6 }
   0xf   :  { %p27_p9 = pnand %p26_p8, %p20_p5 }
  0x11   :  { %30 = shalt.err (!%p27_p9)  }
  0x12   :  { %6 = dma.hbm_to_vmem [thread:$0]  %s61_s0, 512, %s4_s8, [#allocation0] }
  0x13   :  { %31 = dma.done.wait [#allocation0], 512  }
  0x14   :  { %32 = vsyncadd [#allocation0], 4294966784 }
  0x15   :  { %8 = vsyncpa [#allocation0], 1 }

// kernel: custom-call.3
= control target key start
LH: loop header
LB: loop body
LE: loop exit
PB: predicated region body
PF: predicated region fallthrough
CT: control target
= control target key end

     0   :  { %s59_s0 = inlined_call_operand.hbm [shape: c64[2,4,16,4], index: 0, kind: input, shape index: {}]   ;;  %s60_s1 = inlined_call_operand.vmem [shape: f32[2,4,16,4], index: 1, kind: output, shape index: {}]  }
   0x1   :  { %s2_s8 = scalar_lea.hbm %s59_s0, 512 }
   0x2   :  { %3 = vsyncpa [#allocation0], 0  ;;  %s4_s11 = sshll.u32 %s60_s1, 4  ;;  %s34_s14 = scalar_lea.hbm %s59_s0, 1024  ;;  %s5_s11 = int_to_ptr.vmem [resolvable:$true] %s4_s11 }
   0x3   :  { %p11_p0 = scmp.ne.s32.totalorder %s2_s8, %s34_s14  ;;  %p13_p1 = scmp.lt.u32.totalorder %s2_s8, %s59_s0 }
   0x4   :  { %p14_p2 = scmp.lt.u32.totalorder %s34_s14, %s34_s14  ;;  %p16_p4 = scmp.lt.u32.totalorder %s34_s14, %s2_s8 }
   0x6   :  { %p15_p3 = por %p14_p2, %p13_p1 }
   0x8   :  { %p17_p5 = por %p16_p4, %p15_p3 }
   0xa   :  { %p18_p6 = pnand %p17_p5, %p11_p0 }
   0xc   :  { %21 = shalt.err (!%p18_p6)  }
   0xd   :  { %s22_s17 = scalar_lea.vmem %s5_s11, 512  ;;  %p27_p8 = scmp.lt.s32.totalorder %s5_s11, %s5_s11 }
   0xe   :  { %p23_p7 = scmp.ne.s32.totalorder %s5_s11, %s22_s17  ;;  %p28_p9 = scmp.lt.s32.totalorder %s22_s17, %s22_s17 }
  0x10   :  { %p29_p10 = por %p28_p9, %p27_p8 }
  0x12   :  { %p30_p11 = pnand %p29_p10, %p23_p7 }
  0x14   :  { %33 = shalt.err (!%p30_p11)  }
  0x15   :  { %7 = dma.hbm_to_vmem [thread:$0]  %s2_s8, 512, %s5_s11, [#allocation0] }
  0x16   :  { %35 = dma.done.wait [#allocation0], 512  }
  0x17   :  { %36 = vsyncadd [#allocation0], 4294966784 }
  0x18   :  { %9 = vsyncpa [#allocation0], 1 }

// kernel: neg.5
= control target key start
LH: loop header
LB: loop body
LE: loop exit
PB: predicated region body
PF: predicated region fallthrough
CT: control target
= control target key end

     0   :  { %s136_s0 = inlined_call_operand.vmem [shape: f32[2,4,16,4], index: 0, kind: input, shape index: {}]   ;;  %s137_s1 = inlined_call_operand.vmem [shape: f32[2,4,16,4], index: 1, kind: output, shape index: {}]  }
   0x1   :  { %v2_v0 = vld [vmem:[%s136_s0] sm:$0xf]  ;;  %v64_v1 = vld [vmem:[%s136_s0 + $0x10] sm:$0xf]  ;;  %v66_v2 = vld [vmem:[%s136_s0 + $0x4] sm:$0xf] }
   0x2   :  { %v5_v3 = vxor.u32 2147483648, %v2_v0  ;;  %v12_v4 = vxor.u32 2147483648, %v64_v1  ;;  %v20_v5 = vxor.u32 2147483648, %v66_v2  ;;  %v68_v6 = vld [vmem:[%s136_s0 + $0x14] sm:$0xf] }
   0x3   :  { %v28_v7 = vxor.u32 2147483648, %v68_v6  ;;  %v70_v8 = vld [vmem:[%s136_s0 + $0x8] sm:$0xf]  ;;  %v72_v9 = vld [vmem:[%s136_s0 + $0x18] sm:$0xf] }
   0x4   :  { %7 = vst [vmem:[%s137_s1] sm:$0xf] %v5_v3  ;;  %65 = vst [vmem:[%s137_s1 + $0x10] sm:$0xf] %v12_v4  ;;  %v36_v10 = vxor.u32 2147483648, %v70_v8  ;;  %v44_v11 = vxor.u32 2147483648, %v72_v9 }
   0x5   :  { %67 = vst [vmem:[%s137_s1 + $0x4] sm:$0xf] %v20_v5  ;;  %v74_v12 = vld [vmem:[%s136_s0 + $0xc] sm:$0xf]  ;;  %v76_v13 = vld [vmem:[%s136_s0 + $0x1c] sm:$0xf] }
   0x6   :  { %69 = vst [vmem:[%s137_s1 + $0x14] sm:$0xf] %v28_v7  ;;  %v52_v14 = vxor.u32 2147483648, %v74_v12  ;;  %v60_v15 = vxor.u32 2147483648, %v76_v13  ;;  %71 = vst [vmem:[%s137_s1 + $0x8] sm:$0xf] %v36_v10 }
   0x7   :  { %73 = vst [vmem:[%s137_s1 + $0x18] sm:$0xf] %v44_v11 }
   0x8   :  { %75 = vst [vmem:[%s137_s1 + $0xc] sm:$0xf] %v52_v14  ;;  %77 = vst [vmem:[%s137_s1 + $0x1c] sm:$0xf] %v60_v15 }

// kernel: custom-call.5
= control target key start
LH: loop header
LB: loop body
LE: loop exit
PB: predicated region body
PF: predicated region fallthrough
CT: control target
= control target key end

     0   :  { %s59_s0 = inlined_call_operand.hbm [shape: c64[2,1,4,2,4], index: 0, kind: input, shape index: {}]   ;;  %s60_s1 = inlined_call_operand.vmem [shape: f32[2,1,4,2,4], index: 1, kind: output, shape index: {}]  }
   0x1   :  { %s2_s8 = scalar_lea.hbm %s59_s0, 256 }
   0x2   :  { %3 = vsyncpa [#allocation0], 0  ;;  %s4_s11 = sshll.u32 %s60_s1, 4  ;;  %s34_s14 = scalar_lea.hbm %s59_s0, 512  ;;  %s5_s11 = int_to_ptr.vmem [resolvable:$true] %s4_s11 }
   0x3   :  { %p11_p0 = scmp.ne.s32.totalorder %s2_s8, %s34_s14  ;;  %p13_p1 = scmp.lt.u32.totalorder %s2_s8, %s59_s0 }
   0x4   :  { %p14_p2 = scmp.lt.u32.totalorder %s34_s14, %s34_s14  ;;  %p16_p4 = scmp.lt.u32.totalorder %s34_s14, %s2_s8 }
   0x6   :  { %p15_p3 = por %p14_p2, %p13_p1 }
   0x8   :  { %p17_p5 = por %p16_p4, %p15_p3 }
   0xa   :  { %p18_p6 = pnand %p17_p5, %p11_p0 }
   0xc   :  { %21 = shalt.err (!%p18_p6)  }
   0xd   :  { %s22_s17 = scalar_lea.vmem %s5_s11, 256  ;;  %p27_p8 = scmp.lt.s32.totalorder %s5_s11, %s5_s11 }
   0xe   :  { %p23_p7 = scmp.ne.s32.totalorder %s5_s11, %s22_s17  ;;  %p28_p9 = scmp.lt.s32.totalorder %s22_s17, %s22_s17 }
  0x10   :  { %p29_p10 = por %p28_p9, %p27_p8 }
  0x12   :  { %p30_p11 = pnand %p29_p10, %p23_p7 }
  0x14   :  { %33 = shalt.err (!%p30_p11)  }
  0x15   :  { %7 = dma.hbm_to_vmem [thread:$0]  %s2_s8, 256, %s5_s11, [#allocation0] }
  0x16   :  { %35 = dma.done.wait [#allocation0], 256  }
  0x17   :  { %36 = vsyncadd [#allocation0], 4294967040 }
  0x18   :  { %9 = vsyncpa [#allocation0], 1 }

// kernel: custom-call.4
= control target key start
LH: loop header
LB: loop body
LE: loop exit
PB: predicated region body
PF: predicated region fallthrough
CT: control target
= control target key end

     0   :  { %2 = vsyncpa [#allocation0], 0  ;;  %s61_s0 = inlined_call_operand.hbm [shape: c64[2,1,4,2,4], index: 0, kind: input, shape index: {}]   ;;  %s62_s1 = inlined_call_operand.vmem [shape: f32[2,1,4,2,4], index: 1, kind: output, shape index: {}]  }
   0x1   :  { %s3_s8 = sshll.u32 %s62_s1, 4  ;;  %s9_s11 = scalar_lea.hbm %s61_s0, 256  ;;  %s4_s8 = int_to_ptr.vmem [resolvable:$true] %s3_s8 }
   0x2   :  { %p10_p0 = scmp.ne.s32.totalorder %s61_s0, %s9_s11  ;;  %s11_s16 = scalar_lea.hbm %s61_s0, 512 }
   0x3   :  { %p12_p1 = scmp.lt.u32.totalorder %s11_s16, %s9_s11  ;;  %p13_p2 = scmp.lt.u32.totalorder %s9_s11, %s61_s0 }
   0x5   :  { %p14_p3 = por %p13_p2, %p12_p1 }
   0x7   :  { %p15_p4 = pnand %p14_p3, %p10_p0 }
   0x9   :  { %18 = shalt.err (!%p15_p4)  }
   0xa   :  { %s19_s1 = scalar_lea.vmem %s4_s8, 256  ;;  %p24_p6 = scmp.lt.s32.totalorder %s4_s8, %s4_s8 }
   0xb   :  { %p20_p5 = scmp.ne.s32.totalorder %s4_s8, %s19_s1  ;;  %p25_p7 = scmp.lt.s32.totalorder %s19_s1, %s19_s1 }
   0xd   :  { %p26_p8 = por %p25_p7, %p24_p6 }
   0xf   :  { %p27_p9 = pnand %p26_p8, %p20_p5 }
  0x11   :  { %30 = shalt.err (!%p27_p9)  }
  0x12   :  { %6 = dma.hbm_to_vmem [thread:$0]  %s61_s0, 256, %s4_s8, [#allocation0] }
  0x13   :  { %31 = dma.done.wait [#allocation0], 256  }
  0x14   :  { %32 = vsyncadd [#allocation0], 4294967040 }
  0x15   :  { %8 = vsyncpa [#allocation0], 1 }

// kernel: _lambda_.6
= control target key start
LH: loop header
LB: loop body
LE: loop exit
PB: predicated region body
PF: predicated region fallthrough
CT: control target
= control target key end

     0   :  { %v234_v0 = vmov 0.0|0.0   ;;  %vm235_vm0 = vmmov 0   ;;  %v236_v4 = vmov 0.0   ;;  %vm116_vm1 = vcmask 123904   ;;  %s333_s1 = inlined_call_operand.vmem [shape: f32[128,16], index: 1, kind: input, shape index: {}]   ;;  %s334_s0 = inlined_call_operand.vmem [shape: f32[2,128], index: 0, kind: input, shape index: {}]   ;;  %s335_s2 = inlined_call_operand.vmem [shape: f32[1,16], index: 2, kind: input, shape index: {}]   ;;  %s336_s3 = inlined_call_operand.vmem [shape: f32[1,16], index: 3, kind: input, shape index: {}]   ;;  %s337_s4 = inlined_call_operand.vmem [shape: f32[1,16], index: 4, kind: input, shape index: {}]   ;;  %s338_s5 = inlined_call_operand.vmem [shape: f32[2,16], index: 5, kind: output, shape index: {}]  }
   0x1   :  { %205 = vmatprep.subr.bf16.mxu0 %v234_v0  ;;  %v21_v1 = vld [vmem:[%s333_s1] sm:$0xff]  ;;  %v22_v2 = vld [vmem:[%s333_s1 + $0x8] sm:$0xff]  ;;  %v23_v3 = vld [vmem:[%s333_s1 + $0x10] sm:$0xff]  ;;  %202 = vmatprep.mubr.msk.f32.mxu0 %vm235_vm0, %v236_v4 }
   0x2   :  { %v206_v5 = vpack.c.bf16 %v22_v2, %v21_v1  ;;  %v24_v6 = vld [vmem:[%s333_s1 + $0x18] sm:$0xff]  ;;  %v25_v8 = vld [vmem:[%s333_s1 + $0x20] sm:$0xff]  ;;  %v26_v9 = vld [vmem:[%s333_s1 + $0x28] sm:$0xff] }
   0x3   :  { %v209_v7 = vpack.c.bf16 %v24_v6, %v23_v3  ;;  %v212_v10 = vpack.c.bf16 %v26_v9, %v25_v8  ;;  %v27_v11 = vld [vmem:[%s333_s1 + $0x30] sm:$0xff]  ;;  %v28_v12 = vld [vmem:[%s333_s1 + $0x38] sm:$0xff]  ;;  %v29_v14 = vld [vmem:[%s333_s1 + $0x40] sm:$0xff] }
   0x4   :  { %207 = vmatpush3.bf16.msra.mxu0 %v206_v5  ;;  %v215_v13 = vpack.c.bf16 %v28_v12, %v27_v11  ;;  %v30_v15 = vld [vmem:[%s333_s1 + $0x48] sm:$0xff]  ;;  %v31_v17 = vld [vmem:[%s333_s1 + $0x50] sm:$0xff]  ;;  %v32_v18 = vld [vmem:[%s333_s1 + $0x58] sm:$0xff] }
   0x5   :  { %208 = vmatprep.subr.bf16.mxu0 %v234_v0  ;;  %v218_v16 = vpack.c.bf16 %v30_v15, %v29_v14  ;;  %v221_v19 = vpack.c.bf16 %v32_v18, %v31_v17  ;;  %v33_v20 = vld [vmem:[%s333_s1 + $0x60] sm:$0xff]  ;;  %v34_v21 = vld [vmem:[%s333_s1 + $0x68] sm:$0xff]  ;;  %v35_v23 = vld [vmem:[%s333_s1 + $0x70] sm:$0xff] }
   0x6   :  { %v224_v22 = vpack.c.bf16 %v34_v21, %v33_v20  ;;  %v36_v24 = vld [vmem:[%s333_s1 + $0x78] sm:$0xff]  ;;  %v20_v26 = vld [vmem:[%s334_s0] sm:$0x3] }
   0x7   :  { %v227_v25 = vpack.c.bf16 %v36_v24, %v35_v23  ;;  %v150_v27 = vld [vmem:[%s335_s2] ss:$0 sm:$0xff] }
   0x8   :  { %210 = vmatpush3.bf16.msra.mxu0 %v209_v7  ;;  %v151_v41 = vld [vmem:[%s336_s3] ss:$0 sm:$0xff] }
   0x9   :  { %211 = vmatprep.subr.bf16.mxu0 %v234_v0  ;;  %v152_v43 = vld [vmem:[%s337_s4] ss:$0 sm:$0xff] }
   0xc   :  { %213 = vmatpush3.bf16.msra.mxu0 %v212_v10 }
   0xd   :  { %214 = vmatprep.subr.bf16.mxu0 %v234_v0 }
  0x10   :  { %216 = vmatpush3.bf16.msra.mxu0 %v215_v13 }
  0x11   :  { %217 = vmatprep.subr.bf16.mxu0 %v234_v0 }
  0x14   :  { %219 = vmatpush3.bf16.msra.mxu0 %v218_v16 }
  0x15   :  { %220 = vmatprep.subr.bf16.mxu0 %v234_v0 }
  0x18   :  { %222 = vmatpush3.bf16.msra.mxu0 %v221_v19 }
  0x19   :  { %223 = vmatprep.subr.bf16.mxu0 %v234_v0 }
  0x1c   :  { %225 = vmatpush3.bf16.msra.mxu0 %v224_v22 }
  0x1d   :  { %226 = vmatprep.subr.bf16.mxu0 %v234_v0 }
  0x20   :  { %228 = vmatpush3.bf16.msra.mxu0 %v227_v25 }
  0x23   :  { %203 = vmatmul.mubr.f32.vlgmr.msra.gmra.mrb[0].mxu0 %v20_v26 }
  0xf6   :  { %v110_v28 = vpop.f32.mrb[0].mxu0 }
  0xf7   :  { %v111_v29 = vadd.f32 %v150_v27, %v110_v28  ;;  %v204_v30 = vpop.f32.mrb[1].mxu0 }
  0xf9   :  { %v117_v31 = vsel %vm116_vm1, %v111_v29, 0.0 }
  0xfa   :  { %118 = vadd.xlane.f32.xlu0 %v117_v31 }
 0x187   :  { %v119_v32 = vpop.xlane.xlu0 %118 }
 0x188   :  { %v121_v33 = vmul.f32 0.0625, %v119_v32 }
 0x18a   :  { %v122_v34 = vsub.f32 %v111_v29, %v121_v33 }
 0x18c   :  { %v123_v35 = vmul.f32 %v122_v34, %v122_v34 }
 0x18e   :  { %v124_v36 = vsel %vm116_vm1, %v123_v35, 0.0 }
 0x18f   :  { %125 = vadd.xlane.f32.xlu0 %v124_v36 }
 0x21c   :  { %v126_v37 = vpop.xlane.xlu0 %125 }
 0x21d   :  { %v127_v38 = vmul.f32 0.0625, %v126_v37 }
 0x21f   :  { %v128_v39 = vadd.f32 1e-05, %v127_v38 }
 0x221   :  { %232 = vrsqrt.f32 %v128_v39 }
 0x22b   :  { %v233_v40 = vpop.eup %232 }
 0x22c   :  { %v130_v42 = vmul.f32 %v233_v40, %v122_v34 }
 0x22e   :  { %v137_v44 = vmul.f32 %v151_v41, %v130_v42 }
 0x230   :  { %v144_v45 = vadd.f32 %v152_v43, %v137_v44 }
 0x232   :  { %145 = vst.msk [vmem:[%s338_s5] sm:$0x3] %vm116_vm1, %v144_v45 }

// kernel: _lambda_.4
= control target key start
LH: loop header
LB: loop body
LE: loop exit
PB: predicated region body
PF: predicated region fallthrough
CT: control target
= control target key end

     0   :  { %s1911_s15 = smov 0   ;;  %s2091_s0 = inlined_call_operand.vmem [shape: f32[16,2,32], index: 0, kind: input, shape index: {}]   ;;  %s2092_s1 = inlined_call_operand.vmem [shape: f32[16,32,8], index: 1, kind: input, shape index: {}]   ;;  %s2093_s2 = inlined_call_operand.vmem [shape: f32[16,2,8], index: 2, kind: input, shape index: {}]   ;;  %s2094_s3 = inlined_call_operand.vmem [shape: f32[16,8,4], index: 3, kind: input, shape index: {}]   ;;  %s2095_s4 = inlined_call_operand.vmem [shape: f32[16,2,4], index: 4, kind: output, shape index: {}]  }
   0x1 LB: > { %s1597_s16 = sadd.s32 4294967295, %s1881_s15   ;;  %p1601_p0 = scmp.ge.s32.totalorder %s1881_s15, 1  ;;  %s1881_s15 = sphi %s1911_s15, %s14_s15  }
   0x2   : > { %p197_p1 = scmp.lt.s32.totalorder %s1881_s15, 3 }
   0x4   : > { %p198_p2 = pnand %p1601_p0, %p197_p1 }
   0x5   : > { %s1602_s17 = sshll.u32 (!%p198_p2), %s1597_s16, 3  ;;  %v1883_v0 = vmov (!%p198_p2), 0.0|0.0   ;;  %vm1884_vm0 = vmmov (!%p198_p2), 0   ;;  %v1885_v1 = vmov (!%p198_p2), 0.0   ;;  %vm318_vm1 = vcmask (!%p198_p2), 261120  }
   0x6   : > { %201 = sbr.rel (%p198_p2) target bundleno = 478 (0x1de), region = 36  ;;  %1816 = vmatprep.subr.bf16.mxu0 (!%p198_p2), %v1883_v0  ;;  %1822 = vmatprep.subr.bf16.mxu1 (!%p198_p2), %v1883_v0  ;;  %p240_p3 = scmp.lt.s32.totalorder (!%p198_p2), %s1602_s17, 15  ;;  %vm911_vm2 = vcmask (!%p198_p2), 64512   ;;  %vm1496_vm3 = vcmask (!%p198_p2), 25600  }
   0x7   : > { %1696 = vmatprep.mubr.msk.f32.mxu0 (!%p198_p2), %vm1884_vm0, %v1885_v1  ;;  %1707 = vmatprep.mubr.msk.f32.mxu1 (!%p198_p2), %vm1884_vm0, %v1885_v1 }
   0xd   : > { %s2097_s17 = smov (!%p240_p3, %s1602_s17), 15 }
   0xe   : > { %s1631_s18 = sshll.u32 %s2097_s17, 5  ;;  %s1940_s22 = sshll.u32 %s2097_s17, 1 }
   0xf   : > { %s1931_s21 = scalar_lea.vmem %s2092_s1, %s1631_s18  ;;  %s1949_s25 = scalar_lea.vmem %s2091_s0, %s1940_s22 }
  0x10   : > { %v278_v2 = vld [vmem:[%s1931_s21] sm:$0xff]  ;;  %v279_v3 = vld [vmem:[%s1931_s21 + $0x8] sm:$0xff]  ;;  %v280_v7 = vld [vmem:[%s1931_s21 + $0x10] sm:$0xff]  ;;  %s1610_s26 = sshll.u32 %s2097_s17, 3  ;;  %s2036_s6 = scalar_lea.vmem %s2093_s2, %s1940_s22 }
  0x11   : > { %v282_v4 = vld [vmem:[%s1931_s21 + $0x20] sm:$0xff]  ;;  %v1817_v5 = vpack.c.bf16 %v279_v3, %v278_v2  ;;  %v283_v6 = vld [vmem:[%s1931_s21 + $0x28] sm:$0xff]  ;;  %v281_v8 = vld [vmem:[%s1931_s21 + $0x18] sm:$0xff]  ;;  %s2026_s29 = scalar_lea.vmem %s2094_s3, %s1610_s26  ;;  %s268_s9 = scalar_lea.vmem %s2095_s4, %s1940_s22 }
  0x12   : > { %v1823_v9 = vpack.c.bf16 %v283_v6, %v282_v4  ;;  %v284_v10 = vld [vmem:[%s1931_s21 + $0x30] sm:$0xff]  ;;  %v285_v11 = vld [vmem:[%s1931_s21 + $0x38] sm:$0xff]  ;;  %v1820_v12 = vpack.c.bf16 %v281_v8, %v280_v7  ;;  %v286_v14 = vld [vmem:[%s1931_s21 + $0x40] sm:$0xff] }
  0x13   : > { %1818 = vmatpush3.bf16.msra.mxu0 %v1817_v5  ;;  %v1826_v13 = vpack.c.bf16 %v285_v11, %v284_v10  ;;  %v287_v15 = vld [vmem:[%s1931_s21 + $0x48] sm:$0xff]  ;;  %v290_v16 = vld [vmem:[%s1931_s21 + $0x60] sm:$0xff]  ;;  %v288_v22 = vld [vmem:[%s1931_s21 + $0x50] sm:$0xff] }
  0x14   : > { %1824 = vmatpush3.bf16.msra.mxu1 %v1823_v9  ;;  %1819 = vmatprep.subr.bf16.mxu0 %v1883_v0  ;;  %v291_v17 = vld [vmem:[%s1931_s21 + $0x68] sm:$0xff]  ;;  %v270_v18 = vld [vmem:[%s1949_s25] sm:$0x3]  ;;  %v1829_v19 = vpack.c.bf16 %v287_v15, %v286_v14  ;;  %v271_v20 = vld [vmem:[%s1949_s25 + $0x2] sm:$0x3] }
  0x15   : > { %1825 = vmatprep.subr.bf16.mxu1 %v1883_v0  ;;  %v1835_v21 = vpack.c.bf16 %v291_v17, %v290_v16  ;;  %v289_v23 = vld [vmem:[%s1931_s21 + $0x58] sm:$0xff]  ;;  %v292_v24 = vld [vmem:[%s1931_s21 + $0x70] sm:$0xff]  ;;  %v294_v28 = vld [vmem:[%s1931_s21 + $0x80] sm:$0xff] }
  0x16   : > { %v293_v25 = vld [vmem:[%s1931_s21 + $0x78] sm:$0xff]  ;;  %v1832_v26 = vpack.c.bf16 %v289_v23, %v288_v22  ;;  %v295_v29 = vld [vmem:[%s1931_s21 + $0x88] sm:$0xff]  ;;  %v298_v30 = vld [vmem:[%s1931_s21 + $0xa0] sm:$0xff] }
  0x17   : > { %1821 = vmatpush3.bf16.msra.mxu0 %v1820_v12  ;;  %v1838_v27 = vpack.c.bf16 %v293_v25, %v292_v24  ;;  %v299_v31 = vld [vmem:[%s1931_s21 + $0xa8] sm:$0xff]  ;;  %v272_v32 = vld [vmem:[%s1949_s25 + $0x4] sm:$0x3]  ;;  %v1841_v33 = vpack.c.bf16 %v295_v29, %v294_v28  ;;  %v273_v34 = vld [vmem:[%s1949_s25 + $0x6] sm:$0x3] }
  0x18   : > { %1827 = vmatpush3.bf16.msra.mxu1 %v1826_v13  ;;  %1828 = vmatprep.subr.bf16.mxu0 %v1883_v0  ;;  %v1847_v35 = vpack.c.bf16 %v299_v31, %v298_v30  ;;  %v296_v36 = vld [vmem:[%s1931_s21 + $0x90] sm:$0xff]  ;;  %v297_v37 = vld [vmem:[%s1931_s21 + $0x98] sm:$0xff]  ;;  %v302_v42 = vld [vmem:[%s1931_s21 + $0xc0] sm:$0xff] }
  0x19   : > { %1834 = vmatprep.subr.bf16.mxu1 %v1883_v0  ;;  %v300_v38 = vld [vmem:[%s1931_s21 + $0xb0] sm:$0xff]  ;;  %v301_v39 = vld [vmem:[%s1931_s21 + $0xb8] sm:$0xff]  ;;  %v1844_v40 = vpack.c.bf16 %v297_v37, %v296_v36  ;;  %v303_v43 = vld [vmem:[%s1931_s21 + $0xc8] sm:$0xff] }
  0x1a   : > { %1697 = vmatmul.mubr.msk.f32.vlgmr.msra.gmra.mrb[0].mxu0 %vm318_vm1, %v270_v18  ;;  %v1850_v41 = vpack.c.bf16 %v301_v39, %v300_v38  ;;  %v306_v44 = vld [vmem:[%s1931_s21 + $0xe0] sm:$0xff]  ;;  %v307_v45 = vld [vmem:[%s1931_s21 + $0xe8] sm:$0xff]  ;;  %v1853_v47 = vpack.c.bf16 %v303_v43, %v302_v42  ;;  %v304_v50 = vld [vmem:[%s1931_s21 + $0xd0] sm:$0xff] }
  0x1b   : > { %1708 = vmatmul.mubr.msk.f32.vlgmr.msra.gmra.mrb[0].mxu1 %vm318_vm1, %v271_v20  ;;  %1830 = vmatpush3.bf16.msra.mxu0 %v1829_v19  ;;  %v274_v46 = vld [vmem:[%s1949_s25 + $0x8] sm:$0x3]  ;;  %v275_v48 = vld [vmem:[%s1949_s25 + $0xa] sm:$0x3]  ;;  %v1859_v49 = vpack.c.bf16 %v307_v45, %v306_v44  ;;  %v305_v51 = vld [vmem:[%s1931_s21 + $0xd8] sm:$0xff] }
  0x1c   : > { %1836 = vmatpush3.bf16.msra.mxu1 %v1835_v21  ;;  %1831 = vmatprep.subr.bf16.mxu0 %v1883_v0  ;;  %v308_v52 = vld [vmem:[%s1931_s21 + $0xf0] sm:$0xff]  ;;  %v309_v53 = vld [vmem:[%s1931_s21 + $0xf8] sm:$0xff]  ;;  %v1856_v54 = vpack.c.bf16 %v305_v51, %v304_v50  ;;  %v276_v56 = vld [vmem:[%s1949_s25 + $0xc] sm:$0x3] }
  0x1d   : > { %1837 = vmatprep.subr.bf16.mxu1 %v1883_v0  ;;  %1718 = vmatprep.mubr.msk.f32.mxu0 %vm1884_vm0, %v1885_v1  ;;  %v1862_v55 = vpack.c.bf16 %v309_v53, %v308_v52  ;;  %v277_v57 = vld [vmem:[%s1949_s25 + $0xe] sm:$0x3]  ;;  %v903_v58 = vld [vmem:[%s2026_s29] sm:$0xff]  ;;  %v905_v3 = vld [vmem:[%s2026_s29 + $0x10] sm:$0xff] }
  0x1e   : > { %1729 = vmatprep.mubr.msk.f32.mxu1 %vm1884_vm0, %v1885_v1  ;;  %v904_v59 = vld [vmem:[%s2026_s29 + $0x8] sm:$0xff]  ;;  %v310_v60 = vld [vmem:[%s2036_s6] sm:$0x3]  ;;  %v311_v61 = vld [vmem:[%s2036_s6 + $0x2] sm:$0x3] }
  0x1f   : > { %1833 = vmatpush3.bf16.msra.mxu0 %v1832_v26  ;;  %v906_v6 = vld [vmem:[%s2026_s29 + $0x18] sm:$0xff]  ;;  %v312_v7 = vld [vmem:[%s2036_s6 + $0x4] sm:$0x3]  ;;  %v313_v8 = vld [vmem:[%s2036_s6 + $0x6] sm:$0x3] }
  0x20   : > { %1839 = vmatpush3.bf16.msra.mxu1 %v1838_v27  ;;  %1840 = vmatprep.subr.bf16.mxu0 %v1883_v0  ;;  %v907_v13 = vld [vmem:[%s2026_s29 + $0x20] sm:$0xff]  ;;  %v908_v16 = vld [vmem:[%s2026_s29 + $0x28] sm:$0xff]  ;;  %v909_v23 = vld [vmem:[%s2026_s29 + $0x30] sm:$0xff] }
  0x21   : > { %1846 = vmatprep.subr.bf16.mxu1 %v1883_v0  ;;  %v314_v17 = vld [vmem:[%s2036_s6 + $0x8] sm:$0x3]  ;;  %v315_v18 = vld [vmem:[%s2036_s6 + $0xa] sm:$0x3]  ;;  %v910_v26 = vld [vmem:[%s2026_s29 + $0x38] sm:$0xff] }
  0x22   : > { %1719 = vmatmul.mubr.msk.f32.vlgmr.msra.gmra.mrb[2].mxu0 %vm318_vm1, %v272_v32  ;;  %v316_v27 = vld [vmem:[%s2036_s6 + $0xc] sm:$0x3]  ;;  %v317_v28 = vld [vmem:[%s2036_s6 + $0xe] sm:$0x3] }
  0x23   : > { %1730 = vmatmul.mubr.msk.f32.vlgmr.msra.gmra.mrb[2].mxu1 %vm318_vm1, %v273_v34  ;;  %1842 = vmatpush3.bf16.msra.mxu0 %v1841_v33 }
  0x24   : > { %1848 = vmatpush3.bf16.msra.mxu1 %v1847_v35  ;;  %1843 = vmatprep.subr.bf16.mxu0 %v1883_v0 }
  0x25   : > { %1849 = vmatprep.subr.bf16.mxu1 %v1883_v0  ;;  %1740 = vmatprep.mubr.msk.f32.mxu0 %vm1884_vm0, %v1885_v1 }
  0x26   : > { %1751 = vmatprep.mubr.msk.f32.mxu1 %vm1884_vm0, %v1885_v1 }
  0x27   : > { %1845 = vmatpush3.bf16.msra.mxu0 %v1844_v40 }
  0x28   : > { %1851 = vmatpush3.bf16.msra.mxu1 %v1850_v41  ;;  %1852 = vmatprep.subr.bf16.mxu0 %v1883_v0 }
  0x29   : > { %1858 = vmatprep.subr.bf16.mxu1 %v1883_v0 }
  0x2a   : > { %1741 = vmatmul.mubr.msk.f32.vlgmr.msra.gmra.mrb[4].mxu0 %vm318_vm1, %v274_v46 }
  0x2b   : > { %1752 = vmatmul.mubr.msk.f32.vlgmr.msra.gmra.mrb[4].mxu1 %vm318_vm1, %v275_v48  ;;  %1854 = vmatpush3.bf16.msra.mxu0 %v1853_v47 }
  0x2c   : > { %1860 = vmatpush3.bf16.msra.mxu1 %v1859_v49  ;;  %1855 = vmatprep.subr.bf16.mxu0 %v1883_v0 }
  0x2d   : > { %1861 = vmatprep.subr.bf16.mxu1 %v1883_v0  ;;  %1762 = vmatprep.mubr.msk.f32.mxu0 %vm1884_vm0, %v1885_v1 }
  0x2e   : > { %1773 = vmatprep.mubr.msk.f32.mxu1 %vm1884_vm0, %v1885_v1 }
  0x2f   : > { %1857 = vmatpush3.bf16.msra.mxu0 %v1856_v54 }
  0x30   : > { %1863 = vmatpush3.bf16.msra.mxu1 %v1862_v55  ;;  %1776 = vmatprep.subr.mxu0 %v1885_v1 }
  0x31   : > { %1781 = vmatprep.subr.mxu1 %v1885_v1 }
  0x32   : > { %1763 = vmatmul.mubr.msk.f32.vlgmr.msra.gmra.mrb[6].mxu0 %vm318_vm1, %v276_v56 }
  0x33   : > { %1774 = vmatmul.mubr.msk.f32.vlgmr.msra.gmra.mrb[6].mxu1 %vm318_vm1, %v277_v57  ;;  %1778 = vmatprep.mubr.msk.f32.mxu0 %vm1884_vm0, %v1885_v1 }
  0x34   : > { %1783 = vmatprep.mubr.msk.f32.mxu1 %vm1884_vm0, %v1885_v1  ;;  %1777 = vmatpush3.msra.mxu0 %v903_v58 }
  0x35   : > { %1782 = vmatpush3.msra.mxu1 %v904_v59  ;;  %1786 = vmatprep.subr.mxu0 %v1885_v1 }
  0x36   : > { %1791 = vmatprep.subr.mxu1 %v1885_v1 }
  0xed   : > { %v388_v62 = vpop.f32.mrb[0].mxu0 }
  0xee   : > { %v389_v63 = vadd.f32 %v388_v62, %v310_v60  ;;  %v461_v0 = vpop.f32.mrb[0].mxu1  ;;  %v1698_v2 = vpop.f32.mrb[1].mxu0 }
  0xef   : > { %v462_v4 = vadd.f32 %v461_v0, %v311_v61  ;;  %v1709_v5 = vpop.f32.mrb[1].mxu1 }
  0xf0   : > { %1779 = vmatmul.mubr.msk.f32.vlgmr.msra.gmra.mrb[8].mxu0 %vm911_vm2, %v389_v63 }
  0xf1   : > { %1784 = vmatmul.mubr.msk.f32.vlgmr.msra.gmra.mrb[8].mxu1 %vm911_vm2, %v462_v4  ;;  %1787 = vmatpush3.msra.mxu0 %v905_v3 }
  0xf2   : > { %1788 = vmatprep.mubr.msk.f32.mxu0 %vm1884_vm0, %v1885_v1  ;;  %1792 = vmatpush3.msra.mxu1 %v906_v6 }
  0xf3   : > { %1793 = vmatprep.mubr.msk.f32.mxu1 %vm1884_vm0, %v1885_v1  ;;  %1796 = vmatprep.subr.mxu0 %v1885_v1 }
  0xf4   : > { %1801 = vmatprep.subr.mxu1 %v1885_v1 }
  0xf5   : > { %v534_v9 = vpop.f32.mrb[2].mxu0 }
  0xf6   : > { %v535_v10 = vadd.f32 %v534_v9, %v312_v7  ;;  %v607_v11 = vpop.f32.mrb[2].mxu1  ;;  %v1720_v12 = vpop.f32.mrb[3].mxu0 }
  0xf7   : > { %v608_v14 = vadd.f32 %v607_v11, %v313_v8  ;;  %v1731_v15 = vpop.f32.mrb[3].mxu1 }
  0xf8   : > { %1789 = vmatmul.mubr.msk.f32.vlgmr.msra.gmra.mrb[10].mxu0 %vm911_vm2, %v535_v10 }
  0xf9   : > { %1794 = vmatmul.mubr.msk.f32.vlgmr.msra.gmra.mrb[10].mxu1 %vm911_vm2, %v608_v14  ;;  %1797 = vmatpush3.msra.mxu0 %v907_v13 }
  0xfa   : > { %1798 = vmatprep.mubr.msk.f32.mxu0 %vm1884_vm0, %v1885_v1  ;;  %1802 = vmatpush3.msra.mxu1 %v908_v16 }
  0xfb   : > { %1803 = vmatprep.mubr.msk.f32.mxu1 %vm1884_vm0, %v1885_v1  ;;  %1806 = vmatprep.subr.mxu0 %v1885_v1 }
  0xfc   : > { %1811 = vmatprep.subr.mxu1 %v1885_v1 }
  0xfd   : > { %v680_v19 = vpop.f32.mrb[4].mxu0 }
  0xfe   : > { %v681_v20 = vadd.f32 %v680_v19, %v314_v17  ;;  %v753_v21 = vpop.f32.mrb[4].mxu1  ;;  %v1742_v22 = vpop.f32.mrb[5].mxu0 }
  0xff   : > { %v754_v24 = vadd.f32 %v753_v21, %v315_v18  ;;  %v1753_v25 = vpop.f32.mrb[5].mxu1 }
 0x100   : > { %1799 = vmatmul.mubr.msk.f32.vlgmr.msra.gmra.mrb[12].mxu0 %vm911_vm2, %v681_v20 }
 0x101   : > { %1804 = vmatmul.mubr.msk.f32.vlgmr.msra.gmra.mrb[12].mxu1 %vm911_vm2, %v754_v24  ;;  %1807 = vmatpush3.msra.mxu0 %v909_v23 }
 0x102   : > { %1812 = vmatpush3.msra.mxu1 %v910_v26  ;;  %1808 = vmatprep.mubr.msk.f32.mxu0 %vm1884_vm0, %v1885_v1 }
 0x103   : > { %1813 = vmatprep.mubr.msk.f32.mxu1 %vm1884_vm0, %v1885_v1 }
 0x105   : > { %v826_v29 = vpop.f32.mrb[6].mxu0 }
 0x106   : > { %v827_v30 = vadd.f32 %v826_v29, %v316_v27  ;;  %v899_v31 = vpop.f32.mrb[6].mxu1  ;;  %v1764_v32 = vpop.f32.mrb[7].mxu0 }
 0x107   : > { %v900_v33 = vadd.f32 %v899_v31, %v317_v28  ;;  %v1775_v34 = vpop.f32.mrb[7].mxu1 }
 0x108   : > { %1809 = vmatmul.mubr.msk.f32.vlgmr.msra.gmra.mrb[14].mxu0 %vm911_vm2, %v827_v30 }
 0x109   : > { %1814 = vmatmul.mubr.msk.f32.vlgmr.msra.gmra.mrb[14].mxu1 %vm911_vm2, %v900_v33 }
 0x1c3   : > { %v981_v35 = vpop.f32.mrb[8].mxu0 }
 0x1c4   : > { %1497 = vst.msk [vmem:[%s268_s9] sm:$0x3] %vm1496_vm3, %v981_v35  ;;  %v1054_v1 = vpop.f32.mrb[8].mxu1  ;;  %v1780_v36 = vpop.f32.mrb[9].mxu0 }
 0x1c5   : > { %1498 = vst.msk [vmem:[%s268_s9 + $0x2] sm:$0x3] %vm1496_vm3, %v1054_v1  ;;  %v1785_v37 = vpop.f32.mrb[9].mxu1 }
 0x1cb   : > { %v1127_v38 = vpop.f32.mrb[10].mxu0 }
 0x1cc   : > { %1499 = vst.msk [vmem:[%s268_s9 + $0x4] sm:$0x3] %vm1496_vm3, %v1127_v38  ;;  %v1200_v39 = vpop.f32.mrb[10].mxu1  ;;  %v1790_v40 = vpop.f32.mrb[11].mxu0 }
 0x1cd   : > { %1500 = vst.msk [vmem:[%s268_s9 + $0x6] sm:$0x3] %vm1496_vm3, %v1200_v39  ;;  %v1795_v41 = vpop.f32.mrb[11].mxu1 }
 0x1d3   : > { %v1273_v42 = vpop.f32.mrb[12].mxu0 }
 0x1d4   : > { %1501 = vst.msk [vmem:[%s268_s9 + $0x8] sm:$0x3] %vm1496_vm3, %v1273_v42  ;;  %v1346_v43 = vpop.f32.mrb[12].mxu1  ;;  %v1800_v44 = vpop.f32.mrb[13].mxu0 }
 0x1d5   : > { %1502 = vst.msk [vmem:[%s268_s9 + $0xa] sm:$0x3] %vm1496_vm3, %v1346_v43  ;;  %v1805_v45 = vpop.f32.mrb[13].mxu1 }
 0x1db   : > { %v1419_v46 = vpop.f32.mrb[14].mxu0 }
 0x1dc   : > { %1503 = vst.msk [vmem:[%s268_s9 + $0xc] sm:$0x3] %vm1496_vm3, %v1419_v46  ;;  %v1492_v47 = vpop.f32.mrb[14].mxu1  ;;  %v1810_v48 = vpop.f32.mrb[15].mxu0 }
 0x1dd   : > { %1504 = vst.msk [vmem:[%s268_s9 + $0xe] sm:$0x3] %vm1496_vm3, %v1492_v47  ;;  %v1815_v49 = vpop.f32.mrb[15].mxu1 }
 0x1de PF: > { %s14_s15 = sadd.s32 1, %s1881_s15  }
 0x1df   : > { %p11_p4 = scmp.ge.s32.totalorder %s14_s15, 4  }
 0x1e1   :  { %13 = sbr.rel (!%p11_p4) target bundleno = 1 (0x1), region = 75 }

// kernel: custom-call.6
= control target key start
LH: loop header
LB: loop body
LE: loop exit
PB: predicated region body
PF: predicated region fallthrough
CT: control target
= control target key end

     0   :  { %s126_s0 = inlined_call_operand.vmem [shape: f32[2,4,16,16], index: 0, kind: input, shape index: {}]   ;;  %s127_s1 = inlined_call_operand.vmem [shape: f32[2,4,16,16], index: 1, kind: input, shape index: {}]   ;;  %s128_s2 = inlined_call_operand.hbm [shape: c64[2,4,16,16], index: 2, kind: output, shape index: {}]  }
   0x1   :  { %s87_s11 = scalar_lea.hbm %s128_s2, 2048 }
   0x2   :  { %4 = vsyncpa [#allocation0], 0  ;;  %s5_s14 = sshll.u32 %s126_s0, 4  ;;  %s6_s14 = int_to_ptr.vmem [resolvable:$true] %s5_s14 }
   0x3   :  { %s18_s15 = scalar_lea.vmem %s6_s14, 2048  ;;  %p23_p1 = scmp.lt.s32.totalorder %s6_s14, %s6_s14 }
   0x4   :  { %p19_p0 = scmp.ne.s32.totalorder %s6_s14, %s18_s15  ;;  %p24_p2 = scmp.lt.s32.totalorder %s18_s15, %s18_s15 }
   0x6   :  { %p25_p3 = por %p24_p2, %p23_p1 }
   0x8   :  { %p26_p4 = pnand %p25_p3, %p19_p0 }
   0xa   :  { %29 = shalt.err (!%p26_p4)  }
   0xb   :  { %p31_p5 = scmp.ne.s32.totalorder %s128_s2, %s87_s11  ;;  %s32_s0 = scalar_lea.hbm %s128_s2, 4096 }
   0xc   :  { %p33_p6 = scmp.lt.u32.totalorder %s32_s0, %s87_s11  ;;  %p34_p7 = scmp.lt.u32.totalorder %s87_s11, %s128_s2 }
   0xe   :  { %p35_p8 = por %p34_p7, %p33_p6 }
  0x10   :  { %p36_p9 = pnand %p35_p8, %p31_p5 }
  0x12   :  { %39 = shalt.err (!%p36_p9)  }
  0x13   :  { %8 = dma.vmem_to_hbm [thread:$0]  %s6_s14, 2048, %s128_s2, [#allocation0] }
  0x14   :  { %65 = dma.done.wait [#allocation0], 2048  }
  0x15   :  { %66 = vsyncadd [#allocation0], 4294965248 }
  0x16   :  { %10 = vsyncpa [#allocation0], 1 }
  0x17   :  { %11 = vsyncpa [#allocation1], 0  ;;  %s12_s28 = sshll.u32 %s127_s1, 4  ;;  %s13_s28 = int_to_ptr.vmem [resolvable:$true] %s12_s28 }
  0x18   :  { %s40_s29 = scalar_lea.vmem %s13_s28, 2048  ;;  %p45_p11 = scmp.lt.s32.totalorder %s13_s28, %s13_s28 }
  0x19   :  { %p41_p10 = scmp.ne.s32.totalorder %s13_s28, %s40_s29  ;;  %p46_p12 = scmp.lt.s32.totalorder %s40_s29, %s40_s29 }
  0x1b   :  { %p47_p13 = por %p46_p12, %p45_p11 }
  0x1d   :  { %p48_p0 = pnand %p47_p13, %p41_p10 }
  0x1f   :  { %51 = shalt.err (!%p48_p0)  }
  0x20   :  { %p53_p1 = scmp.ne.s32.totalorder %s87_s11, %s32_s0  ;;  %p56_p2 = scmp.lt.u32.totalorder %s32_s0, %s32_s0 }
  0x22   :  { %p57_p3 = por %p56_p2, %p34_p7 }
  0x24   :  { %p59_p4 = por %p57_p3, %p33_p6 }
  0x26   :  { %p60_p5 = pnand %p59_p4, %p53_p1 }
  0x28   :  { %63 = shalt.err (!%p60_p5)  }
  0x29   :  { %15 = dma.vmem_to_hbm [thread:$0]  %s13_s28, 2048, %s87_s11, [#allocation1] }
  0x2a   :  { %67 = dma.done.wait [#allocation1], 2048  }
  0x2b   :  { %68 = vsyncadd [#allocation1], 4294965248 }
  0x2c   :  { %17 = vsyncpa [#allocation1], 1 }

// kernel: custom-call.7
= control target key start
LH: loop header
LB: loop body
LE: loop exit
PB: predicated region body
PF: predicated region fallthrough
CT: control target
= control target key end

     0   :  { %s62_s0 = inlined_call_operand.vmem [shape: f32[2,4,4,2], index: 0, kind: input, shape index: {}]   ;;  %s63_s1 = inlined_call_operand.vmem [shape: f32[2,4,4,2], index: 1, kind: input, shape index: {}]   ;;  %s64_s2 = inlined_call_operand.vmem [shape: c64[2,4,4,2], index: 2, kind: output, shape index: {}]  }
   0x1   :  { %v5_v0 = vld [vmem:[%s62_s0] sm:$0xff]  ;;  %v18_v1 = vld [vmem:[%s62_s0 + $0x8] sm:$0xff] }
   0x2   :  { %v11_v2 = vld [vmem:[%s63_s1] sm:$0xff]  ;;  %6 = vst [vmem:[%s64_s2] sm:$0xff] %v5_v0  ;;  %19 = vst [vmem:[%s64_s2 + $0x8] sm:$0xff] %v18_v1  ;;  %v21_v3 = vld [vmem:[%s63_s1 + $0x8] sm:$0xff] }
   0x3   :  { %20 = vst [vmem:[%s64_s2 + $0x10] sm:$0xff] %v11_v2  ;;  %22 = vst [vmem:[%s64_s2 + $0x18] sm:$0xff] %v21_v3 }

// kernel: _lambda_.7
= control target key start
LH: loop header
LB: loop body
LE: loop exit
PB: predicated region body
PF: predicated region fallthrough
CT: control target
= control target key end

     0   :  { %vm33_vm0 = vcmask 1043456   ;;  %vm29_vm1 = vcmask 31744   ;;  %v159_v0 = vmov 0.0   ;;  %vm160_vm2 = vmmov 0   ;;  %s212_s1 = inlined_call_operand.vmem [shape: f32[4,2], index: 1, kind: input, shape index: {}]   ;;  %s213_s0 = inlined_call_operand.vmem [shape: f32[8,4], index: 0, kind: input, shape index: {}]   ;;  %s214_s2 = inlined_call_operand.vmem [shape: f32[1,2], index: 2, kind: input, shape index: {}]   ;;  %s215_s3 = inlined_call_operand.vmem [shape: f32[1,2], index: 3, kind: input, shape index: {}]   ;;  %s216_s4 = inlined_call_operand.vmem [shape: f32[1,2], index: 4, kind: input, shape index: {}]   ;;  %s217_s5 = inlined_call_operand.vmem [shape: f32[8,2], index: 5, kind: output, shape index: {}]  }
   0x1   :  { %150 = vmatprep.subr.mxu0 %v159_v0  ;;  %v21_v1 = vld [vmem:[%s212_s1] sm:$0xf]  ;;  %152 = vmatprep.mubr.msk.f32.mxu0 %vm160_vm2, %v159_v0  ;;  %vm109_vm3 = vcmask 15360  }
   0x2   :  { %v20_v2 = vld [vmem:[%s213_s0] sm:$0xff]  ;;  %151 = vmatpush3.msk.msra.mxu0 %vm33_vm0, %v21_v1 }
   0x3   :  { %153 = vmatmul.mubr.msk.f32.vlgmr.msra.gmra.mrb[0].mxu0 %vm29_vm1, %v20_v2  ;;  %v143_v3 = vld [vmem:[%s214_s2] ss:$0 sm:$0xff] }
   0x4   :  { %v146_v17 = vld [vmem:[%s215_s3] ss:$0 sm:$0xff] }
   0x5   :  { %v147_v19 = vld [vmem:[%s216_s4] ss:$0 sm:$0xff] }
  0xd6   :  { %v103_v4 = vpop.f32.mrb[0].mxu0 }
  0xd7   :  { %v104_v5 = vadd.f32 %v143_v3, %v103_v4  ;;  %v154_v6 = vpop.f32.mrb[1].mxu0 }
  0xd9   :  { %v110_v7 = vsel %vm109_vm3, %v104_v5, 0.0 }
  0xda   :  { %111 = vadd.xlane.f32.xlu0 %v110_v7 }
 0x167   :  { %v112_v8 = vpop.xlane.xlu0 %111 }
 0x168   :  { %v114_v9 = vmul.f32 0.5, %v112_v8 }
 0x16a   :  { %v115_v10 = vsub.f32 %v104_v5, %v114_v9 }
 0x16c   :  { %v116_v11 = vmul.f32 %v115_v10, %v115_v10 }
 0x16e   :  { %v117_v12 = vsel %vm109_vm3, %v116_v11, 0.0 }
 0x16f   :  { %118 = vadd.xlane.f32.xlu0 %v117_v12 }
 0x1fc   :  { %v119_v13 = vpop.xlane.xlu0 %118 }
 0x1fd   :  { %v120_v14 = vmul.f32 0.5, %v119_v13 }
 0x1ff   :  { %v121_v15 = vadd.f32 1e-05, %v120_v14 }
 0x201   :  { %157 = vrsqrt.f32 %v121_v15 }
 0x20b   :  { %v158_v16 = vpop.eup %157 }
 0x20c   :  { %v123_v18 = vmul.f32 %v158_v16, %v115_v10 }
 0x20e   :  { %v130_v20 = vmul.f32 %v146_v17, %v123_v18 }
 0x210   :  { %v137_v21 = vadd.f32 %v147_v19, %v130_v20 }
 0x212   :  { %138 = vst.msk [vmem:[%s217_s5] sm:$0xff] %vm109_vm3, %v137_v21 }

// kernel: _lambda_.5
= control target key start
LH: loop header
LB: loop body
LE: loop exit
PB: predicated region body
PF: predicated region fallthrough
CT: control target
= control target key end

     0   :  { %s3500_s0 = inlined_call_operand.vmem [shape: f32[2,4,16], index: 0, kind: input, shape index: {}]   ;;  %s3501_s1 = inlined_call_operand.vmem [shape: f32[2,1,16], index: 1, kind: input, shape index: {}]   ;;  %s3502_s2 = inlined_call_operand.vmem [shape: f32[2,1,16], index: 2, kind: input, shape index: {}]   ;;  %s3503_s3 = inlined_call_operand.vmem [shape: f32[2,64,4], index: 3, kind: input, shape index: {}]   ;;  %s3504_s4 = inlined_call_operand.vmem [shape: f32[2,64,1], index: 4, kind: input, shape index: {}]   ;;  %s3505_s5 = inlined_call_operand.vmem [shape: f32[2,4,64], index: 5, kind: input, shape index: {}]   ;;  %s3506_s6 = inlined_call_operand.vmem [shape: f32[2,4,1], index: 6, kind: input, shape index: {}]   ;;  %s3507_s7 = inlined_call_operand.vmem [shape: f32[2,1,16], index: 7, kind: input, shape index: {}]   ;;  %s3508_s8 = inlined_call_operand.vmem [shape: f32[2,1,16], index: 8, kind: input, shape index: {}]   ;;  %s3509_s9 = inlined_call_operand.vmem [shape: f32[2,16,64], index: 9, kind: input, shape index: {}]   ;;  %s3510_s10 = inlined_call_operand.vmem [shape: f32[2,1,64], index: 10, kind: input, shape index: {}]   ;;  %s3511_s11 = inlined_call_operand.vmem [shape: f32[2,64,16], index: 11, kind: input, shape index: {}]   ;;  %s3512_s12 = inlined_call_operand.vmem [shape: f32[2,1,16], index: 12, kind: input, shape index: {}]   ;;  %s3513_s13 = inlined_call_operand.vmem [shape: f32[1,16], index: 13, kind: input, shape index: {}]   ;;  %s3514_s14 = inlined_call_operand.vmem [shape: f32[1,16], index: 14, kind: input, shape index: {}]   ;;  %s3515_s15 = inlined_call_operand.vmem [shape: f32[16,16], index: 15, kind: input, shape index: {}]   ;;  %s3516_s16 = inlined_call_operand.vmem [shape: f32[1,16], index: 16, kind: input, shape index: {}]   ;;  %s3517_s17 = inlined_call_operand.vmem [shape: f32[16,48], index: 17, kind: input, shape index: {}]   ;;  %s3518_s18 = inlined_call_operand.vmem [shape: f32[1,48], index: 18, kind: input, shape index: {}]   ;;  %s3519_s19 = inlined_call_operand.vmem [shape: f32[2,4,48], index: 19, kind: output, shape index: {}]  }
   0x1   :  { %3524 = sst [smem:[#allocation2_spill]] %s3500_s0  ;;  %s2898_s0 = smov 0  }
   0x2   :  { %3525 = sst [smem:[#allocation3_spill]] %s3501_s1 }
   0x3   :  { %3526 = sst [smem:[#allocation4_spill]] %s3502_s2 }
   0x4   :  { %3527 = sst [smem:[#allocation5_spill]] %s3503_s3 }
   0x5 LB: > { %s2347_s30 = sadd.s32 4294967295, %s2792_s0   ;;  %p2351_p0 = scmp.ge.s32.totalorder %s2792_s0, 1  ;;  %s2792_s0 = sphi %s2898_s0, %s29_s0  }
   0x6   : > { %p536_p1 = scmp.lt.s32.totalorder %s2792_s0, 3 }
   0x8   : > { %p537_p2 = pnand %p2351_p0, %p536_p1 }
   0x9   : > { %p590_p3 = scmp.lt.s32.totalorder (!%p537_p2), %s2347_s30, 1  ;;  %vm601_vm0 = vcmask (!%p537_p2), 125952   ;;  %s3528_s22 = sld [smem:[#allocation2_spill]] (!%p537_p2)  ;;  %vm686_vm1 = vcmask (!%p537_p2), 31744   ;;  %v638_v8 = vld [vmem:[%s3504_s4] sm:$0xff] (!%p537_p2)  ;;  %v2794_v9 = vmov (!%p537_p2), 0  }
   0xa   : > { %540 = sbr.rel (%p537_p2) target bundleno = 3979 (0xf8b), region = 96  ;;  %s3529_s25 = sld [smem:[#allocation5_spill]] (!%p537_p2)  ;;  %2702 = vset.pattern.permute.xlu1 (!%p537_p2), %v2794_v9  ;;  %2703 = vset.pattern.permute.xlu0 (!%p537_p2), %v2794_v9  ;;  %v640_v10 = vld [vmem:[%s3504_s4 + $0x10] sm:$0xff] (!%p537_p2)  ;;  %v639_v11 = vld [vmem:[%s3504_s4 + $0x8] sm:$0xff] (!%p537_p2)  ;;  %v641_v12 = vld [vmem:[%s3504_s4 + $0x18] sm:$0xff] (!%p537_p2)  ;;  %vm711_vm2 = vcmask (!%p537_p2), 1043456  }
   0xb   : > { %648 = vperm.xlu1 (!%p537_p2), %2702, %v638_v8   ;;  %v642_v13 = vld [vmem:[%s3504_s4 + $0x20] sm:$0xff] (!%p537_p2)  ;;  %v643_v14 = vld [vmem:[%s3504_s4 + $0x28] sm:$0xff] (!%p537_p2)  ;;  %v644_v15 = vld [vmem:[%s3504_s4 + $0x30] sm:$0xff] (!%p537_p2)  ;;  %s3530_s23 = sld [smem:[#allocation3_spill]] (!%p537_p2)  ;;  %s3531_s26 = sld [smem:[#allocation4_spill]] (!%p537_p2)  ;;  %v2795_v34 = vmov (!%p537_p2), 0.0|0.0  }
   0xc   : > { %v645_v16 = vld [vmem:[%s3504_s4 + $0x38] sm:$0xff] (!%p537_p2)  ;;  %v1037_v17 = vld [vmem:[%s3506_s6] sm:$0xf] (!%p537_p2)  ;;  %2642 = vmatprep.subr.bf16.mxu1 (!%p537_p2), %v2795_v34  ;;  %vm2796_vm3 = vmmov (!%p537_p2), 0   ;;  %v2797_v35 = vmov (!%p537_p2), 0.0   ;;  %vm1043_vm12 = vcmask (!%p537_p2), 523264  }
   0xd   : > { %2535 = vmatprep.mubr.msk.f32.mxu1 (!%p537_p2), %vm2796_vm3, %v2797_v35  ;;  %vm1156_vm13 = vcmask (!%p537_p2), 130048  }
   0xf   : > { %653 = vperm.xlu1 (!%p537_p2), %2702, %v639_v11  }
  0x10   : > { %v630_v7 = vld [vmem:[%s3529_s25] sm:$0xff] (!%p537_p2)  ;;  %v631_v27 = vld [vmem:[%s3529_s25 + $0x8] sm:$0xff] (!%p537_p2)  ;;  %v632_v28 = vld [vmem:[%s3529_s25 + $0x10] sm:$0xff] (!%p537_p2) }
  0x11   : > { %s3534_s30 = smov (!%p590_p3, %s2347_s30), 1  ;;  %2500 = vmatprep.mubr.msk.f32.mxu0 %vm686_vm1, %v630_v7  ;;  %v2354_v22 = vld [vmem:[%s3530_s23] ss:$0 sm:$0xff]  ;;  %v633_v29 = vld [vmem:[%s3529_s25 + $0x18] sm:$0xff]  ;;  %v635_v31 = vld [vmem:[%s3529_s25 + $0x28] sm:$0xff] }
  0x12   : > { %s3523_s20 = sshll.u32 %s3534_s30, 2  ;;  %v2355_v24 = vld [vmem:[%s3531_s26] ss:$0 sm:$0xff]  ;;  %v636_v32 = vld [vmem:[%s3529_s25 + $0x30] sm:$0xff]  ;;  %v637_v33 = vld [vmem:[%s3529_s25 + $0x38] sm:$0xff]  ;;  %s3532_s27 = sshll.u32 %s3534_s30, 2 }
  0x13   : > { %s593_s2 = scalar_lea.vmem %s3528_s22, %s3523_s20  ;;  %663 = vperm.xlu1 %2702, %v641_v12   ;;  %v634_v30 = vld [vmem:[%s3529_s25 + $0x20] sm:$0xff]  ;;  %s597_s29 = scalar_lea.vmem %s3519_s19, %s3532_s27 }
  0x14   : > { %v2914_v0 = vld [vmem:[%s593_s2] sm:$0xf] }
  0x15   : > { %v602_v1 = vsel %vm601_vm0, %v2914_v0, 0.0 }
  0x16   : > { %603 = vadd.xlane.f32.xlu0 %v602_v1 }
  0x17   : > { %668 = vperm.xlu1 %2702, %v642_v13  }
  0x1b   : > { %673 = vperm.xlu1 %2702, %v643_v14  }
  0x1f   : > { %678 = vperm.xlu1 %2702, %v644_v15  }
  0x23   : > { %683 = vperm.xlu1 %2702, %v645_v16  }
  0x27   : > { %1040 = vperm.xlu1 %2702, %v1037_v17  }
  0x8a   : > { %v649_v36 = vpop.permute.xlu1 %648 }
  0x8e   : > { %v654_v37 = vpop.permute.xlu1 %653 }
  0x92   : > { %v664_v38 = vpop.permute.xlu1 %663 }
  0x96   : > { %v669_v39 = vpop.permute.xlu1 %668 }
  0x9a   : > { %v674_v46 = vpop.permute.xlu1 %673 }
  0x9e   : > { %v679_v61 = vpop.permute.xlu1 %678 }
  0xa2   : > { %v684_v14 = vpop.permute.xlu1 %683 }
  0xa3   : > { %v604_v2 = vpop.xlane.xlu0 %603 }
  0xa4   : > { %v606_v3 = vmul.f32 0.0625, %v604_v2 }
  0xa6   : > { %v607_v4 = vsub.f32 %v2914_v0, %v606_v3 }
  0xa8   : > { %v608_v5 = vmul.f32 %v607_v4, %v607_v4 }
  0xaa   : > { %v609_v6 = vsel %vm601_vm0, %v608_v5, 0.0 }
  0xab   : > { %610 = vadd.xlane.f32.xlu0 %v609_v6 }
  0xc1   : > { %658 = vperm.xlu0 %2703, %v640_v10  }
 0x138   : > { %v611_v18 = vpop.xlane.xlu0 %610 }
 0x139   : > { %v612_v19 = vmul.f32 0.0625, %v611_v18 }
 0x13b   : > { %v613_v20 = vadd.f32 1e-05, %v612_v19 }
 0x13d   : > { %2704 = vrsqrt.f32 %v613_v20 }
 0x140   : > { %v659_v45 = vpop.permute.xlu0 %658 }
 0x147   : > { %v2705_v21 = vpop.eup %2704 }
 0x148   : > { %v615_v23 = vmul.f32 %v2705_v21, %v607_v4 }
 0x14a   : > { %v622_v25 = vmul.f32 %v2354_v22, %v615_v23 }
 0x14c   : > { %v629_v26 = vadd.f32 %v2355_v24, %v622_v25 }
 0x14e   : > { %2498 = vmatprep.subr.msk.mxu0 %vm711_vm2, %v629_v26 }
 0x14f   : > { %2499 = vmatpush3.msk.msra.mxu0 %vm711_vm2, %v629_v26 }
 0x150   : > { %2501 = vmatmul.mubr.msk.f32.vlgmr.msra.gmra.mrb[0].mxu0 %vm686_vm1, %v631_v27  ;;  %2630 = vmatprep.subr.bf16.mxu0 %v2795_v34 }
 0x151   : > { %2503 = vmatprep.mubr.msk.f32.mxu0 %vm686_vm1, %v632_v28 }
 0x154   : > { %2504 = vmatmul.mubr.msk.f32.gmra.mrb[2].mxu0 %vm686_vm1, %v633_v29 }
 0x155   : > { %2506 = vmatprep.mubr.msk.f32.mxu0 %vm686_vm1, %v634_v30 }
 0x158   : > { %2507 = vmatmul.mubr.msk.f32.gmra.mrb[4].mxu0 %vm686_vm1, %v635_v31 }
 0x159   : > { %2509 = vmatprep.mubr.msk.f32.mxu0 %vm686_vm1, %v636_v32 }
 0x15c   : > { %2510 = vmatmul.mubr.msk.f32.gmra.mrb[6].mxu0 %vm686_vm1, %v637_v33 }
 0x15d   : > { %2528 = vmatprep.mubr.msk.f32.mxu0 %vm2796_vm3, %v2797_v35 }
 0x223   : > { %v2502_v40 = vpop.f32.mrb[0].mxu0 }
 0x224   : > { %v787_v41 = vadd.f32 %v2502_v40, %v654_v37  ;;  %v781_v42 = vpop.f32.mrb[1].mxu0 }
 0x225   : > { %v782_v43 = vadd.f32 %v781_v42, %v649_v36 }
 0x226   : > { %v2993_v44 = vmul.f32 0.70710677, %v787_v41  ;;  %v3021_v21 = vmul.f32 0.5, %v787_v41 }
 0x227   : > { %v2995_v47 = vmul.f32 0.70710677, %v782_v43  ;;  %v2505_v48 = vpop.f32.mrb[2].mxu0  ;;  %v3023_v22 = vmul.f32 0.5, %v782_v43 }
 0x228   : > { %v837_v49 = vand.u32 2147483647, %v2993_v44  ;;  %v797_v50 = vadd.f32 %v2505_v48, %v664_v38  ;;  %v791_v51 = vpop.f32.mrb[3].mxu0  ;;  %vm997_vm4 = vcmp.lt.f32.partialorder %v2993_v44, 0.0 }
 0x229   : > { %v836_v52 = vand.u32 2147483647, %v2995_v47  ;;  %v2999_v53 = vadd.f32 %v791_v51, %v659_v45  ;;  %vm996_vm5 = vcmp.lt.f32.partialorder %v2995_v47, 0.0 }
 0x22a   : > { %v845_v54 = vmul.f32 0.3275911, %v837_v49  ;;  %v3001_v55 = vmul.f32 0.70710677, %v797_v50  ;;  %v949_v3 = vsub.f32 0.0, %v837_v49  ;;  %v3028_v25 = vmul.f32 0.5, %v797_v50 }
 0x22b   : > { %v844_v56 = vmul.f32 0.3275911, %v836_v52  ;;  %v3004_v57 = vmul.f32 0.70710677, %v2999_v53  ;;  %v2508_v60 = vpop.f32.mrb[4].mxu0  ;;  %v948_v6 = vsub.f32 0.0, %v836_v52 }
 0x22c   : > { %v853_v58 = vadd.f32 1.0, %v845_v54  ;;  %v839_v59 = vand.u32 2147483647, %v3001_v55  ;;  %v801_v1 = vpop.f32.mrb[5].mxu0  ;;  %v3008_v8 = vadd.f32 %v2508_v60, %v674_v46  ;;  %v957_v15 = vmul.f32 %v949_v3, %v837_v49 }
 0x22d   : > { %v852_v62 = vadd.f32 1.0, %v844_v56  ;;  %v838_v63 = vand.u32 2147483647, %v3004_v57  ;;  %v3010_v11 = vadd.f32 %v801_v1, %v669_v39  ;;  %v956_v17 = vmul.f32 %v948_v6, %v836_v52 }
 0x22e   : > { %2706 = vrcp.f32 %v853_v58  ;;  %v847_v2 = vmul.f32 0.3275911, %v839_v59  ;;  %v951_v12 = vsub.f32 0.0, %v839_v59  ;;  %v3013_v13 = vmul.f32 0.70710677, %v3008_v8 }
 0x22f   : > { %2708 = vrcp.f32 %v852_v62  ;;  %v846_v4 = vmul.f32 0.3275911, %v838_v63  ;;  %v2511_v5 = vpop.f32.mrb[6].mxu0  ;;  %v3016_v16 = vmul.f32 0.70710677, %v3010_v11  ;;  %v950_v18 = vsub.f32 0.0, %v838_v63 }
 0x230   : > { %v855_v7 = vadd.f32 1.0, %v847_v2  ;;  %v811_v9 = vpop.f32.mrb[7].mxu0  ;;  %v841_v19 = vand.u32 2147483647, %v3013_v13  ;;  %v3019_v20 = vadd.f32 %v2511_v5, %v684_v14  ;;  %v959_v26 = vmul.f32 %v951_v12, %v839_v59 }
 0x231   : > { %v854_v10 = vadd.f32 1.0, %v846_v4  ;;  %v840_v23 = vand.u32 2147483647, %v3016_v16  ;;  %v3026_v24 = vadd.f32 %v811_v9, %v679_v61  ;;  %v966_v29 = vmul.f32 1.442695, %v957_v15 }
 0x232   : > { %2710 = vrcp.f32 %v855_v7  ;;  %v849_v27 = vmul.f32 0.3275911, %v841_v19  ;;  %v3031_v28 = vmul.f32 0.70710677, %v3019_v20  ;;  %v964_v33 = vmul.f32 1.442695, %v956_v17 }
 0x233   : > { %2712 = vrcp.f32 %v854_v10  ;;  %v848_v30 = vmul.f32 0.3275911, %v840_v23  ;;  %v3034_v31 = vmul.f32 0.70710677, %v3026_v24  ;;  %v958_v36 = vmul.f32 %v950_v18, %v838_v63 }
 0x234   : > { %v857_v37 = vadd.f32 1.0, %v849_v27  ;;  %v843_v38 = vand.u32 2147483647, %v3031_v28  ;;  %v953_v41 = vsub.f32 0.0, %v841_v19  ;;  %v970_v46 = vmul.f32 1.442695, %v959_v26 }
 0x235   : > { %v856_v42 = vadd.f32 1.0, %v848_v30  ;;  %v842_v43 = vand.u32 2147483647, %v3034_v31  ;;  %v952_v50 = vsub.f32 0.0, %v840_v23  ;;  %v968_v62 = vmul.f32 1.442695, %v958_v36 }
 0x236   : > { %2714 = vrcp.f32 %v857_v37  ;;  %v851_v48 = vmul.f32 0.3275911, %v843_v38  ;;  %v955_v51 = vsub.f32 0.0, %v843_v38  ;;  %v961_v63 = vmul.f32 %v953_v41, %v841_v19 }
 0x237   : > { %2716 = vrcp.f32 %v856_v42  ;;  %v850_v58 = vmul.f32 0.3275911, %v842_v43  ;;  %v960_v6 = vmul.f32 %v952_v50, %v840_v23  ;;  %v954_v12 = vsub.f32 0.0, %v842_v43 }
 0x238   : > { %v3036_v32 = vpop.eup %2706  ;;  %2718 = vpow2.f32 %v966_v29  ;;  %v859_v56 = vadd.f32 1.0, %v851_v48  ;;  %v963_v7 = vmul.f32 %v955_v51, %v843_v38  ;;  %v974_v17 = vmul.f32 1.442695, %v961_v63 }
 0x239   : > { %v3039_v39 = vpop.eup %2708  ;;  %v877_v40 = vmul.f32 1.0614054, %v3036_v32  ;;  %v858_v3 = vadd.f32 1.0, %v850_v58  ;;  %v3056_v19 = vmul.f32 0.5, %v2999_v53  ;;  %v962_v27 = vmul.f32 %v954_v12, %v842_v43 }
 0x23a   : > { %v876_v45 = vmul.f32 1.0614054, %v3039_v39  ;;  %2720 = vrcp.f32 %v859_v56  ;;  %v972_v30 = vmul.f32 1.442695, %v960_v6  ;;  %vm999_vm6 = vcmp.lt.f32.partialorder %v3001_v55, 0.0 }
 0x23b   : > { %v885_v49 = vadd.f32 -1.4531521, %v877_v40  ;;  %2722 = vrcp.f32 %v858_v3  ;;  %vm998_vm7 = vcmp.lt.f32.partialorder %v3004_v57, 0.0  ;;  %vm1001_vm8 = vcmp.lt.f32.partialorder %v3013_v13, 0.0 }
 0x23c   : > { %v3044_v52 = vpop.eup %2710  ;;  %v884_v54 = vadd.f32 -1.4531521, %v876_v45  ;;  %2724 = vpow2.f32 %v964_v33  ;;  %v978_v33 = vmul.f32 1.442695, %v963_v7  ;;  %vm1000_vm9 = vcmp.lt.f32.partialorder %v3016_v16, 0.0 }
 0x23d   : > { %v3046_v59 = vpop.eup %2712  ;;  %v893_v60 = vmul.f32 %v3036_v32, %v885_v49  ;;  %v879_v61 = vmul.f32 1.0614054, %v3044_v52  ;;  %2726 = vpow2.f32 %v970_v46  ;;  %v976_v49 = vmul.f32 1.442695, %v962_v27 }
 0x23e   : > { %v892_v1 = vmul.f32 %v3039_v39, %v884_v54  ;;  %v878_v2 = vmul.f32 1.0614054, %v3046_v59  ;;  %2728 = vpow2.f32 %v968_v62  ;;  %vm1003_vm10 = vcmp.lt.f32.partialorder %v3031_v28, 0.0 }
 0x23f   : > { %v901_v4 = vadd.f32 1.4214138, %v893_v60  ;;  %v887_v5 = vadd.f32 -1.4531521, %v879_v61  ;;  %2730 = vpow2.f32 %v974_v17  ;;  %vm1002_vm11 = vcmp.lt.f32.partialorder %v3034_v31, 0.0 }
 0x240   : > { %v900_v9 = vadd.f32 1.4214138, %v892_v1  ;;  %v886_v10 = vadd.f32 -1.4531521, %v878_v2  ;;  %v3059_v36 = vpop.eup %2714  ;;  %2732 = vpow2.f32 %v972_v30 }
 0x241   : > { %v909_v14 = vmul.f32 %v3036_v32, %v901_v4  ;;  %v895_v15 = vmul.f32 %v3044_v52, %v887_v5  ;;  %v3061_v40 = vpop.eup %2716  ;;  %v881_v42 = vmul.f32 1.0614054, %v3059_v36  ;;  %2734 = vpow2.f32 %v978_v33 }
 0x242   : > { %v908_v18 = vmul.f32 %v3039_v39, %v900_v9  ;;  %v894_v26 = vmul.f32 %v3046_v59, %v886_v10  ;;  %v2719_v43 = vpop.eup %2718  ;;  %v880_v48 = vmul.f32 1.0614054, %v3061_v40  ;;  %2736 = vpow2.f32 %v976_v49 }
 0x243   : > { %v917_v23 = vadd.f32 -0.28449672, %v909_v14  ;;  %v903_v29 = vadd.f32 1.4214138, %v895_v15  ;;  %v889_v54 = vadd.f32 -1.4531521, %v881_v42 }
 0x244   : > { %v916_v37 = vadd.f32 -0.28449672, %v908_v18  ;;  %v902_v38 = vadd.f32 1.4214138, %v894_v26  ;;  %v3069_v56 = vpop.eup %2720  ;;  %v888_v61 = vadd.f32 -1.4531521, %v880_v48 }
 0x245   : > { %v925_v41 = vmul.f32 %v3036_v32, %v917_v23  ;;  %v911_v53 = vmul.f32 %v3044_v52, %v903_v29  ;;  %v897_v1 = vmul.f32 %v3059_v36, %v889_v54  ;;  %v883_v2 = vmul.f32 1.0614054, %v3069_v56  ;;  %v3077_v3 = vpop.eup %2722 }
 0x246   : > { %v924_v45 = vmul.f32 %v3039_v39, %v916_v37  ;;  %v910_v46 = vmul.f32 %v3046_v59, %v902_v38  ;;  %v896_v6 = vmul.f32 %v3061_v40, %v888_v61  ;;  %v2725_v7 = vpop.eup %2724  ;;  %v882_v18 = vmul.f32 1.0614054, %v3077_v3 }
 0x247   : > { %v933_v50 = vadd.f32 0.2548296, %v925_v41  ;;  %v919_v51 = vadd.f32 -0.28449672, %v911_v53  ;;  %v905_v10 = vadd.f32 1.4214138, %v897_v1  ;;  %v2727_v26 = vpop.eup %2726 }
 0x248   : > { %v932_v58 = vadd.f32 0.2548296, %v924_v45  ;;  %v918_v60 = vadd.f32 -0.28449672, %v910_v46  ;;  %v891_v12 = vadd.f32 -1.4531521, %v883_v2  ;;  %v2729_v30 = vpop.eup %2728 }
 0x249   : > { %v941_v62 = vmul.f32 %v3036_v32, %v933_v50  ;;  %v927_v63 = vmul.f32 %v3044_v52, %v919_v51  ;;  %v904_v17 = vadd.f32 1.4214138, %v896_v6  ;;  %v913_v23 = vmul.f32 %v3059_v36, %v905_v10  ;;  %v2731_v53 = vpop.eup %2730 }
 0x24a   : > { %v940_v4 = vmul.f32 %v3039_v39, %v932_v58  ;;  %v926_v5 = vmul.f32 %v3046_v59, %v918_v60  ;;  %v899_v29 = vmul.f32 %v3069_v56, %v891_v12  ;;  %v890_v41 = vadd.f32 -1.4531521, %v882_v18  ;;  %v2733_v51 = vpop.eup %2732 }
 0x24b   : > { %v981_v9 = vmul.f32 %v2719_v43, %v941_v62  ;;  %v935_v32 = vadd.f32 0.2548296, %v927_v63  ;;  %v912_v33 = vmul.f32 %v3061_v40, %v904_v17  ;;  %v921_v45 = vadd.f32 -0.28449672, %v913_v23  ;;  %v2735_v61 = vpop.eup %2734 }
 0x24c   : > { %v980_v14 = vmul.f32 %v2725_v7, %v940_v4  ;;  %v934_v15 = vadd.f32 0.2548296, %v926_v5  ;;  %v907_v46 = vadd.f32 1.4214138, %v899_v29  ;;  %v898_v50 = vmul.f32 %v3077_v3, %v890_v41 }
 0x24d   : > { %v989_v27 = vsub.f32 1.0, %v981_v9  ;;  %v943_v39 = vmul.f32 %v3044_v52, %v935_v32  ;;  %v920_v49 = vadd.f32 -0.28449672, %v912_v33  ;;  %v2737_v9 = vpop.eup %2736 }
 0x24e   : > { %v988_v37 = vsub.f32 1.0, %v980_v14  ;;  %v942_v38 = vmul.f32 %v3046_v59, %v934_v15  ;;  %v929_v59 = vmul.f32 %v3059_v36, %v921_v45  ;;  %v915_v60 = vmul.f32 %v3069_v56, %v907_v46 }
 0x24f   : > { %v1005_v42 = vsub.f32 0.0, %v989_v27  ;;  %v983_v43 = vmul.f32 %v2727_v26, %v943_v39  ;;  %v928_v2 = vmul.f32 %v3061_v40, %v920_v49  ;;  %v906_v12 = vadd.f32 1.4214138, %v898_v50 }
 0x250   : > { %v1004_v48 = vsub.f32 0.0, %v988_v37  ;;  %v982_v52 = vmul.f32 %v2729_v30, %v942_v38  ;;  %v937_v6 = vadd.f32 0.2548296, %v929_v59  ;;  %v923_v7 = vadd.f32 -0.28449672, %v915_v60 }
 0x251   : > { %v1013_v54 = vsel %vm997_vm4, %v1005_v42, %v989_v27  ;;  %v991_v58 = vsub.f32 1.0, %v983_v43  ;;  %v936_v10 = vadd.f32 0.2548296, %v928_v2  ;;  %v824_v49 = vmul.f32 0.5, %v3010_v11 }
 0x252   : > { %v1021_v62 = vadd.f32 1.0, %v1013_v54  ;;  %v1012_v63 = vsel %vm996_vm5, %v1004_v48, %v988_v37  ;;  %v990_v1 = vsub.f32 1.0, %v982_v52  ;;  %v945_v47 = vmul.f32 %v3059_v36, %v937_v6 }
 0x253   : > { %v1020_v4 = vadd.f32 1.0, %v1012_v63  ;;  %v1007_v5 = vsub.f32 0.0, %v991_v58  ;;  %v931_v17 = vmul.f32 %v3069_v56, %v923_v7  ;;  %v944_v27 = vmul.f32 %v3061_v40, %v936_v10 }
 0x254   : > { %v1029_v44 = vmul.f32 %v1021_v62, %v3021_v21  ;;  %v1006_v32 = vsub.f32 0.0, %v990_v1  ;;  %v914_v21 = vmul.f32 %v3077_v3, %v906_v12  ;;  %v985_v29 = vmul.f32 %v2731_v53, %v945_v47  ;;  %v1147_v47 = vld [vmem:[%s3509_s9] sm:$0xff] }
 0x255   : > { %v1028_v14 = vmul.f32 %v1020_v4, %v3023_v22  ;;  %v1015_v15 = vsel %vm999_vm6, %v1007_v5, %v991_v58  ;;  %v939_v30 = vadd.f32 0.2548296, %v931_v17  ;;  %v984_v55 = vmul.f32 %v2733_v51, %v944_v27  ;;  %v1036_v4 = vld [vmem:[%s3505_s5] sm:$0xf]  ;;  %v1148_v17 = vld [vmem:[%s3509_s9 + $0x8] sm:$0xff] }
 0x256   : > { %v1023_v18 = vadd.f32 1.0, %v1015_v15  ;;  %v1014_v26 = vsel %vm998_vm7, %v1006_v32, %v990_v1  ;;  %v922_v37 = vadd.f32 -0.28449672, %v914_v21  ;;  %v993_v38 = vsub.f32 1.0, %v985_v29  ;;  %v2391_v15 = vld [vmem:[%s3504_s4 + $0x78] sm:$0xff] }
 0x257   : > { %v2631_v39 = vpack.c.bf16 %v1029_v44, %v1028_v14  ;;  %v1022_v23 = vadd.f32 1.0, %v1014_v26  ;;  %v947_v33 = vmul.f32 %v3069_v56, %v939_v30  ;;  %v992_v57 = vsub.f32 1.0, %v984_v55  ;;  %v2385_v14 = vld [vmem:[%s3504_s4 + $0x48] sm:$0xff]  ;;  %v2367_v30 = vld [vmem:[%s3508_s8] ss:$0 sm:$0xff] }
 0x258   : > { %v1031_v22 = vmul.f32 %v1023_v18, %v3028_v25  ;;  %v930_v41 = vmul.f32 %v3077_v3, %v922_v37  ;;  %v1009_v42 = vsub.f32 0.0, %v993_v38  ;;  %v825_v56 = vmul.f32 0.5, %v3008_v8  ;;  %v1257_v37 = vld [vmem:[%s3511_s11] sm:$0xff] }
 0x259   : > { %v1030_v36 = vmul.f32 %v1022_v23, %v3056_v19  ;;  %2632 = vmatpush3.bf16.msra.mxu0 %v2631_v39  ;;  %v987_v43 = vmul.f32 %v2735_v61, %v947_v33  ;;  %v1008_v53 = vsub.f32 0.0, %v992_v57  ;;  %v827_v62 = vmul.f32 0.5, %v3019_v20  ;;  %v1041_v20 = vpop.permute.xlu1 %1040  ;;  %v2366_v23 = vld [vmem:[%s3507_s7] ss:$0 sm:$0xff]  ;;  %v1259_v33 = vld [vmem:[%s3511_s11 + $0x10] sm:$0xff] }
 0x25a   : > { %2633 = vmatprep.subr.bf16.mxu0 %v2795_v34  ;;  %v938_v25 = vadd.f32 0.2548296, %v930_v41  ;;  %v1017_v45 = vsel %vm1001_vm8, %v1009_v42, %v993_v38  ;;  %v826_v63 = vmul.f32 0.5, %v3026_v24  ;;  %v2643_v18 = vpack.c.bf16 %v1148_v17, %v1147_v47  ;;  %v1262_v42 = vld [vmem:[%s3511_s11 + $0x28] sm:$0xff] }
 0x25b   : > { %v2634_v40 = vpack.c.bf16 %v1031_v22, %v1030_v36  ;;  %v995_v19 = vsub.f32 1.0, %v987_v43  ;;  %v1025_v46 = vadd.f32 1.0, %v1017_v45  ;;  %v1016_v48 = vsel %vm1000_vm9, %v1008_v53, %v992_v57  ;;  %v1258_v36 = vld [vmem:[%s3511_s11 + $0x8] sm:$0xff]  ;;  %v1260_v57 = vld [vmem:[%s3511_s11 + $0x18] sm:$0xff]  ;;  %v1263_v53 = vld [vmem:[%s3511_s11 + $0x30] sm:$0xff] }
 0x25c   : > { %v946_v52 = vmul.f32 %v3077_v3, %v938_v25  ;;  %v1024_v50 = vadd.f32 1.0, %v1016_v48  ;;  %2644 = vmatpush3.bf16.msra.mxu1 %v2643_v18  ;;  %v2646_v38 = vpack.c.bf16 %v1258_v36, %v1257_v37  ;;  %v2649_v41 = vpack.c.bf16 %v1260_v57, %v1259_v33  ;;  %v1264_v25 = vld [vmem:[%s3511_s11 + $0x38] sm:$0xff]  ;;  %v2374_v36 = vld [vmem:[%s3530_s23 + $0x1] ss:$0 sm:$0xff] }
 0x25d   : > { %2635 = vmatpush3.bf16.msra.mxu0 %v2634_v40  ;;  %v1011_v51 = vsub.f32 0.0, %v995_v19  ;;  %v1033_v13 = vmul.f32 %v1025_v46, %v825_v56  ;;  %2645 = vmatprep.subr.bf16.mxu1 %v2795_v34  ;;  %v1261_v40 = vld [vmem:[%s3511_s11 + $0x20] sm:$0xff]  ;;  %v2655_v45 = vpack.c.bf16 %v1264_v25, %v1263_v53  ;;  %v2381_v25 = vld [vmem:[%s3529_s25 + $0x68] sm:$0xff] }
 0x25e   : > { %2636 = vmatprep.subr.bf16.mxu0 %v2795_v34  ;;  %v986_v54 = vmul.f32 %v2737_v9, %v946_v52  ;;  %v1032_v58 = vmul.f32 %v1024_v50, %v824_v49  ;;  %v2652_v43 = vpack.c.bf16 %v1262_v42, %v1261_v40  ;;  %v2375_v33 = vld [vmem:[%s3531_s26 + $0x1] ss:$0 sm:$0xff]  ;;  %v2377_v40 = vld [vmem:[%s3529_s25 + $0x48] sm:$0xff]  ;;  %v2378_v42 = vld [vmem:[%s3529_s25 + $0x50] sm:$0xff] }
 0x25f   : > { %v1019_v16 = vsel %vm1003_vm10, %v1011_v51, %v995_v19  ;;  %v2368_v19 = vld [vmem:[%s3510_s10] ss:$0 sm:$0xff] }
 0x260   : > { %v994_v59 = vsub.f32 1.0, %v986_v54  ;;  %v2637_v60 = vpack.c.bf16 %v1033_v13, %v1032_v58  ;;  %v1027_v61 = vadd.f32 1.0, %v1019_v16  ;;  %v2380_v53 = vld [vmem:[%s3529_s25 + $0x60] sm:$0xff] }
 0x262   : > { %v1010_v8 = vsub.f32 0.0, %v994_v59  ;;  %2638 = vmatpush3.bf16.msra.mxu0 %v2637_v60  ;;  %v1035_v11 = vmul.f32 %v1027_v61, %v827_v62 }
 0x263   : > { %2639 = vmatprep.subr.bf16.mxu0 %v2795_v34 }
 0x264   : > { %v1018_v3 = vsel %vm1002_vm11, %v1010_v8, %v994_v59 }
 0x265   : > { %v1026_v1 = vadd.f32 1.0, %v1018_v3 }
 0x267   : > { %v1034_v28 = vmul.f32 %v1026_v1, %v826_v63 }
 0x269   : > { %v2640_v2 = vpack.c.bf16 %v1035_v11, %v1034_v28 }
 0x26b   : > { %2641 = vmatpush3.bf16.msra.mxu0 %v2640_v2 }
 0x26e   : > { %2529 = vmatmul.mubr.msk.f32.vlgmr.msra.gmra.mrb[8].mxu0 %vm1043_vm12, %v1036_v4 }
 0x341   : > { %v1113_v31 = vpop.f32.mrb[8].mxu0 }
 0x342   : > { %v1114_v5 = vadd.f32 %v1113_v31, %v1041_v20  ;;  %v2530_v6 = vpop.f32.mrb[9].mxu0 }
 0x344   : > { %v3129_v7 = vadd.f32 %v1114_v5, %v2914_v0  ;;  %v2389_v0 = vld [vmem:[%s3504_s4 + $0x68] sm:$0xff] }
 0x346   : > { %v1120_v24 = vsel %vm601_vm0, %v3129_v7, 0.0 }
 0x347   : > { %1121 = vadd.xlane.f32.xlu1 %v1120_v24 }
 0x3d4   : > { %v1122_v9 = vpop.xlane.xlu1 %1121 }
 0x3d5   : > { %v1123_v44 = vmul.f32 0.0625, %v1122_v9  ;;  %v2370_v9 = vld [vmem:[%s3512_s12] ss:$0 sm:$0xff] }
 0x3d7   : > { %v1124_v32 = vsub.f32 %v3129_v7, %v1123_v44 }
 0x3d9   : > { %v1125_v10 = vmul.f32 %v1124_v32, %v1124_v32 }
 0x3db   : > { %v1126_v12 = vsel %vm601_vm0, %v1125_v10, 0.0 }
 0x3dc   : > { %1127 = vadd.xlane.f32.xlu0 %v1126_v12 }
 0x3f2   : > { %1402 = vperm.xlu0 %2703, %v2385_v14  }
 0x3f6   : > { %1422 = vperm.xlu0 %2703, %v2389_v0  }
 0x3fa   : > { %1432 = vperm.xlu0 %2703, %v2391_v15  }
 0x469   : > { %v1128_v26 = vpop.xlane.xlu0 %1127 }
 0x46a   : > { %v1129_v27 = vmul.f32 0.0625, %v1128_v26  ;;  %v2384_v26 = vld [vmem:[%s3504_s4 + $0x40] sm:$0xff] }
 0x46c   : > { %v1130_v21 = vadd.f32 1e-05, %v1129_v27  ;;  %v2387_v27 = vld [vmem:[%s3504_s4 + $0x58] sm:$0xff] }
 0x46e   : > { %2738 = vrsqrt.f32 %v1130_v21  ;;  %v2388_v21 = vld [vmem:[%s3504_s4 + $0x60] sm:$0xff] }
 0x478   : > { %v2739_v39 = vpop.eup %2738 }
 0x479   : > { %v1132_v29 = vmul.f32 %v2739_v39, %v1124_v32  ;;  %v2390_v39 = vld [vmem:[%s3504_s4 + $0x70] sm:$0xff] }
 0x47b   : > { %v1139_v22 = vmul.f32 %v2366_v23, %v1132_v29  ;;  %v2402_v23 = vld [vmem:[%s3506_s6 + $0x4] sm:$0xf] }
 0x47c   : > { %v2376_v29 = vld [vmem:[%s3529_s25 + $0x40] sm:$0xff] }
 0x47d   : > { %v1146_v55 = vadd.f32 %v2367_v30, %v1139_v22  ;;  %2559 = vmatprep.mubr.msk.f32.mxu0 %vm686_vm1, %v2376_v29 }
 0x47f   : > { %2536 = vmatmul.mubr.msk.f32.vlgmr.msra.gmra.mrb[0].mxu1 %vm1156_vm13, %v1146_v55 }
 0x480   : > { %2554 = vmatprep.mubr.msk.f32.mxu1 %vm2796_vm3, %v2797_v35  ;;  %2647 = vmatpush3.bf16.msra.mxu1 %v2646_v38 }
 0x481   : > { %2648 = vmatprep.subr.bf16.mxu1 %v2795_v34 }
 0x484   : > { %2650 = vmatpush3.bf16.msra.mxu1 %v2649_v41 }
 0x485   : > { %2651 = vmatprep.subr.bf16.mxu1 %v2795_v34 }
 0x488   : > { %2653 = vmatpush3.bf16.msra.mxu1 %v2652_v43  ;;  %v2379_v43 = vld [vmem:[%s3529_s25 + $0x58] sm:$0xff] }
 0x489   : > { %2654 = vmatprep.subr.bf16.mxu1 %v2795_v34 }
 0x48c   : > { %2656 = vmatpush3.bf16.msra.mxu1 %v2655_v45  ;;  %v2382_v45 = vld [vmem:[%s3529_s25 + $0x70] sm:$0xff] }
 0x48d   : > { %2669 = vmatprep.subr.bf16.mxu1 %v2795_v34 }
 0x552   : > { %v1226_v56 = vpop.f32.mrb[0].mxu1 }
 0x553   : > { %v1227_v46 = vadd.f32 %v2368_v19, %v1226_v56  ;;  %v2537_v48 = vpop.f32.mrb[1].mxu1  ;;  %v2383_v19 = vld [vmem:[%s3529_s25 + $0x78] sm:$0xff] }
 0x554   : > { %v1403_v48 = vpop.permute.xlu0 %1402 }
 0x555   : > { %v1231_v52 = vmul.f32 0.70710677, %v1227_v46  ;;  %v1230_v5 = vmul.f32 0.5, %v1227_v46 }
 0x557   : > { %v1232_v49 = vand.u32 2147483647, %v1231_v52  ;;  %vm1252_vm14 = vcmp.lt.f32.partialorder %v1231_v52, 0.0 }
 0x559   : > { %v1233_v50 = vmul.f32 0.3275911, %v1232_v49  ;;  %v1246_v13 = vsub.f32 0.0, %v1232_v49 }
 0x55b   : > { %v1234_v51 = vadd.f32 1.0, %v1233_v50  ;;  %v1247_v58 = vmul.f32 %v1246_v13, %v1232_v49 }
 0x55d   : > { %2740 = vrcp.f32 %v1234_v51  ;;  %v1248_v60 = vmul.f32 1.442695, %v1247_v58 }
 0x55f   : > { %2742 = vpow2.f32 %v1248_v60 }
 0x567   : > { %v2741_v54 = vpop.eup %2740 }
 0x568   : > { %v1237_v16 = vmul.f32 1.0614054, %v2741_v54 }
 0x569   : > { %v2743_v28 = vpop.eup %2742 }
 0x56a   : > { %v1238_v59 = vadd.f32 -1.4531521, %v1237_v16 }
 0x56c   : > { %v1239_v61 = vmul.f32 %v2741_v54, %v1238_v59 }
 0x56e   : > { %v1240_v8 = vadd.f32 1.4214138, %v1239_v61 }
 0x570   : > { %v1241_v62 = vmul.f32 %v2741_v54, %v1240_v8 }
 0x572   : > { %v1242_v3 = vadd.f32 -0.28449672, %v1241_v62 }
 0x574   : > { %v1243_v11 = vmul.f32 %v2741_v54, %v1242_v3 }
 0x576   : > { %v1244_v63 = vadd.f32 0.2548296, %v1243_v11 }
 0x578   : > { %v1245_v1 = vmul.f32 %v2741_v54, %v1244_v63 }
 0x57a   : > { %v1250_v2 = vmul.f32 %v2743_v28, %v1245_v1 }
 0x57c   : > { %v1251_v4 = vsub.f32 1.0, %v1250_v2 }
 0x57e   : > { %v1253_v20 = vsub.f32 0.0, %v1251_v4 }
 0x580   : > { %v1254_v31 = vsel %vm1252_vm14, %v1253_v20, %v1251_v4  ;;  %v1423_v20 = vpop.permute.xlu0 %1422 }
 0x581   : > { %v1255_v6 = vadd.f32 1.0, %v1254_v31 }
 0x583   : > { %v1256_v24 = vmul.f32 %v1255_v6, %v1230_v5 }
 0x585   : > { %2555 = vmatmul.mubr.msk.f32.vlgmr.msra.gmra.mrb[2].mxu1 %vm1043_vm12, %v1256_v24 }
 0x586   : > { %2594 = vmatprep.mubr.msk.f32.mxu1 %vm2796_vm3, %v2797_v35 }
 0x658   : > { %v1341_v44 = vpop.f32.mrb[2].mxu1 }
 0x659   : > { %v1342_v32 = vadd.f32 %v2370_v9, %v1341_v44  ;;  %v2556_v10 = vpop.f32.mrb[3].mxu1 }
 0x65b   : > { %v3198_v12 = vadd.f32 %v1342_v32, %v3129_v7  ;;  %v2386_v7 = vld [vmem:[%s3504_s4 + $0x50] sm:$0xff] }
 0x65d   : > { %v1350_v14 = vsel %vm601_vm0, %v3198_v12, 0.0 }
 0x65e   : > { %1351 = vadd.xlane.f32.xlu1 %v1350_v14 }
 0x6eb   : > { %v1352_v0 = vpop.xlane.xlu1 %1351 }
 0x6ec   : > { %v1353_v15 = vmul.f32 0.0625, %v1352_v0 }
 0x6ee   : > { %v1354_v47 = vsub.f32 %v3198_v12, %v1353_v15 }
 0x6f0   : > { %v1355_v17 = vmul.f32 %v1354_v47, %v1354_v47 }
 0x6f2   : > { %v1356_v18 = vsel %vm601_vm0, %v1355_v17, 0.0 }
 0x6f3   : > { %1357 = vadd.xlane.f32.xlu1 %v1356_v18 }
 0x704   : > { %1397 = vperm.xlu1 %2702, %v2384_v26  }
 0x708   : > { %1407 = vperm.xlu1 %2702, %v2386_v7  }
 0x70c   : > { %1412 = vperm.xlu1 %2702, %v2387_v27   ;;  %v1433_v27 = vpop.permute.xlu0 %1432 }
 0x710   : > { %1417 = vperm.xlu1 %2702, %v2388_v21  }
 0x714   : > { %1427 = vperm.xlu1 %2702, %v2390_v39  }
 0x718   : > { %1789 = vperm.xlu1 %2702, %v2402_v23  }
 0x780   : > { %v1358_v30 = vpop.xlane.xlu1 %1357 }
 0x781   : > { %v1359_v22 = vmul.f32 0.0625, %v1358_v30 }
 0x783   : > { %v1360_v55 = vadd.f32 1e-05, %v1359_v22 }
 0x784   : > { %v1398_v56 = vpop.permute.xlu1 %1397 }
 0x785   : > { %2744 = vrsqrt.f32 %v1360_v55 }
 0x788   : > { %v1408_v46 = vpop.permute.xlu1 %1407 }
 0x78c   : > { %v1413_v54 = vpop.permute.xlu1 %1412 }
 0x78f   : > { %v2745_v37 = vpop.eup %2744 }
 0x790   : > { %v1362_v38 = vmul.f32 %v2745_v37, %v1354_v47  ;;  %v1418_v24 = vpop.permute.xlu1 %1417 }
 0x792   : > { %v1369_v57 = vmul.f32 %v2374_v36, %v1362_v38 }
 0x794   : > { %v1376_v41 = vadd.f32 %v2375_v33, %v1369_v57  ;;  %v1428_v23 = vpop.permute.xlu1 %1427 }
 0x796   : > { %2557 = vmatprep.subr.msk.mxu0 %vm711_vm2, %v1376_v41 }
 0x797   : > { %2558 = vmatpush3.msk.msra.mxu0 %vm711_vm2, %v1376_v41 }
 0x798   : > { %2560 = vmatmul.mubr.msk.f32.vlgmr.msra.gmra.mrb[10].mxu0 %vm686_vm1, %v2377_v40  ;;  %2657 = vmatprep.subr.bf16.mxu0 %v2795_v34 }
 0x799   : > { %2562 = vmatprep.mubr.msk.f32.mxu0 %vm686_vm1, %v2378_v42 }
 0x79c   : > { %2563 = vmatmul.mubr.msk.f32.gmra.mrb[12].mxu0 %vm686_vm1, %v2379_v43 }
 0x79d   : > { %2565 = vmatprep.mubr.msk.f32.mxu0 %vm686_vm1, %v2380_v53 }
 0x7a0   : > { %2566 = vmatmul.mubr.msk.f32.gmra.mrb[14].mxu0 %vm686_vm1, %v2381_v25 }
 0x7a1   : > { %2568 = vmatprep.mubr.msk.f32.mxu0 %vm686_vm1, %v2382_v45 }
 0x7a4   : > { %2569 = vmatmul.mubr.msk.f32.gmra.mrb[16].mxu0 %vm686_vm1, %v2383_v19 }
 0x7a5   : > { %2587 = vmatprep.mubr.msk.f32.mxu0 %vm2796_vm3, %v2797_v35 }
 0x86b   : > { %v2561_v52 = vpop.f32.mrb[10].mxu0 }
 0x86c   : > { %v1534_v49 = vadd.f32 %v2561_v52, %v1403_v48  ;;  %v1528_v50 = vpop.f32.mrb[11].mxu0 }
 0x86d   : > { %v1529_v51 = vadd.f32 %v1528_v50, %v1398_v56 }
 0x86e   : > { %v3265_v13 = vmul.f32 0.70710677, %v1534_v49  ;;  %v3293_v37 = vmul.f32 0.5, %v1534_v49 }
 0x86f   : > { %v3267_v58 = vmul.f32 0.70710677, %v1529_v51  ;;  %v2564_v16 = vpop.f32.mrb[12].mxu0  ;;  %v3295_v36 = vmul.f32 0.5, %v1529_v51 }
 0x870   : > { %v1584_v59 = vand.u32 2147483647, %v3265_v13  ;;  %v1544_v60 = vadd.f32 %v2564_v16, %v1413_v54  ;;  %v1538_v61 = vpop.f32.mrb[13].mxu0  ;;  %vm1744_vm15 = vcmp.lt.f32.partialorder %v3265_v13, 0.0 }
 0x871   : > { %v1583_v8 = vand.u32 2147483647, %v3267_v58  ;;  %v3271_v62 = vadd.f32 %v1538_v61, %v1408_v46  ;;  %vm1743_vm1 = vcmp.lt.f32.partialorder %v3267_v58, 0.0 }
 0x872   : > { %v1592_v3 = vmul.f32 0.3275911, %v1584_v59  ;;  %v3273_v11 = vmul.f32 0.70710677, %v1544_v60  ;;  %v1696_v44 = vsub.f32 0.0, %v1584_v59  ;;  %v3300_v57 = vmul.f32 0.5, %v1544_v60 }
 0x873   : > { %v1591_v63 = vmul.f32 0.3275911, %v1583_v8  ;;  %v3276_v1 = vmul.f32 0.70710677, %v3271_v62  ;;  %v2567_v4 = vpop.f32.mrb[14].mxu0  ;;  %v1695_v14 = vsub.f32 0.0, %v1583_v8 }
 0x874   : > { %v1600_v28 = vadd.f32 1.0, %v1592_v3  ;;  %v1586_v2 = vand.u32 2147483647, %v3273_v11  ;;  %v1548_v6 = vpop.f32.mrb[15].mxu0  ;;  %v3280_v15 = vadd.f32 %v2567_v4, %v1423_v20  ;;  %v1704_v21 = vmul.f32 %v1696_v44, %v1584_v59 }
 0x875   : > { %v1599_v31 = vadd.f32 1.0, %v1591_v63  ;;  %v1585_v5 = vand.u32 2147483647, %v3276_v1  ;;  %v3282_v18 = vadd.f32 %v1548_v6, %v1418_v24  ;;  %v1703_v29 = vmul.f32 %v1695_v14, %v1583_v8 }
 0x876   : > { %2746 = vrcp.f32 %v1600_v28  ;;  %v1594_v9 = vmul.f32 0.3275911, %v1586_v2  ;;  %v1698_v26 = vsub.f32 0.0, %v1586_v2  ;;  %v3285_v7 = vmul.f32 0.70710677, %v3280_v15 }
 0x877   : > { %2748 = vrcp.f32 %v1599_v31  ;;  %v1593_v32 = vmul.f32 0.3275911, %v1585_v5  ;;  %v2570_v10 = vpop.f32.mrb[16].mxu0  ;;  %v3288_v39 = vmul.f32 0.70710677, %v3282_v18  ;;  %v1697_v30 = vsub.f32 0.0, %v1585_v5 }
 0x878   : > { %v1602_v0 = vadd.f32 1.0, %v1594_v9  ;;  %v1558_v47 = vpop.f32.mrb[17].mxu0  ;;  %v1588_v22 = vand.u32 2147483647, %v3285_v7  ;;  %v3291_v55 = vadd.f32 %v2570_v10, %v1433_v27  ;;  %v1706_v41 = vmul.f32 %v1698_v26, %v1586_v2 }
 0x879   : > { %v1601_v17 = vadd.f32 1.0, %v1593_v32  ;;  %v1587_v38 = vand.u32 2147483647, %v3288_v39  ;;  %v3298_v33 = vadd.f32 %v1558_v47, %v1428_v23  ;;  %v1713_v43 = vmul.f32 1.442695, %v1704_v21 }
 0x87a   : > { %2750 = vrcp.f32 %v1602_v0  ;;  %v1596_v40 = vmul.f32 0.3275911, %v1588_v22  ;;  %v3303_v42 = vmul.f32 0.70710677, %v3291_v55  ;;  %v1711_v19 = vmul.f32 1.442695, %v1703_v29 }
 0x87b   : > { %2752 = vrcp.f32 %v1601_v17  ;;  %v1595_v53 = vmul.f32 0.3275911, %v1587_v38  ;;  %v3306_v25 = vmul.f32 0.70710677, %v3298_v33  ;;  %v1705_v56 = vmul.f32 %v1697_v30, %v1585_v5 }
 0x87c   : > { %v1604_v46 = vadd.f32 1.0, %v1596_v40  ;;  %v1590_v48 = vand.u32 2147483647, %v3303_v42  ;;  %v1700_v50 = vsub.f32 0.0, %v1588_v22  ;;  %v1717_v59 = vmul.f32 1.442695, %v1706_v41 }
 0x87d   : > { %v1603_v51 = vadd.f32 1.0, %v1595_v53  ;;  %v1589_v54 = vand.u32 2147483647, %v3306_v25  ;;  %v1699_v8 = vsub.f32 0.0, %v1587_v38  ;;  %v1715_v6 = vmul.f32 1.442695, %v1705_v56 }
 0x87e   : > { %2754 = vrcp.f32 %v1604_v46  ;;  %v1598_v60 = vmul.f32 0.3275911, %v1590_v48  ;;  %v1702_v3 = vsub.f32 0.0, %v1590_v48  ;;  %v1708_v24 = vmul.f32 %v1700_v50, %v1588_v22 }
 0x87f   : > { %2756 = vrcp.f32 %v1603_v51  ;;  %v1597_v4 = vmul.f32 0.3275911, %v1589_v54  ;;  %v1707_v0 = vmul.f32 %v1699_v8, %v1587_v38  ;;  %v1701_v27 = vsub.f32 0.0, %v1589_v54 }
 0x880   : > { %v3308_v45 = vpop.eup %2746  ;;  %2758 = vpow2.f32 %v1713_v43  ;;  %v1606_v2 = vadd.f32 1.0, %v1598_v60  ;;  %v1710_v47 = vmul.f32 %v1702_v3, %v1590_v48  ;;  %v1721_v29 = vmul.f32 1.442695, %v1708_v24 }
 0x881   : > { %v3311_v52 = vpop.eup %2748  ;;  %v1624_v49 = vmul.f32 1.0614054, %v3308_v45  ;;  %v1605_v32 = vadd.f32 1.0, %v1597_v4  ;;  %v3328_v22 = vmul.f32 0.5, %v3271_v62  ;;  %v1709_v40 = vmul.f32 %v1701_v27, %v1589_v54 }
 0x882   : > { %v1623_v16 = vmul.f32 1.0614054, %v3311_v52  ;;  %2760 = vrcp.f32 %v1606_v2  ;;  %v1719_v53 = vmul.f32 1.442695, %v1707_v0  ;;  %vm1746_vm2 = vcmp.lt.f32.partialorder %v3273_v11, 0.0 }
 0x883   : > { %v1632_v61 = vadd.f32 -1.4531521, %v1624_v49  ;;  %2762 = vrcp.f32 %v1605_v32  ;;  %vm1745_vm4 = vcmp.lt.f32.partialorder %v3276_v1, 0.0  ;;  %vm1748_vm5 = vcmp.lt.f32.partialorder %v3285_v7, 0.0 }
 0x884   : > { %v3316_v63 = vpop.eup %2750  ;;  %v1631_v28 = vadd.f32 -1.4531521, %v1623_v16  ;;  %2764 = vpow2.f32 %v1711_v19  ;;  %v1725_v19 = vmul.f32 1.442695, %v1710_v47  ;;  %vm1747_vm6 = vcmp.lt.f32.partialorder %v3288_v39, 0.0 }
 0x885   : > { %v3318_v20 = vpop.eup %2752  ;;  %v1640_v31 = vmul.f32 %v3308_v45, %v1632_v61  ;;  %v1626_v5 = vmul.f32 1.0614054, %v3316_v63  ;;  %2766 = vpow2.f32 %v1717_v59  ;;  %v1723_v61 = vmul.f32 1.442695, %v1709_v40 }
 0x886   : > { %v1639_v9 = vmul.f32 %v3311_v52, %v1631_v28  ;;  %v1625_v44 = vmul.f32 1.0614054, %v3318_v20  ;;  %2768 = vpow2.f32 %v1715_v6  ;;  %vm1750_vm7 = vcmp.lt.f32.partialorder %v3303_v42, 0.0 }
 0x887   : > { %v1648_v10 = vadd.f32 1.4214138, %v1640_v31  ;;  %v1634_v14 = vadd.f32 -1.4531521, %v1626_v5  ;;  %2770 = vpow2.f32 %v1721_v29  ;;  %vm1749_vm8 = vcmp.lt.f32.partialorder %v3306_v25, 0.0 }
 0x888   : > { %v1647_v17 = vadd.f32 1.4214138, %v1639_v9  ;;  %v1633_v26 = vadd.f32 -1.4531521, %v1625_v44  ;;  %v3331_v56 = vpop.eup %2754  ;;  %2772 = vpow2.f32 %v1719_v53 }
 0x889   : > { %v1656_v21 = vmul.f32 %v3308_v45, %v1648_v10  ;;  %v1642_v23 = vmul.f32 %v3316_v63, %v1634_v14  ;;  %v3333_v49 = vpop.eup %2756  ;;  %v1628_v51 = vmul.f32 1.0614054, %v3331_v56  ;;  %2774 = vpow2.f32 %v1725_v19 }
 0x88a   : > { %v1655_v30 = vmul.f32 %v3311_v52, %v1647_v17  ;;  %v1641_v41 = vmul.f32 %v3318_v20, %v1633_v26  ;;  %v2759_v54 = vpop.eup %2758  ;;  %v1627_v60 = vmul.f32 1.0614054, %v3333_v49  ;;  %2776 = vpow2.f32 %v1723_v61 }
 0x88b   : > { %v1664_v38 = vadd.f32 -0.28449672, %v1656_v21  ;;  %v1650_v43 = vadd.f32 1.4214138, %v1642_v23  ;;  %v1636_v28 = vadd.f32 -1.4531521, %v1628_v51 }
 0x88c   : > { %v1663_v46 = vadd.f32 -0.28449672, %v1655_v30  ;;  %v1649_v48 = vadd.f32 1.4214138, %v1641_v41  ;;  %v3341_v2 = vpop.eup %2760  ;;  %v1635_v5 = vadd.f32 -1.4531521, %v1627_v60 }
 0x88d   : > { %v1672_v50 = vmul.f32 %v3308_v45, %v1664_v38  ;;  %v1658_v62 = vmul.f32 %v3316_v63, %v1650_v43  ;;  %v1644_v9 = vmul.f32 %v3331_v56, %v1636_v28  ;;  %v1630_v44 = vmul.f32 1.0614054, %v3341_v2  ;;  %v3349_v32 = vpop.eup %2762 }
 0x88e   : > { %v1671_v16 = vmul.f32 %v3311_v52, %v1663_v46  ;;  %v1657_v59 = vmul.f32 %v3318_v20, %v1649_v48  ;;  %v1643_v0 = vmul.f32 %v3333_v49, %v1635_v5  ;;  %v2765_v47 = vpop.eup %2764  ;;  %v1629_v30 = vmul.f32 1.0614054, %v3349_v32 }
 0x88f   : > { %v1680_v8 = vadd.f32 0.2548296, %v1672_v50  ;;  %v1666_v3 = vadd.f32 -0.28449672, %v1658_v62  ;;  %v1652_v26 = vadd.f32 1.4214138, %v1644_v9  ;;  %v2767_v41 = vpop.eup %2766 }
 0x890   : > { %v1679_v4 = vadd.f32 0.2548296, %v1671_v16  ;;  %v1665_v31 = vadd.f32 -0.28449672, %v1657_v59  ;;  %v1638_v27 = vadd.f32 -1.4531521, %v1630_v44  ;;  %v2769_v53 = vpop.eup %2768 }
 0x891   : > { %v1688_v6 = vmul.f32 %v3308_v45, %v1680_v8  ;;  %v1674_v24 = vmul.f32 %v3316_v63, %v1666_v3  ;;  %v1651_v29 = vadd.f32 1.4214138, %v1643_v0  ;;  %v1660_v38 = vmul.f32 %v3331_v56, %v1652_v26  ;;  %v2771_v62 = vpop.eup %2770 }
 0x892   : > { %v1687_v10 = vmul.f32 %v3311_v52, %v1679_v4  ;;  %v1673_v14 = vmul.f32 %v3318_v20, %v1665_v31  ;;  %v1646_v43 = vmul.f32 %v3341_v2, %v1638_v27  ;;  %v1637_v50 = vadd.f32 -1.4531521, %v1629_v30  ;;  %v2773_v3 = vpop.eup %2772 }
 0x893   : > { %v1728_v17 = vmul.f32 %v2759_v54, %v1688_v6  ;;  %v1682_v45 = vadd.f32 0.2548296, %v1674_v24  ;;  %v1659_v19 = vmul.f32 %v3333_v49, %v1651_v29  ;;  %v1668_v16 = vadd.f32 -0.28449672, %v1660_v38  ;;  %v2775_v5 = vpop.eup %2774 }
 0x894   : > { %v1727_v21 = vmul.f32 %v2765_v47, %v1687_v10  ;;  %v1681_v23 = vadd.f32 0.2548296, %v1673_v14  ;;  %v1654_v59 = vadd.f32 1.4214138, %v1646_v43  ;;  %v1645_v8 = vmul.f32 %v3349_v32, %v1637_v50 }
 0x895   : > { %v1736_v40 = vsub.f32 1.0, %v1728_v17  ;;  %v1690_v52 = vmul.f32 %v3316_v63, %v1682_v45  ;;  %v1667_v61 = vadd.f32 -0.28449672, %v1659_v19  ;;  %v2777_v17 = vpop.eup %2776 }
 0x896   : > { %v1735_v46 = vsub.f32 1.0, %v1727_v21  ;;  %v1689_v48 = vmul.f32 %v3318_v20, %v1681_v23  ;;  %v1676_v20 = vmul.f32 %v3331_v56, %v1668_v16  ;;  %v1662_v31 = vmul.f32 %v3341_v2, %v1654_v59 }
 0x897   : > { %v1752_v51 = vsub.f32 0.0, %v1736_v40  ;;  %v1730_v54 = vmul.f32 %v2767_v41, %v1690_v52  ;;  %v1675_v44 = vmul.f32 %v3333_v49, %v1667_v61  ;;  %v1653_v27 = vadd.f32 1.4214138, %v1645_v8 }
 0x898   : > { %v1751_v60 = vsub.f32 0.0, %v1735_v46  ;;  %v1729_v63 = vmul.f32 %v2769_v53, %v1689_v48  ;;  %v1684_v0 = vadd.f32 0.2548296, %v1676_v20  ;;  %v1670_v47 = vadd.f32 -0.28449672, %v1662_v31 }
 0x899   : > { %v1760_v28 = vsel %vm1744_vm15, %v1752_v51, %v1736_v40  ;;  %v1738_v4 = vsub.f32 1.0, %v1730_v54  ;;  %v1683_v26 = vadd.f32 0.2548296, %v1675_v44  ;;  %v1571_v61 = vmul.f32 0.5, %v3282_v18 }
 0x89a   : > { %v1768_v6 = vadd.f32 1.0, %v1760_v28  ;;  %v1759_v24 = vsel %vm1743_vm1, %v1751_v60, %v1735_v46  ;;  %v1737_v9 = vsub.f32 1.0, %v1729_v63  ;;  %v1692_v58 = vmul.f32 %v3331_v56, %v1684_v0 }
 0x89b   : > { %v1767_v10 = vadd.f32 1.0, %v1759_v24  ;;  %v1754_v14 = vsub.f32 0.0, %v1738_v4  ;;  %v1678_v29 = vmul.f32 %v3341_v2, %v1670_v47  ;;  %v1691_v40 = vmul.f32 %v3333_v49, %v1683_v26 }
 0x89c   : > { %v1776_v13 = vmul.f32 %v1768_v6, %v3293_v37  ;;  %v1753_v45 = vsub.f32 0.0, %v1737_v9  ;;  %v1661_v37 = vmul.f32 %v3349_v32, %v1653_v27  ;;  %v1732_v43 = vmul.f32 %v2771_v62, %v1692_v58 }
 0x89d   : > { %v1775_v21 = vmul.f32 %v1767_v10, %v3295_v36  ;;  %v1762_v23 = vsel %vm1746_vm2, %v1754_v14, %v1738_v4  ;;  %v1686_v53 = vadd.f32 0.2548296, %v1678_v29  ;;  %v1731_v11 = vmul.f32 %v2773_v3, %v1691_v40  ;;  %v2401_v10 = vld [vmem:[%s3505_s5 + $0x4] sm:$0xf]  ;;  %v2406_v40 = vld [vmem:[%s3507_s7 + $0x1] ss:$0 sm:$0xff] }
 0x89e   : > { %v1770_v30 = vadd.f32 1.0, %v1762_v23  ;;  %v1761_v41 = vsel %vm1745_vm4, %v1753_v45, %v1737_v9  ;;  %v1669_v46 = vadd.f32 -0.28449672, %v1661_v37  ;;  %v1740_v48 = vsub.f32 1.0, %v1732_v43 }
 0x89f   : > { %v2658_v52 = vpack.c.bf16 %v1776_v13, %v1775_v21  ;;  %v1769_v38 = vadd.f32 1.0, %v1761_v41  ;;  %v1694_v19 = vmul.f32 %v3341_v2, %v1686_v53  ;;  %v1739_v1 = vsub.f32 1.0, %v1731_v11  ;;  %v2408_v21 = vld [vmem:[%s3509_s9 + $0x10] sm:$0xff]  ;;  %v2413_v53 = vld [vmem:[%s3511_s11 + $0x40] sm:$0xff] }
 0x8a0   : > { %v1778_v36 = vmul.f32 %v1770_v30, %v3300_v57  ;;  %v1677_v50 = vmul.f32 %v3349_v32, %v1669_v46  ;;  %v1756_v51 = vsub.f32 0.0, %v1740_v48  ;;  %v1572_v2 = vmul.f32 0.5, %v3280_v15  ;;  %v2415_v46 = vld [vmem:[%s3511_s11 + $0x50] sm:$0xff] }
 0x8a1   : > { %v1777_v56 = vmul.f32 %v1769_v38, %v3328_v22  ;;  %2659 = vmatpush3.bf16.msra.mxu0 %v2658_v52  ;;  %v1734_v54 = vmul.f32 %v2775_v5, %v1694_v19  ;;  %v1755_v62 = vsub.f32 0.0, %v1739_v1  ;;  %v1574_v6 = vmul.f32 0.5, %v3291_v55  ;;  %v1790_v55 = vpop.permute.xlu1 %1789  ;;  %v2407_v52 = vld [vmem:[%s3508_s8 + $0x1] ss:$0 sm:$0xff] }
 0x8a2   : > { %2660 = vmatprep.subr.bf16.mxu0 %v2795_v34  ;;  %v1685_v57 = vadd.f32 0.2548296, %v1677_v50  ;;  %v1764_v16 = vsel %vm1748_vm5, %v1756_v51, %v1740_v48  ;;  %v1573_v24 = vmul.f32 0.5, %v3298_v33  ;;  %v2417_v19 = vld [vmem:[%s3511_s11 + $0x60] sm:$0xff]  ;;  %v2420_v51 = vld [vmem:[%s3511_s11 + $0x78] sm:$0xff] }
 0x8a3   : > { %v2661_v49 = vpack.c.bf16 %v1778_v36, %v1777_v56  ;;  %v1742_v22 = vsub.f32 1.0, %v1734_v54  ;;  %v1772_v59 = vadd.f32 1.0, %v1764_v16  ;;  %v1763_v60 = vsel %vm1747_vm6, %v1755_v62, %v1739_v1  ;;  %v2414_v36 = vld [vmem:[%s3511_s11 + $0x48] sm:$0xff]  ;;  %v2416_v56 = vld [vmem:[%s3511_s11 + $0x58] sm:$0xff]  ;;  %v2411_v62 = vld [vmem:[%s3510_s10 + $0x1] ss:$0 sm:$0xff] }
 0x8a4   : > { %v1693_v63 = vmul.f32 %v3349_v32, %v1685_v57  ;;  %v1771_v8 = vadd.f32 1.0, %v1763_v60  ;;  %v2673_v11 = vpack.c.bf16 %v2414_v36, %v2413_v53  ;;  %v2676_v48 = vpack.c.bf16 %v2416_v56, %v2415_v46  ;;  %v2418_v1 = vld [vmem:[%s3511_s11 + $0x68] sm:$0xff]  ;;  %v2210_v53 = vld [vmem:[%s3517_s17] sm:$0xff] }
 0x8a5   : > { %2662 = vmatpush3.bf16.msra.mxu0 %v2661_v49  ;;  %v1758_v3 = vsub.f32 0.0, %v1742_v22  ;;  %v1780_v7 = vmul.f32 %v1772_v59, %v1572_v2  ;;  %v2679_v50 = vpack.c.bf16 %v2418_v1, %v2417_v19  ;;  %v2419_v49 = vld [vmem:[%s3511_s11 + $0x70] sm:$0xff]  ;;  %v2211_v36 = vld [vmem:[%s3517_s17 + $0x8] sm:$0xff]  ;;  %v2426_v46 = vld [vmem:[%s3516_s16] ss:$0 sm:$0xff] }
 0x8a6   : > { %2663 = vmatprep.subr.bf16.mxu0 %v2795_v34  ;;  %v1733_v28 = vmul.f32 %v2777_v17, %v1693_v63  ;;  %v1779_v4 = vmul.f32 %v1771_v8, %v1571_v61  ;;  %v2682_v54 = vpack.c.bf16 %v2420_v51, %v2419_v49  ;;  %v2428_v1 = vld [vmem:[%s3518_s18] ss:$0 sm:$0xff] }
 0x8a7   : > { %v1766_v39 = vsel %vm1750_vm7, %v1758_v3, %v1742_v22 }
 0x8a8   : > { %v1741_v20 = vsub.f32 1.0, %v1733_v28  ;;  %v2664_v31 = vpack.c.bf16 %v1780_v7, %v1779_v4  ;;  %v1774_v5 = vadd.f32 1.0, %v1766_v39 }
 0x8aa   : > { %v1757_v15 = vsub.f32 0.0, %v1741_v20  ;;  %2665 = vmatpush3.bf16.msra.mxu0 %v2664_v31  ;;  %v1782_v18 = vmul.f32 %v1774_v5, %v1574_v6 }
 0x8ab   : > { %2666 = vmatprep.subr.bf16.mxu0 %v2795_v34 }
 0x8ac   : > { %v1765_v32 = vsel %vm1749_vm8, %v1757_v15, %v1741_v20 }
 0x8ad   : > { %v1773_v9 = vadd.f32 1.0, %v1765_v32 }
 0x8af   : > { %v1781_v42 = vmul.f32 %v1773_v9, %v1573_v24 }
 0x8b1   : > { %v2667_v44 = vpack.c.bf16 %v1782_v18, %v1781_v42 }
 0x8b3   : > { %2668 = vmatpush3.bf16.msra.mxu0 %v2667_v44 }
 0x8b4   : > { %2687 = vmatprep.subr.bf16.mxu0 %v2795_v34 }
 0x8b6   : > { %2588 = vmatmul.mubr.msk.f32.vlgmr.msra.gmra.mrb[18].mxu0 %vm1043_vm12, %v2401_v10 }
 0x8b7   : > { %2627 = vmatprep.mubr.msk.f32.mxu0 %vm2796_vm3, %v2797_v35 }
 0x989   : > { %v1861_v25 = vpop.f32.mrb[18].mxu0 }
 0x98a   : > { %v1862_v14 = vadd.f32 %v1861_v25, %v1790_v55  ;;  %v2589_v0 = vpop.f32.mrb[19].mxu0  ;;  %v2422_v25 = vld [vmem:[%s3512_s12 + $0x1] ss:$0 sm:$0xff] }
 0x98c   : > { %v3404_v33 = vadd.f32 %v1862_v14, %v3198_v12  ;;  %v2409_v12 = vld [vmem:[%s3509_s9 + $0x18] sm:$0xff] }
 0x98d   : > { %v2670_v23 = vpack.c.bf16 %v2409_v12, %v2408_v21 }
 0x98e   : > { %v1870_v47 = vsel %vm601_vm0, %v3404_v33, 0.0 }
 0x98f   : > { %1871 = vadd.xlane.f32.xlu0 %v1870_v47  ;;  %2671 = vmatpush3.bf16.msra.mxu1 %v2670_v23  ;;  %v2129_v23 = vld [vmem:[%s3515_s15 + $0x8] sm:$0xff] }
 0x990   : > { %2672 = vmatprep.subr.bf16.mxu1 %v2795_v34 }
 0xa1c   : > { %v1872_v17 = vpop.xlane.xlu0 %1871 }
 0xa1d   : > { %v1873_v13 = vmul.f32 0.0625, %v1872_v17 }
 0xa1f   : > { %v1874_v45 = vsub.f32 %v3404_v33, %v1873_v13 }
 0xa21   : > { %v1875_v26 = vmul.f32 %v1874_v45, %v1874_v45 }
 0xa23   : > { %v1876_v27 = vsel %vm601_vm0, %v1875_v26, 0.0 }
 0xa24   : > { %1877 = vadd.xlane.f32.xlu1 %v1876_v27 }
 0xab1   : > { %v1878_v58 = vpop.xlane.xlu1 %1877 }
 0xab2   : > { %v1879_v29 = vmul.f32 0.0625, %v1878_v58 }
 0xab4   : > { %v1880_v30 = vadd.f32 1e-05, %v1879_v29 }
 0xab6   : > { %2778 = vrsqrt.f32 %v1880_v30 }
 0xac0   : > { %v2779_v41 = vpop.eup %2778 }
 0xac1   : > { %v1882_v37 = vmul.f32 %v2779_v41, %v1874_v45 }
 0xac3   : > { %v1889_v38 = vmul.f32 %v2406_v40, %v1882_v37  ;;  %v2424_v40 = vld [vmem:[%s3513_s13] ss:$0 sm:$0xff] }
 0xac5   : > { %v1896_v43 = vadd.f32 %v2407_v52, %v1889_v38  ;;  %v2425_v52 = vld [vmem:[%s3514_s14] ss:$0 sm:$0xff] }
 0xac7   : > { %2595 = vmatmul.mubr.msk.f32.vlgmr.msra.gmra.mrb[4].mxu1 %vm1156_vm13, %v1896_v43 }
 0xac8   : > { %2613 = vmatprep.mubr.msk.f32.mxu1 %vm2796_vm3, %v2797_v35  ;;  %2674 = vmatpush3.bf16.msra.mxu1 %v2673_v11  ;;  %v2688_v11 = vpack.c.bf16 %v2211_v36, %v2210_v53 }
 0xac9   : > { %2675 = vmatprep.subr.bf16.mxu1 %v2795_v34 }
 0xaca   : > { %2689 = vmatpush3.bf16.msra.mxu0 %v2688_v11 }
 0xacc   : > { %2677 = vmatpush3.bf16.msra.mxu1 %v2676_v48 }
 0xacd   : > { %2678 = vmatprep.subr.bf16.mxu1 %v2795_v34 }
 0xad0   : > { %2680 = vmatpush3.bf16.msra.mxu1 %v2679_v50 }
 0xad1   : > { %2681 = vmatprep.subr.bf16.mxu1 %v2795_v34 }
 0xad4   : > { %2683 = vmatpush3.bf16.msra.mxu1 %v2682_v54 }
 0xad5   : > { %2684 = vmatprep.subr.bf16.mxu1 %v2795_v34 }
 0xb9a   : > { %v1977_v57 = vpop.f32.mrb[4].mxu1 }
 0xb9b   : > { %v1978_v16 = vadd.f32 %v2411_v62, %v1977_v57  ;;  %v2596_v22 = vpop.f32.mrb[5].mxu1 }
 0xb9d   : > { %v1982_v2 = vmul.f32 0.70710677, %v1978_v16  ;;  %v1981_v44 = vmul.f32 0.5, %v1978_v16 }
 0xb9f   : > { %v1983_v59 = vand.u32 2147483647, %v1982_v2  ;;  %vm2003_vm9 = vcmp.lt.f32.partialorder %v1982_v2, 0.0 }
 0xba1   : > { %v1984_v60 = vmul.f32 0.3275911, %v1983_v59  ;;  %v1997_v61 = vsub.f32 0.0, %v1983_v59 }
 0xba3   : > { %v1985_v63 = vadd.f32 1.0, %v1984_v60  ;;  %v1998_v3 = vmul.f32 %v1997_v61, %v1983_v59 }
 0xba5   : > { %2780 = vrcp.f32 %v1985_v63  ;;  %v1999_v4 = vmul.f32 1.442695, %v1998_v3 }
 0xba7   : > { %2782 = vpow2.f32 %v1999_v4 }
 0xbaf   : > { %v2781_v8 = vpop.eup %2780 }
 0xbb0   : > { %v1988_v7 = vmul.f32 1.0614054, %v2781_v8 }
 0xbb1   : > { %v2783_v32 = vpop.eup %2782 }
 0xbb2   : > { %v1989_v28 = vadd.f32 -1.4531521, %v1988_v7 }
 0xbb4   : > { %v1990_v39 = vmul.f32 %v2781_v8, %v1989_v28 }
 0xbb6   : > { %v1991_v34 = vadd.f32 1.4214138, %v1990_v39 }
 0xbb8   : > { %v1992_v20 = vmul.f32 %v2781_v8, %v1991_v34 }
 0xbba   : > { %v1993_v31 = vadd.f32 -0.28449672, %v1992_v20 }
 0xbbc   : > { %v1994_v5 = vmul.f32 %v2781_v8, %v1993_v31 }
 0xbbe   : > { %v1995_v15 = vadd.f32 0.2548296, %v1994_v5 }
 0xbc0   : > { %v1996_v6 = vmul.f32 %v2781_v8, %v1995_v15 }
 0xbc2   : > { %v2001_v18 = vmul.f32 %v2783_v32, %v1996_v6 }
 0xbc4   : > { %v2002_v24 = vsub.f32 1.0, %v2001_v18 }
 0xbc6   : > { %v2004_v9 = vsub.f32 0.0, %v2002_v24 }
 0xbc8   : > { %v2005_v42 = vsel %vm2003_vm9, %v2004_v9, %v2002_v24 }
 0xbc9   : > { %v2006_v10 = vadd.f32 1.0, %v2005_v42 }
 0xbcb   : > { %v2007_v55 = vmul.f32 %v2006_v10, %v1981_v44 }
 0xbcd   : > { %2614 = vmatmul.mubr.msk.f32.vlgmr.msra.gmra.mrb[6].mxu1 %vm1043_vm12, %v2007_v55 }
 0xbce   : > { %2620 = vmatprep.mubr.msk.f32.mxu1 %vm2796_vm3, %v2797_v35  ;;  %v2128_v35 = vld [vmem:[%s3515_s15] sm:$0xff] }
 0xbcf   : > { %v2685_v58 = vpack.c.bf16 %v2129_v23, %v2128_v35 }
 0xbd1   : > { %2686 = vmatpush3.bf16.msra.mxu1 %v2685_v58 }
 0xca0   : > { %v2094_v14 = vpop.f32.mrb[6].mxu1 }
 0xca1   : > { %v2095_v0 = vadd.f32 %v2422_v25, %v2094_v14  ;;  %v2615_v47 = vpop.f32.mrb[7].mxu1 }
 0xca3   : > { %v2098_v17 = vadd.f32 %v2095_v0, %v3404_v33 }
 0xca5   : > { %v2101_v13 = vsel %vm601_vm0, %v2098_v17, 0.0 }
 0xca6   : > { %2102 = vadd.xlane.f32.xlu0 %v2101_v13 }
 0xd33   : > { %v2103_v45 = vpop.xlane.xlu0 %2102 }
 0xd34   : > { %v2104_v26 = vmul.f32 0.0625, %v2103_v45 }
 0xd36   : > { %v2105_v27 = vsub.f32 %v2098_v17, %v2104_v26 }
 0xd38   : > { %v2106_v21 = vmul.f32 %v2105_v27, %v2105_v27 }
 0xd3a   : > { %v2107_v12 = vsel %vm601_vm0, %v2106_v21, 0.0  ;;  %vm2292_vm0 = vcmask 388096  }
 0xd3b   : > { %2108 = vadd.xlane.f32.xlu0 %v2107_v12 }
 0xdc8   : > { %v2109_v33 = vpop.xlane.xlu0 %2108 }
 0xdc9   : > { %v2110_v29 = vmul.f32 0.0625, %v2109_v33 }
 0xdcb   : > { %v2111_v30 = vadd.f32 1e-05, %v2110_v29 }
 0xdcd   : > { %2784 = vrsqrt.f32 %v2111_v30 }
 0xdd7   : > { %v2785_v41 = vpop.eup %2784 }
 0xdd8   : > { %v2113_v37 = vmul.f32 %v2785_v41, %v2105_v27 }
 0xdda   : > { %v2120_v38 = vmul.f32 %v2424_v40, %v2113_v37 }
 0xddc   : > { %v2127_v43 = vadd.f32 %v2425_v52, %v2120_v38 }
 0xdde   : > { %2621 = vmatmul.mubr.msk.f32.vlgmr.msra.gmra.mrb[8].mxu1 %vm1156_vm13, %v2127_v43 }
 0xeb1   : > { %v2206_v56 = vpop.f32.mrb[8].mxu1 }
 0xeb2   : > { %v2207_v48 = vadd.f32 %v2426_v46, %v2206_v56  ;;  %v2622_v19 = vpop.f32.mrb[9].mxu1 }
 0xeb4   : > { %2628 = vmatmul.mubr.msk.f32.vlgmr.msra.gmra.mrb[20].mxu0 %vm1156_vm13, %v2207_v48 }
 0xf87   : > { %v2288_v50 = vpop.f32.mrb[20].mxu0 }
 0xf88   : > { %v2289_v49 = vadd.f32 %v2428_v1, %v2288_v50  ;;  %v2629_v51 = vpop.f32.mrb[21].mxu0 }
 0xf8a   : > { %2293 = vst.msk [vmem:[%s597_s29] sm:$0xf] %vm2292_vm0, %v2289_v49 }
 0xf8b PF: > { %s29_s0 = sadd.s32 1, %s2792_s0  }
 0xf8c   : > { %p26_p4 = scmp.ge.s32.totalorder %s29_s0, 4  }
 0xf8e   :  { %28 = sbr.rel (!%p26_p4) target bundleno = 5 (0x5), region = 138 }

// kernel: custom-call.8
= control target key start
LH: loop header
LB: loop body
LE: loop exit
PB: predicated region body
PF: predicated region fallthrough
CT: control target
= control target key end

     0   :  { %s126_s0 = inlined_call_operand.vmem [shape: f32[2,4,2,2], index: 0, kind: input, shape index: {}]   ;;  %s127_s1 = inlined_call_operand.vmem [shape: f32[2,4,2,2], index: 1, kind: input, shape index: {}]   ;;  %s128_s2 = inlined_call_operand.hbm [shape: c64[2,4,2,2], index: 2, kind: output, shape index: {}]  }
   0x1   :  { %s87_s11 = scalar_lea.hbm %s128_s2, 128 }
   0x2   :  { %4 = vsyncpa [#allocation0], 0  ;;  %s5_s14 = sshll.u32 %s126_s0, 4  ;;  %s6_s14 = int_to_ptr.vmem [resolvable:$true] %s5_s14 }
   0x3   :  { %s18_s15 = scalar_lea.vmem %s6_s14, 128  ;;  %p23_p1 = scmp.lt.s32.totalorder %s6_s14, %s6_s14 }
   0x4   :  { %p19_p0 = scmp.ne.s32.totalorder %s6_s14, %s18_s15  ;;  %p24_p2 = scmp.lt.s32.totalorder %s18_s15, %s18_s15 }
   0x6   :  { %p25_p3 = por %p24_p2, %p23_p1 }
   0x8   :  { %p26_p4 = pnand %p25_p3, %p19_p0 }
   0xa   :  { %29 = shalt.err (!%p26_p4)  }
   0xb   :  { %p31_p5 = scmp.ne.s32.totalorder %s128_s2, %s87_s11  ;;  %s32_s0 = scalar_lea.hbm %s128_s2, 256 }
   0xc   :  { %p33_p6 = scmp.lt.u32.totalorder %s32_s0, %s87_s11  ;;  %p34_p7 = scmp.lt.u32.totalorder %s87_s11, %s128_s2 }
   0xe   :  { %p35_p8 = por %p34_p7, %p33_p6 }
  0x10   :  { %p36_p9 = pnand %p35_p8, %p31_p5 }
  0x12   :  { %39 = shalt.err (!%p36_p9)  }
  0x13   :  { %8 = dma.vmem_to_hbm [thread:$0]  %s6_s14, 128, %s128_s2, [#allocation0] }
  0x14   :  { %65 = dma.done.wait [#allocation0], 128  }
  0x15   :  { %66 = vsyncadd [#allocation0], 4294967168 }
  0x16   :  { %10 = vsyncpa [#allocation0], 1 }
  0x17   :  { %11 = vsyncpa [#allocation1], 0  ;;  %s12_s28 = sshll.u32 %s127_s1, 4  ;;  %s13_s28 = int_to_ptr.vmem [resolvable:$true] %s12_s28 }
  0x18   :  { %s40_s29 = scalar_lea.vmem %s13_s28, 128  ;;  %p45_p11 = scmp.lt.s32.totalorder %s13_s28, %s13_s28 }
  0x19   :  { %p41_p10 = scmp.ne.s32.totalorder %s13_s28, %s40_s29  ;;  %p46_p12 = scmp.lt.s32.totalorder %s40_s29, %s40_s29 }
  0x1b   :  { %p47_p13 = por %p46_p12, %p45_p11 }
  0x1d   :  { %p48_p0 = pnand %p47_p13, %p41_p10 }
  0x1f   :  { %51 = shalt.err (!%p48_p0)  }
  0x20   :  { %p53_p1 = scmp.ne.s32.totalorder %s87_s11, %s32_s0  ;;  %p56_p2 = scmp.lt.u32.totalorder %s32_s0, %s32_s0 }
  0x22   :  { %p57_p3 = por %p56_p2, %p34_p7 }
  0x24   :  { %p59_p4 = por %p57_p3, %p33_p6 }
  0x26   :  { %p60_p5 = pnand %p59_p4, %p53_p1 }
  0x28   :  { %63 = shalt.err (!%p60_p5)  }
  0x29   :  { %15 = dma.vmem_to_hbm [thread:$0]  %s13_s28, 128, %s87_s11, [#allocation1] }
  0x2a   :  { %67 = dma.done.wait [#allocation1], 128  }
  0x2b   :  { %68 = vsyncadd [#allocation1], 4294967168 }
  0x2c   :  { %17 = vsyncpa [#allocation1], 1 }

</bundles_post_ra>
